<compile_context>
chip_gen: v7x
topology: tpu7x:2x2x1
jax: 0.10.0
libtpu: 0.0.40
codegen_flags: <defaults>
</compile_context>

<pallas_src>
import numpy as np
import jax
import jax.numpy as jnp
from jax import lax
from jax.experimental import pallas as pl
from jax.experimental.pallas import tpu as pltpu

K = 5                     # conv kernel size
H1 = 32                   # conv1 input spatial size
C1I, C1O = 3, 6
P1 = 14                   # pool1 output spatial size (width of conv2 input)
C2I, C2O = 6, 16
P2 = 5                    # pool2 output spatial size
F1, F2, F3 = 120, 84, 10

R1IMG = 32                # activation rows per image, stage 1 (conv1 / pool1)
R2IMG = 16                # activation rows per image, stage 2 (14 valid + 2 pad rows)
B_BLK = 8                 # images per grid step  (M = 256 / 128 rows per conv matmul)


# ----------------------------- fused Pallas kernel ----------------------------- #

def lenet_fused_kernel(x_ref,
                       a1_ref, b1_ref, pc1_ref, pr1_ref,
                       a2_ref, b2_ref, pc2_ref,
                       eh2_ref, w1_ref, fb1_ref, w2_ref, fb2_ref, w3_ref, fb3_ref,
                       o_ref):
    bf16, f32 = jnp.bfloat16, jnp.float32

    def mm(a, b):
        # bf16 operands (native MXU path on v5e/v6e/v7x), f32 accumulation.
        return jnp.dot(a.astype(bf16), b.astype(bf16), preferred_element_type=f32)

    def shift_up(v, k):
        # rows: out[r] = v[r + k].  Wrap-around only contaminates per-image padding rows
        # (conv1: h>=28, conv2: h>=10) which are never selected downstream.
        return v if k == 0 else pltpu.roll(v, shift=v.shape[0] - k, axis=0)

    x = x_ref[...]                                              # (B_BLK*32, 96) f32

    # conv1 + bias + ReLU   (taps: sublane roll + banded lane-side matmul)
    o1 = mm(x, a1_ref[0])
    for kh in range(1, K):
        o1 = o1 + mm(shift_up(x, kh), a1_ref[kh])
    o1 = jnp.maximum(o1 + b1_ref[...], 0.0)                     # (B_BLK*32, 192)

    # pool1: width pairs via 0/1 lane-selection matmuls + max, height pairs via roll+max,
    # then one even-row decimation matmul -> 16 padded rows per image.
    t1 = jnp.maximum(mm(o1, pc1_ref[0]), mm(o1, pc1_ref[1]))    # (B_BLK*32, 84)
    t1 = jnp.maximum(t1, shift_up(t1, 1))
    p1 = mm(pr1_ref[...], t1)                                   # (B_BLK*16, 84)

    # conv2 + bias + ReLU
    o2 = mm(p1, a2_ref[0])
    for kh in range(1, K):
        o2 = o2 + mm(shift_up(p1, kh), a2_ref[kh])
    o2 = jnp.maximum(o2 + b2_ref[...], 0.0)                     # (B_BLK*16, 224)

    # pool2: lane selection + height roll+max; the row decimation is folded into the
    # per-image row extraction of fc1 below (valid data sits at per-image rows 0,2,4,6,8).
    t2 = jnp.maximum(mm(o2, pc2_ref[0]), mm(o2, pc2_ref[1]))    # (B_BLK*16, 80)
    t2 = jnp.maximum(t2, shift_up(t2, 1))

    # fc1 (PyTorch NCHW flatten folded into per-row weight blocks) + ReLU
    h = mm(mm(eh2_ref[0], t2), w1_ref[0])                       # (B_BLK, 120)
    for h3 in range(1, P2):
        h = h + mm(mm(eh2_ref[h3], t2), w1_ref[h3])
    h = jnp.maximum(h + fb1_ref[...], 0.0)

    # fc2 + ReLU, fc3
    h = jnp.maximum(mm(h, w2_ref[...]) + fb2_ref[...], 0.0)     # (B_BLK, 84)
    o_ref[...] = mm(h, w3_ref[...]) + fb3_ref[...]              # (B_BLK, 10)


# --------------------- one-time structured-parameter preparation ----------------- #

def build_structured_params(p, b_blk=B_BLK):
    c1w = np.asarray(p["conv1_w"], np.float32); c1b = np.asarray(p["conv1_b"], np.float32)
    c2w = np.asarray(p["conv2_w"], np.float32); c2b = np.asarray(p["conv2_b"], np.float32)
    f1w = np.asarray(p["fc1_w"], np.float32);  f1b = np.asarray(p["fc1_b"], np.float32)
    f2w = np.asarray(p["fc2_w"], np.float32);  f2b = np.asarray(p["fc2_b"], np.float32)
    f3w = np.asarray(p["fc3_w"], np.float32);  f3b = np.asarray(p["fc3_b"], np.float32)

    def band(w, width, cin, cout):
        # w: (cout, cin, K, K) torch conv weight -> banded tap matrix (K, width*cin, width*cout)
        a = np.zeros((K, width * cin, width * cout), np.float32)
        for kh in range(K):
            for ow in range(width - K + 1):
                for kw in range(K):
                    wp = ow + kw
                    a[kh, wp * cin:(wp + 1) * cin, ow * cout:(ow + 1) * cout] = w[:, :, kh, kw].T
        return a

    def pool_cols(n_out, n_in_w, c):
        m = np.zeros((2, n_in_w * c, n_out * c), np.float32)
        for dw in range(2):
            for w_ in range(n_out):
                for co in range(c):
                    m[dw, (2 * w_ + dw) * c + co, w_ * c + co] = 1.0
        return m

    # even-row decimation after the height max: per image 32 rows -> 16 rows (14 valid + 2 zero)
    PR1 = np.zeros((b_blk * R2IMG, b_blk * R1IMG), np.float32)
    for i in range(b_blk):
        for j in range(P1):
            PR1[i * R2IMG + j, i * R1IMG + 2 * j] = 1.0

    # fc1 row extraction (fuses the pool2 row decimation): row 2*h3 of each image's 16-row block
    EH2 = np.zeros((P2, b_blk, b_blk * R2IMG), np.float32)
    for h3 in range(P2):
        for i in range(b_blk):
            EH2[h3, i, i * R2IMG + 2 * h3] = 1.0

    # fold the NCHW flatten (index = c*25 + h*5 + w) into fc1's weights
    W1 = np.zeros((P2, P2 * C2O, F1), np.float32)
    for h3 in range(P2):
        for w3 in range(P2):
            for c in range(C2O):
                W1[h3, w3 * C2O + c, :] = f1w[:, c * (P2 * P2) + h3 * P2 + w3]

    bf = jnp.bfloat16
    kp = {
        "A1":  jnp.asarray(band(c1w, H1, C1I, C1O), bf),    # (5, 96, 192)
        "b1":  jnp.asarray(np.tile(c1b, H1)[None, :]),       # (1, 192)  f32
        "PC1": jnp.asarray(pool_cols(P1, H1, C1O), bf),       # (2, 192, 84)
        "PR1": jnp.asarray(PR1, bf),                          # (b*16, b*32)
        "A2":  jnp.asarray(band(c2w, P1, C2I, C2O), bf),      # (5, 84, 224)
        "b2":  jnp.asarray(np.tile(c2b, P1)[None, :]),        # (1, 224)  f32
        "PC2": jnp.asarray(pool_cols(P2, P1, C2O), bf),        # (2, 224, 80)
        "EH2": jnp.asarray(EH2, bf),                          # (5, b, b*16)
        "W1":  jnp.asarray(W1, bf),                           # (5, 80, 120)
        "fb1": jnp.asarray(f1b[None, :]),                     # (1, 120)  f32
        "W2":  jnp.asarray(f2w.T.copy(), bf),                 # (120, 84)
        "fb2": jnp.asarray(f2b[None, :]),
        "W3":  jnp.asarray(f3w.T.copy(), bf),                 # (84, 10)
        "fb3": jnp.asarray(f3b[None, :]),
    }
    return kp


# ----------------------------- forward pass wrapper ----------------------------- #

def lenet_forward(x_nchw, kp):
    B = x_nchw.shape[0]
    Bp = ((B + B_BLK - 1) // B_BLK) * B_BLK
    x = x_nchw.astype(jnp.float32)
    if Bp != B:
        x = jnp.pad(x, ((0, Bp - B), (0, 0), (0, 0), (0, 0)))
    # rows = b*32 + h, lanes = w*3 + c  (lane-dense activation layout)
    x2 = jnp.transpose(x, (0, 2, 3, 1)).reshape(Bp * R1IMG, H1 * C1I)

    weight_keys = ("A1", "b1", "PC1", "PR1", "A2", "b2", "PC2",
                   "EH2", "W1", "fb1", "W2", "fb2", "W3", "fb3")
    weights = [kp[k] for k in weight_keys]

    def full_spec(a):
        n = a.ndim
        return pl.BlockSpec(a.shape, lambda b, n=n: (0,) * n)

    in_specs = [pl.BlockSpec((B_BLK * R1IMG, H1 * C1I), lambda b: (b, 0))]
    in_specs += [full_spec(w) for w in weights]

    mm2 = lambda m, k, n: 2 * m * k * n
    RB1, RB2 = B_BLK * R1IMG, B_BLK * R2IMG
    per_blk = (K * mm2(RB1, H1 * C1I, H1 * C1O)
               + 2 * mm2(RB1, H1 * C1O, P1 * C1O)
               + mm2(RB2, RB1, P1 * C1O)
               + K * mm2(RB2, P1 * C2I, P1 * C2O)
               + 2 * mm2(RB2, P1 * C2O, P2 * C2O)
               + P2 * (mm2(B_BLK, RB2, P2 * C2O) + mm2(B_BLK, P2 * C2O, F1))
               + mm2(B_BLK, F1, F2) + mm2(B_BLK, F2, F3))
    n_blocks = Bp // B_BLK
    bytes_accessed = (x2.size * 4
                      + sum(int(w.size) * w.dtype.itemsize for w in weights)
                      + Bp * F3 * 4)

    out = pl.pallas_call(
        lenet_fused_kernel,
        out_shape=jax.ShapeDtypeStruct((Bp, F3), jnp.float32),
        grid=(n_blocks,),
        in_specs=in_specs,
        out_specs=pl.BlockSpec((B_BLK, F3), lambda b: (b, 0)),
        compiler_params=pltpu.CompilerParams(dimension_semantics=("parallel",)),
        cost_estimate=pl.CostEstimate(flops=n_blocks * per_blk, transcendentals=0,
                                      bytes_accessed=int(bytes_accessed)),
    )(x2, *weights)
    return out[:B]


# ------------------------------ pure-JAX reference ------------------------------ #

def lenet_reference(x_nchw, params):
    x = x_nchw.astype(jnp.float32)

    def conv(z, w, b):
        y = lax.conv_general_dilated(z, w, (1, 1), "VALID",
                                     dimension_numbers=("NCHW", "OIHW", "NCHW"),
                                     precision=lax.Precision.HIGHEST)
        return y + b.reshape(1, -1, 1, 1)

    def pool(z):
        return lax.reduce_window(z, -jnp.inf, lax.max, (1, 1, 2, 2), (1, 1, 2, 2), "VALID")

    y = pool(jnp.maximum(conv(x, params["conv1_w"], params["conv1_b"]), 0.0))
    y = pool(jnp.maximum(conv(y, params["conv2_w"], params["conv2_b"]), 0.0))
    y = y.reshape(y.shape[0], -1)
    y = jnp.maximum(y @ params["fc1_w"].T + params["fc1_b"], 0.0)
    y = jnp.maximum(y @ params["fc2_w"].T + params["fc2_b"], 0.0)
    return y @ params["fc3_w"].T + params["fc3_b"]


# ------------------------------------- main ------------------------------------- #

if __name__ == "__main__":
    key = jax.random.PRNGKey(0)
    ks = jax.random.split(key, 11)

    def norm(k, shape, scale=0.1):
        return scale * jax.random.normal(k, shape, dtype=jnp.float32)

    # PyTorch-layout parameters: conv (Cout, Cin, KH, KW), fc (out, in)
    params = {
        "conv1_w": norm(ks[0], (6, 3, 5, 5)),
        "conv1_b": norm(ks[1], (6,)),
        "conv2_w": norm(ks[2], (16, 6, 5, 5)),
        "conv2_b": norm(ks[3], (16,)),
        "fc1_w":   norm(ks[4], (120, 400)),
        "fc1_b":   norm(ks[5], (120,)),
        "fc2_w":   norm(ks[6], (84, 120)),
        "fc2_b":   norm(ks[7], (84,)),
        "fc3_w":   norm(ks[8], (10, 84)),
        "fc3_b":   norm(ks[9], (10,)),
    }

    # CIFAR-shaped input (fc1's 16*5*5 forces 32x32 spatial).  Batch 16 -> two B_BLK=8 grid
    # steps, so v7x's 2 TensorCores both get a full block.
    B = 16
    x = jax.random.normal(ks[10], (B, 3, 32, 32), dtype=jnp.float32)

    kp = build_structured_params(params, B_BLK)
    fwd = jax.jit(lenet_forward)

    out = jax.block_until_ready(fwd(x, kp))
    assert out.shape == (B, 10), out.shape

    ref = jax.block_until_ready(lenet_reference(x, params))
    # bf16 MXU operands with f32 accumulation -> slightly looser tolerance vs. the f32 reference
    np.testing.assert_allclose(np.asarray(out), np.asarray(ref), rtol=5e-2, atol=5e-2)

    print("KERNEL_OK")
</pallas_src>

<mosaic_0001>
module attributes {stable_mosaic.version = 11 : i64} {
  func.func @lenet_fused_kernel(%arg0: i32, %arg1: memref<256x96xf32, #tpu.memory_space<vmem>>, %arg2: memref<5x96x192xbf16, #tpu.memory_space<vmem>>, %arg3: memref<1x192xf32, #tpu.memory_space<vmem>>, %arg4: memref<2x192x84xbf16, #tpu.memory_space<vmem>>, %arg5: memref<128x256xbf16, #tpu.memory_space<vmem>>, %arg6: memref<5x84x224xbf16, #tpu.memory_space<vmem>>, %arg7: memref<1x224xf32, #tpu.memory_space<vmem>>, %arg8: memref<2x224x80xbf16, #tpu.memory_space<vmem>>, %arg9: memref<5x8x128xbf16, #tpu.memory_space<vmem>>, %arg10: memref<5x80x120xbf16, #tpu.memory_space<vmem>>, %arg11: memref<1x120xf32, #tpu.memory_space<vmem>>, %arg12: memref<120x84xbf16, #tpu.memory_space<vmem>>, %arg13: memref<1x84xf32, #tpu.memory_space<vmem>>, %arg14: memref<84x10xbf16, #tpu.memory_space<vmem>>, %arg15: memref<1x10xf32, #tpu.memory_space<vmem>>, %arg16: memref<8x10xf32, #tpu.memory_space<vmem>>) attributes {dimension_semantics = [#tpu.dimension_semantics<parallel>], iteration_bounds = array<i64: 2>, scalar_prefetch = 0 : i64, scratch_operands = 0 : i64, tpu.core_type = #tpu.core_type<tc>, window_params = [{transform_indices = @transform_0, window_bounds = array<i64: 256, 96>}, {pipeline_mode = #tpu.pipeline_mode<synchronous>, transform_indices = @transform_1, window_bounds = array<i64: 5, 96, 192>}, {pipeline_mode = #tpu.pipeline_mode<synchronous>, transform_indices = @transform_2, window_bounds = array<i64: 1, 192>}, {pipeline_mode = #tpu.pipeline_mode<synchronous>, transform_indices = @transform_3, window_bounds = array<i64: 2, 192, 84>}, {pipeline_mode = #tpu.pipeline_mode<synchronous>, transform_indices = @transform_4, window_bounds = array<i64: 128, 256>}, {pipeline_mode = #tpu.pipeline_mode<synchronous>, transform_indices = @transform_5, window_bounds = array<i64: 5, 84, 224>}, {pipeline_mode = #tpu.pipeline_mode<synchronous>, transform_indices = @transform_6, window_bounds = array<i64: 1, 224>}, {pipeline_mode = #tpu.pipeline_mode<synchronous>, transform_indices = @transform_7, window_bounds = array<i64: 2, 224, 80>}, {pipeline_mode = #tpu.pipeline_mode<synchronous>, transform_indices = @transform_8, window_bounds = array<i64: 5, 8, 128>}, {pipeline_mode = #tpu.pipeline_mode<synchronous>, transform_indices = @transform_9, window_bounds = array<i64: 5, 80, 120>}, {pipeline_mode = #tpu.pipeline_mode<synchronous>, transform_indices = @transform_10, window_bounds = array<i64: 1, 120>}, {pipeline_mode = #tpu.pipeline_mode<synchronous>, transform_indices = @transform_11, window_bounds = array<i64: 120, 84>}, {pipeline_mode = #tpu.pipeline_mode<synchronous>, transform_indices = @transform_12, window_bounds = array<i64: 1, 84>}, {pipeline_mode = #tpu.pipeline_mode<synchronous>, transform_indices = @transform_13, window_bounds = array<i64: 84, 10>}, {pipeline_mode = #tpu.pipeline_mode<synchronous>, transform_indices = @transform_14, window_bounds = array<i64: 1, 10>}, {transform_indices = @transform_15, window_bounds = array<i64: 8, 10>}]} {
    %c0 = arith.constant 0 : index
    %c0_0 = arith.constant 0 : index
    %0 = vector.load %arg1[%c0, %c0_0] : memref<256x96xf32, #tpu.memory_space<vmem>>, vector<256x96xf32>
    %c0_1 = arith.constant 0 : index
    %c0_2 = arith.constant 0 : index
    %c0_3 = arith.constant 0 : index
    %1 = vector.load %arg2[%c0_1, %c0_2, %c0_3] : memref<5x96x192xbf16, #tpu.memory_space<vmem>>, vector<1x96x192xbf16>
    %2 = vector.shape_cast %1 : vector<1x96x192xbf16> to vector<96x192xbf16>
    %3 = arith.truncf %0 : vector<256x96xf32> to vector<256x96xbf16>
    %cst = arith.constant dense<0.000000e+00> : vector<256x192xf32>
    %4 = tpu.matmul %3, %2, %cst {dimension_numbers = #tpu.dot_dimension_numbers<[1], [0], [0], [1], [0, 0, 1, 1], [], []>} : vector<256x96xbf16>, vector<96x192xbf16>, vector<256x192xf32> -> vector<256x192xf32>
    %c255_i32 = arith.constant 255 : i32
    %5 = tpu.dynamic_rotate %0 by %c255_i32 dim 0 : vector<256x96xf32>, i32 -> vector<256x96xf32>
    %c1 = arith.constant 1 : index
    %c0_4 = arith.constant 0 : index
    %c0_5 = arith.constant 0 : index
    %6 = vector.load %arg2[%c1, %c0_4, %c0_5] : memref<5x96x192xbf16, #tpu.memory_space<vmem>>, vector<1x96x192xbf16>
    %7 = vector.shape_cast %6 : vector<1x96x192xbf16> to vector<96x192xbf16>
    %8 = arith.truncf %5 : vector<256x96xf32> to vector<256x96xbf16>
    %cst_6 = arith.constant dense<0.000000e+00> : vector<256x192xf32>
    %9 = tpu.matmul %8, %7, %cst_6 {dimension_numbers = #tpu.dot_dimension_numbers<[1], [0], [0], [1], [0, 0, 1, 1], [], []>} : vector<256x96xbf16>, vector<96x192xbf16>, vector<256x192xf32> -> vector<256x192xf32>
    %10 = arith.addf %4, %9 : vector<256x192xf32>
    %c254_i32 = arith.constant 254 : i32
    %11 = tpu.dynamic_rotate %0 by %c254_i32 dim 0 : vector<256x96xf32>, i32 -> vector<256x96xf32>
    %c2 = arith.constant 2 : index
    %c0_7 = arith.constant 0 : index
    %c0_8 = arith.constant 0 : index
    %12 = vector.load %arg2[%c2, %c0_7, %c0_8] : memref<5x96x192xbf16, #tpu.memory_space<vmem>>, vector<1x96x192xbf16>
    %13 = vector.shape_cast %12 : vector<1x96x192xbf16> to vector<96x192xbf16>
    %14 = arith.truncf %11 : vector<256x96xf32> to vector<256x96xbf16>
    %cst_9 = arith.constant dense<0.000000e+00> : vector<256x192xf32>
    %15 = tpu.matmul %14, %13, %cst_9 {dimension_numbers = #tpu.dot_dimension_numbers<[1], [0], [0], [1], [0, 0, 1, 1], [], []>} : vector<256x96xbf16>, vector<96x192xbf16>, vector<256x192xf32> -> vector<256x192xf32>
    %16 = arith.addf %10, %15 : vector<256x192xf32>
    %c253_i32 = arith.constant 253 : i32
    %17 = tpu.dynamic_rotate %0 by %c253_i32 dim 0 : vector<256x96xf32>, i32 -> vector<256x96xf32>
    %c3 = arith.constant 3 : index
    %c0_10 = arith.constant 0 : index
    %c0_11 = arith.constant 0 : index
    %18 = vector.load %arg2[%c3, %c0_10, %c0_11] : memref<5x96x192xbf16, #tpu.memory_space<vmem>>, vector<1x96x192xbf16>
    %19 = vector.shape_cast %18 : vector<1x96x192xbf16> to vector<96x192xbf16>
    %20 = arith.truncf %17 : vector<256x96xf32> to vector<256x96xbf16>
    %cst_12 = arith.constant dense<0.000000e+00> : vector<256x192xf32>
    %21 = tpu.matmul %20, %19, %cst_12 {dimension_numbers = #tpu.dot_dimension_numbers<[1], [0], [0], [1], [0, 0, 1, 1], [], []>} : vector<256x96xbf16>, vector<96x192xbf16>, vector<256x192xf32> -> vector<256x192xf32>
    %22 = arith.addf %16, %21 : vector<256x192xf32>
    %c252_i32 = arith.constant 252 : i32
    %23 = tpu.dynamic_rotate %0 by %c252_i32 dim 0 : vector<256x96xf32>, i32 -> vector<256x96xf32>
    %c4 = arith.constant 4 : index
    %c0_13 = arith.constant 0 : index
    %c0_14 = arith.constant 0 : index
    %24 = vector.load %arg2[%c4, %c0_13, %c0_14] : memref<5x96x192xbf16, #tpu.memory_space<vmem>>, vector<1x96x192xbf16>
    %25 = vector.shape_cast %24 : vector<1x96x192xbf16> to vector<96x192xbf16>
    %26 = arith.truncf %23 : vector<256x96xf32> to vector<256x96xbf16>
    %cst_15 = arith.constant dense<0.000000e+00> : vector<256x192xf32>
    %27 = tpu.matmul %26, %25, %cst_15 {dimension_numbers = #tpu.dot_dimension_numbers<[1], [0], [0], [1], [0, 0, 1, 1], [], []>} : vector<256x96xbf16>, vector<96x192xbf16>, vector<256x192xf32> -> vector<256x192xf32>
    %28 = arith.addf %22, %27 : vector<256x192xf32>
    %c0_16 = arith.constant 0 : index
    %c0_17 = arith.constant 0 : index
    %29 = vector.load %arg3[%c0_16, %c0_17] : memref<1x192xf32, #tpu.memory_space<vmem>>, vector<1x192xf32>
    %30 = vector.broadcast %29 : vector<1x192xf32> to vector<256x192xf32>
    %31 = arith.addf %28, %30 : vector<256x192xf32>
    %cst_18 = arith.constant 0.000000e+00 : f32
    %32 = vector.broadcast %cst_18 : f32 to vector<256x192xf32>
    %33 = arith.maximumf %31, %32 : vector<256x192xf32>
    %c0_19 = arith.constant 0 : index
    %c0_20 = arith.constant 0 : index
    %c0_21 = arith.constant 0 : index
    %34 = vector.load %arg4[%c0_19, %c0_20, %c0_21] : memref<2x192x84xbf16, #tpu.memory_space<vmem>>, vector<1x192x84xbf16>
    %35 = vector.shape_cast %34 : vector<1x192x84xbf16> to vector<192x84xbf16>
    %36 = arith.truncf %33 : vector<256x192xf32> to vector<256x192xbf16>
    %cst_22 = arith.constant dense<0.000000e+00> : vector<256x84xf32>
    %37 = tpu.matmul %36, %35, %cst_22 {dimension_numbers = #tpu.dot_dimension_numbers<[1], [0], [0], [1], [0, 0, 1, 1], [], []>} : vector<256x192xbf16>, vector<192x84xbf16>, vector<256x84xf32> -> vector<256x84xf32>
    %c1_23 = arith.constant 1 : index
    %c0_24 = arith.constant 0 : index
    %c0_25 = arith.constant 0 : index
    %38 = vector.load %arg4[%c1_23, %c0_24, %c0_25] : memref<2x192x84xbf16, #tpu.memory_space<vmem>>, vector<1x192x84xbf16>
    %39 = vector.shape_cast %38 : vector<1x192x84xbf16> to vector<192x84xbf16>
    %40 = arith.truncf %33 : vector<256x192xf32> to vector<256x192xbf16>
    %cst_26 = arith.constant dense<0.000000e+00> : vector<256x84xf32>
    %41 = tpu.matmul %40, %39, %cst_26 {dimension_numbers = #tpu.dot_dimension_numbers<[1], [0], [0], [1], [0, 0, 1, 1], [], []>} : vector<256x192xbf16>, vector<192x84xbf16>, vector<256x84xf32> -> vector<256x84xf32>
    %42 = arith.maximumf %37, %41 : vector<256x84xf32>
    %c255_i32_27 = arith.constant 255 : i32
    %43 = tpu.dynamic_rotate %42 by %c255_i32_27 dim 0 : vector<256x84xf32>, i32 -> vector<256x84xf32>
    %44 = arith.maximumf %42, %43 : vector<256x84xf32>
    %c0_28 = arith.constant 0 : index
    %c0_29 = arith.constant 0 : index
    %45 = vector.load %arg5[%c0_28, %c0_29] : memref<128x256xbf16, #tpu.memory_space<vmem>>, vector<128x256xbf16>
    %46 = arith.truncf %44 : vector<256x84xf32> to vector<256x84xbf16>
    %cst_30 = arith.constant dense<0.000000e+00> : vector<128x84xf32>
    %47 = tpu.matmul %45, %46, %cst_30 {dimension_numbers = #tpu.dot_dimension_numbers<[1], [0], [0], [1], [0, 0, 1, 1], [], []>} : vector<128x256xbf16>, vector<256x84xbf16>, vector<128x84xf32> -> vector<128x84xf32>
    %c0_31 = arith.constant 0 : index
    %c0_32 = arith.constant 0 : index
    %c0_33 = arith.constant 0 : index
    %48 = vector.load %arg6[%c0_31, %c0_32, %c0_33] : memref<5x84x224xbf16, #tpu.memory_space<vmem>>, vector<1x84x224xbf16>
    %49 = vector.shape_cast %48 : vector<1x84x224xbf16> to vector<84x224xbf16>
    %50 = arith.truncf %47 : vector<128x84xf32> to vector<128x84xbf16>
    %cst_34 = arith.constant dense<0.000000e+00> : vector<128x224xf32>
    %51 = tpu.matmul %50, %49, %cst_34 {dimension_numbers = #tpu.dot_dimension_numbers<[1], [0], [0], [1], [0, 0, 1, 1], [], []>} : vector<128x84xbf16>, vector<84x224xbf16>, vector<128x224xf32> -> vector<128x224xf32>
    %c127_i32 = arith.constant 127 : i32
    %52 = tpu.dynamic_rotate %47 by %c127_i32 dim 0 : vector<128x84xf32>, i32 -> vector<128x84xf32>
    %c1_35 = arith.constant 1 : index
    %c0_36 = arith.constant 0 : index
    %c0_37 = arith.constant 0 : index
    %53 = vector.load %arg6[%c1_35, %c0_36, %c0_37] : memref<5x84x224xbf16, #tpu.memory_space<vmem>>, vector<1x84x224xbf16>
    %54 = vector.shape_cast %53 : vector<1x84x224xbf16> to vector<84x224xbf16>
    %55 = arith.truncf %52 : vector<128x84xf32> to vector<128x84xbf16>
    %cst_38 = arith.constant dense<0.000000e+00> : vector<128x224xf32>
    %56 = tpu.matmul %55, %54, %cst_38 {dimension_numbers = #tpu.dot_dimension_numbers<[1], [0], [0], [1], [0, 0, 1, 1], [], []>} : vector<128x84xbf16>, vector<84x224xbf16>, vector<128x224xf32> -> vector<128x224xf32>
    %57 = arith.addf %51, %56 : vector<128x224xf32>
    %c126_i32 = arith.constant 126 : i32
    %58 = tpu.dynamic_rotate %47 by %c126_i32 dim 0 : vector<128x84xf32>, i32 -> vector<128x84xf32>
    %c2_39 = arith.constant 2 : index
    %c0_40 = arith.constant 0 : index
    %c0_41 = arith.constant 0 : index
    %59 = vector.load %arg6[%c2_39, %c0_40, %c0_41] : memref<5x84x224xbf16, #tpu.memory_space<vmem>>, vector<1x84x224xbf16>
    %60 = vector.shape_cast %59 : vector<1x84x224xbf16> to vector<84x224xbf16>
    %61 = arith.truncf %58 : vector<128x84xf32> to vector<128x84xbf16>
    %cst_42 = arith.constant dense<0.000000e+00> : vector<128x224xf32>
    %62 = tpu.matmul %61, %60, %cst_42 {dimension_numbers = #tpu.dot_dimension_numbers<[1], [0], [0], [1], [0, 0, 1, 1], [], []>} : vector<128x84xbf16>, vector<84x224xbf16>, vector<128x224xf32> -> vector<128x224xf32>
    %63 = arith.addf %57, %62 : vector<128x224xf32>
    %c125_i32 = arith.constant 125 : i32
    %64 = tpu.dynamic_rotate %47 by %c125_i32 dim 0 : vector<128x84xf32>, i32 -> vector<128x84xf32>
    %c3_43 = arith.constant 3 : index
    %c0_44 = arith.constant 0 : index
    %c0_45 = arith.constant 0 : index
    %65 = vector.load %arg6[%c3_43, %c0_44, %c0_45] : memref<5x84x224xbf16, #tpu.memory_space<vmem>>, vector<1x84x224xbf16>
    %66 = vector.shape_cast %65 : vector<1x84x224xbf16> to vector<84x224xbf16>
    %67 = arith.truncf %64 : vector<128x84xf32> to vector<128x84xbf16>
    %cst_46 = arith.constant dense<0.000000e+00> : vector<128x224xf32>
    %68 = tpu.matmul %67, %66, %cst_46 {dimension_numbers = #tpu.dot_dimension_numbers<[1], [0], [0], [1], [0, 0, 1, 1], [], []>} : vector<128x84xbf16>, vector<84x224xbf16>, vector<128x224xf32> -> vector<128x224xf32>
    %69 = arith.addf %63, %68 : vector<128x224xf32>
    %c124_i32 = arith.constant 124 : i32
    %70 = tpu.dynamic_rotate %47 by %c124_i32 dim 0 : vector<128x84xf32>, i32 -> vector<128x84xf32>
    %c4_47 = arith.constant 4 : index
    %c0_48 = arith.constant 0 : index
    %c0_49 = arith.constant 0 : index
    %71 = vector.load %arg6[%c4_47, %c0_48, %c0_49] : memref<5x84x224xbf16, #tpu.memory_space<vmem>>, vector<1x84x224xbf16>
    %72 = vector.shape_cast %71 : vector<1x84x224xbf16> to vector<84x224xbf16>
    %73 = arith.truncf %70 : vector<128x84xf32> to vector<128x84xbf16>
    %cst_50 = arith.constant dense<0.000000e+00> : vector<128x224xf32>
    %74 = tpu.matmul %73, %72, %cst_50 {dimension_numbers = #tpu.dot_dimension_numbers<[1], [0], [0], [1], [0, 0, 1, 1], [], []>} : vector<128x84xbf16>, vector<84x224xbf16>, vector<128x224xf32> -> vector<128x224xf32>
    %75 = arith.addf %69, %74 : vector<128x224xf32>
    %c0_51 = arith.constant 0 : index
    %c0_52 = arith.constant 0 : index
    %76 = vector.load %arg7[%c0_51, %c0_52] : memref<1x224xf32, #tpu.memory_space<vmem>>, vector<1x224xf32>
    %77 = vector.broadcast %76 : vector<1x224xf32> to vector<128x224xf32>
    %78 = arith.addf %75, %77 : vector<128x224xf32>
    %cst_53 = arith.constant 0.000000e+00 : f32
    %79 = vector.broadcast %cst_53 : f32 to vector<128x224xf32>
    %80 = arith.maximumf %78, %79 : vector<128x224xf32>
    %c0_54 = arith.constant 0 : index
    %c0_55 = arith.constant 0 : index
    %c0_56 = arith.constant 0 : index
    %81 = vector.load %arg8[%c0_54, %c0_55, %c0_56] : memref<2x224x80xbf16, #tpu.memory_space<vmem>>, vector<1x224x80xbf16>
    %82 = vector.shape_cast %81 : vector<1x224x80xbf16> to vector<224x80xbf16>
    %83 = arith.truncf %80 : vector<128x224xf32> to vector<128x224xbf16>
    %cst_57 = arith.constant dense<0.000000e+00> : vector<128x80xf32>
    %84 = tpu.matmul %83, %82, %cst_57 {dimension_numbers = #tpu.dot_dimension_numbers<[1], [0], [0], [1], [0, 0, 1, 1], [], []>} : vector<128x224xbf16>, vector<224x80xbf16>, vector<128x80xf32> -> vector<128x80xf32>
    %c1_58 = arith.constant 1 : index
    %c0_59 = arith.constant 0 : index
    %c0_60 = arith.constant 0 : index
    %85 = vector.load %arg8[%c1_58, %c0_59, %c0_60] : memref<2x224x80xbf16, #tpu.memory_space<vmem>>, vector<1x224x80xbf16>
    %86 = vector.shape_cast %85 : vector<1x224x80xbf16> to vector<224x80xbf16>
    %87 = arith.truncf %80 : vector<128x224xf32> to vector<128x224xbf16>
    %cst_61 = arith.constant dense<0.000000e+00> : vector<128x80xf32>
    %88 = tpu.matmul %87, %86, %cst_61 {dimension_numbers = #tpu.dot_dimension_numbers<[1], [0], [0], [1], [0, 0, 1, 1], [], []>} : vector<128x224xbf16>, vector<224x80xbf16>, vector<128x80xf32> -> vector<128x80xf32>
    %89 = arith.maximumf %84, %88 : vector<128x80xf32>
    %c127_i32_62 = arith.constant 127 : i32
    %90 = tpu.dynamic_rotate %89 by %c127_i32_62 dim 0 : vector<128x80xf32>, i32 -> vector<128x80xf32>
    %91 = arith.maximumf %89, %90 : vector<128x80xf32>
    %c0_63 = arith.constant 0 : index
    %c0_64 = arith.constant 0 : index
    %c0_65 = arith.constant 0 : index
    %92 = vector.load %arg9[%c0_63, %c0_64, %c0_65] : memref<5x8x128xbf16, #tpu.memory_space<vmem>>, vector<1x8x128xbf16>
    %93 = vector.shape_cast %92 : vector<1x8x128xbf16> to vector<8x128xbf16>
    %94 = arith.truncf %91 : vector<128x80xf32> to vector<128x80xbf16>
    %cst_66 = arith.constant dense<0.000000e+00> : vector<8x80xf32>
    %95 = tpu.matmul %93, %94, %cst_66 {dimension_numbers = #tpu.dot_dimension_numbers<[1], [0], [0], [1], [0, 0, 1, 1], [], []>} : vector<8x128xbf16>, vector<128x80xbf16>, vector<8x80xf32> -> vector<8x80xf32>
    %c0_67 = arith.constant 0 : index
    %c0_68 = arith.constant 0 : index
    %c0_69 = arith.constant 0 : index
    %96 = vector.load %arg10[%c0_67, %c0_68, %c0_69] : memref<5x80x120xbf16, #tpu.memory_space<vmem>>, vector<1x80x120xbf16>
    %97 = vector.shape_cast %96 : vector<1x80x120xbf16> to vector<80x120xbf16>
    %98 = arith.truncf %95 : vector<8x80xf32> to vector<8x80xbf16>
    %cst_70 = arith.constant dense<0.000000e+00> : vector<8x120xf32>
    %99 = tpu.matmul %98, %97, %cst_70 {dimension_numbers = #tpu.dot_dimension_numbers<[1], [0], [0], [1], [0, 0, 1, 1], [], []>} : vector<8x80xbf16>, vector<80x120xbf16>, vector<8x120xf32> -> vector<8x120xf32>
    %c1_71 = arith.constant 1 : index
    %c0_72 = arith.constant 0 : index
    %c0_73 = arith.constant 0 : index
    %100 = vector.load %arg9[%c1_71, %c0_72, %c0_73] : memref<5x8x128xbf16, #tpu.memory_space<vmem>>, vector<1x8x128xbf16>
    %101 = vector.shape_cast %100 : vector<1x8x128xbf16> to vector<8x128xbf16>
    %102 = arith.truncf %91 : vector<128x80xf32> to vector<128x80xbf16>
    %cst_74 = arith.constant dense<0.000000e+00> : vector<8x80xf32>
    %103 = tpu.matmul %101, %102, %cst_74 {dimension_numbers = #tpu.dot_dimension_numbers<[1], [0], [0], [1], [0, 0, 1, 1], [], []>} : vector<8x128xbf16>, vector<128x80xbf16>, vector<8x80xf32> -> vector<8x80xf32>
    %c1_75 = arith.constant 1 : index
    %c0_76 = arith.constant 0 : index
    %c0_77 = arith.constant 0 : index
    %104 = vector.load %arg10[%c1_75, %c0_76, %c0_77] : memref<5x80x120xbf16, #tpu.memory_space<vmem>>, vector<1x80x120xbf16>
    %105 = vector.shape_cast %104 : vector<1x80x120xbf16> to vector<80x120xbf16>
    %106 = arith.truncf %103 : vector<8x80xf32> to vector<8x80xbf16>
    %cst_78 = arith.constant dense<0.000000e+00> : vector<8x120xf32>
    %107 = tpu.matmul %106, %105, %cst_78 {dimension_numbers = #tpu.dot_dimension_numbers<[1], [0], [0], [1], [0, 0, 1, 1], [], []>} : vector<8x80xbf16>, vector<80x120xbf16>, vector<8x120xf32> -> vector<8x120xf32>
    %108 = arith.addf %99, %107 : vector<8x120xf32>
    %c2_79 = arith.constant 2 : index
    %c0_80 = arith.constant 0 : index
    %c0_81 = arith.constant 0 : index
    %109 = vector.load %arg9[%c2_79, %c0_80, %c0_81] : memref<5x8x128xbf16, #tpu.memory_space<vmem>>, vector<1x8x128xbf16>
    %110 = vector.shape_cast %109 : vector<1x8x128xbf16> to vector<8x128xbf16>
    %111 = arith.truncf %91 : vector<128x80xf32> to vector<128x80xbf16>
    %cst_82 = arith.constant dense<0.000000e+00> : vector<8x80xf32>
    %112 = tpu.matmul %110, %111, %cst_82 {dimension_numbers = #tpu.dot_dimension_numbers<[1], [0], [0], [1], [0, 0, 1, 1], [], []>} : vector<8x128xbf16>, vector<128x80xbf16>, vector<8x80xf32> -> vector<8x80xf32>
    %c2_83 = arith.constant 2 : index
    %c0_84 = arith.constant 0 : index
    %c0_85 = arith.constant 0 : index
    %113 = vector.load %arg10[%c2_83, %c0_84, %c0_85] : memref<5x80x120xbf16, #tpu.memory_space<vmem>>, vector<1x80x120xbf16>
    %114 = vector.shape_cast %113 : vector<1x80x120xbf16> to vector<80x120xbf16>
    %115 = arith.truncf %112 : vector<8x80xf32> to vector<8x80xbf16>
    %cst_86 = arith.constant dense<0.000000e+00> : vector<8x120xf32>
    %116 = tpu.matmul %115, %114, %cst_86 {dimension_numbers = #tpu.dot_dimension_numbers<[1], [0], [0], [1], [0, 0, 1, 1], [], []>} : vector<8x80xbf16>, vector<80x120xbf16>, vector<8x120xf32> -> vector<8x120xf32>
    %117 = arith.addf %108, %116 : vector<8x120xf32>
    %c3_87 = arith.constant 3 : index
    %c0_88 = arith.constant 0 : index
    %c0_89 = arith.constant 0 : index
    %118 = vector.load %arg9[%c3_87, %c0_88, %c0_89] : memref<5x8x128xbf16, #tpu.memory_space<vmem>>, vector<1x8x128xbf16>
    %119 = vector.shape_cast %118 : vector<1x8x128xbf16> to vector<8x128xbf16>
    %120 = arith.truncf %91 : vector<128x80xf32> to vector<128x80xbf16>
    %cst_90 = arith.constant dense<0.000000e+00> : vector<8x80xf32>
    %121 = tpu.matmul %119, %120, %cst_90 {dimension_numbers = #tpu.dot_dimension_numbers<[1], [0], [0], [1], [0, 0, 1, 1], [], []>} : vector<8x128xbf16>, vector<128x80xbf16>, vector<8x80xf32> -> vector<8x80xf32>
    %c3_91 = arith.constant 3 : index
    %c0_92 = arith.constant 0 : index
    %c0_93 = arith.constant 0 : index
    %122 = vector.load %arg10[%c3_91, %c0_92, %c0_93] : memref<5x80x120xbf16, #tpu.memory_space<vmem>>, vector<1x80x120xbf16>
    %123 = vector.shape_cast %122 : vector<1x80x120xbf16> to vector<80x120xbf16>
    %124 = arith.truncf %121 : vector<8x80xf32> to vector<8x80xbf16>
    %cst_94 = arith.constant dense<0.000000e+00> : vector<8x120xf32>
    %125 = tpu.matmul %124, %123, %cst_94 {dimension_numbers = #tpu.dot_dimension_numbers<[1], [0], [0], [1], [0, 0, 1, 1], [], []>} : vector<8x80xbf16>, vector<80x120xbf16>, vector<8x120xf32> -> vector<8x120xf32>
    %126 = arith.addf %117, %125 : vector<8x120xf32>
    %c4_95 = arith.constant 4 : index
    %c0_96 = arith.constant 0 : index
    %c0_97 = arith.constant 0 : index
    %127 = vector.load %arg9[%c4_95, %c0_96, %c0_97] : memref<5x8x128xbf16, #tpu.memory_space<vmem>>, vector<1x8x128xbf16>
    %128 = vector.shape_cast %127 : vector<1x8x128xbf16> to vector<8x128xbf16>
    %129 = arith.truncf %91 : vector<128x80xf32> to vector<128x80xbf16>
    %cst_98 = arith.constant dense<0.000000e+00> : vector<8x80xf32>
    %130 = tpu.matmul %128, %129, %cst_98 {dimension_numbers = #tpu.dot_dimension_numbers<[1], [0], [0], [1], [0, 0, 1, 1], [], []>} : vector<8x128xbf16>, vector<128x80xbf16>, vector<8x80xf32> -> vector<8x80xf32>
    %c4_99 = arith.constant 4 : index
    %c0_100 = arith.constant 0 : index
    %c0_101 = arith.constant 0 : index
    %131 = vector.load %arg10[%c4_99, %c0_100, %c0_101] : memref<5x80x120xbf16, #tpu.memory_space<vmem>>, vector<1x80x120xbf16>
    %132 = vector.shape_cast %131 : vector<1x80x120xbf16> to vector<80x120xbf16>
    %133 = arith.truncf %130 : vector<8x80xf32> to vector<8x80xbf16>
    %cst_102 = arith.constant dense<0.000000e+00> : vector<8x120xf32>
    %134 = tpu.matmul %133, %132, %cst_102 {dimension_numbers = #tpu.dot_dimension_numbers<[1], [0], [0], [1], [0, 0, 1, 1], [], []>} : vector<8x80xbf16>, vector<80x120xbf16>, vector<8x120xf32> -> vector<8x120xf32>
    %135 = arith.addf %126, %134 : vector<8x120xf32>
    %c0_103 = arith.constant 0 : index
    %c0_104 = arith.constant 0 : index
    %136 = vector.load %arg11[%c0_103, %c0_104] : memref<1x120xf32, #tpu.memory_space<vmem>>, vector<1x120xf32>
    %137 = vector.broadcast %136 : vector<1x120xf32> to vector<8x120xf32>
    %138 = arith.addf %135, %137 : vector<8x120xf32>
    %cst_105 = arith.constant 0.000000e+00 : f32
    %139 = vector.broadcast %cst_105 : f32 to vector<8x120xf32>
    %140 = arith.maximumf %138, %139 : vector<8x120xf32>
    %c0_106 = arith.constant 0 : index
    %c0_107 = arith.constant 0 : index
    %141 = vector.load %arg12[%c0_106, %c0_107] : memref<120x84xbf16, #tpu.memory_space<vmem>>, vector<120x84xbf16>
    %142 = arith.truncf %140 : vector<8x120xf32> to vector<8x120xbf16>
    %cst_108 = arith.constant dense<0.000000e+00> : vector<8x84xf32>
    %143 = tpu.matmul %142, %141, %cst_108 {dimension_numbers = #tpu.dot_dimension_numbers<[1], [0], [0], [1], [0, 0, 1, 1], [], []>} : vector<8x120xbf16>, vector<120x84xbf16>, vector<8x84xf32> -> vector<8x84xf32>
    %c0_109 = arith.constant 0 : index
    %c0_110 = arith.constant 0 : index
    %144 = vector.load %arg13[%c0_109, %c0_110] : memref<1x84xf32, #tpu.memory_space<vmem>>, vector<1x84xf32>
    %145 = vector.broadcast %144 : vector<1x84xf32> to vector<8x84xf32>
    %146 = arith.addf %143, %145 : vector<8x84xf32>
    %cst_111 = arith.constant 0.000000e+00 : f32
    %147 = vector.broadcast %cst_111 : f32 to vector<8x84xf32>
    %148 = arith.maximumf %146, %147 : vector<8x84xf32>
    %c0_112 = arith.constant 0 : index
    %c0_113 = arith.constant 0 : index
    %149 = vector.load %arg14[%c0_112, %c0_113] : memref<84x10xbf16, #tpu.memory_space<vmem>>, vector<84x10xbf16>
    %150 = arith.truncf %148 : vector<8x84xf32> to vector<8x84xbf16>
    %cst_114 = arith.constant dense<0.000000e+00> : vector<8x10xf32>
    %151 = tpu.matmul %150, %149, %cst_114 {dimension_numbers = #tpu.dot_dimension_numbers<[1], [0], [0], [1], [0, 0, 1, 1], [], []>} : vector<8x84xbf16>, vector<84x10xbf16>, vector<8x10xf32> -> vector<8x10xf32>
    %c0_115 = arith.constant 0 : index
    %c0_116 = arith.constant 0 : index
    %152 = vector.load %arg15[%c0_115, %c0_116] : memref<1x10xf32, #tpu.memory_space<vmem>>, vector<1x10xf32>
    %153 = vector.broadcast %152 : vector<1x10xf32> to vector<8x10xf32>
    %154 = arith.addf %151, %153 : vector<8x10xf32>
    %c0_117 = arith.constant 0 : index
    %c0_118 = arith.constant 0 : index
    %155 = vector.load %arg16[%c0_117, %c0_118] : memref<8x10xf32, #tpu.memory_space<vmem>>, vector<8x10xf32>
    tpu.vector_store %arg16[%c0_117, %c0_118], %154 {strides = array<i32>} : memref<8x10xf32, #tpu.memory_space<vmem>>, vector<8x10xf32>,
    return
  }
  func.func @transform_0(%arg0: i32) -> (i32, i32) {
    %c0_i32 = arith.constant 0 : i32
    %c0_i32_0 = arith.constant 0 : i32
    return %arg0, %c0_i32 : i32, i32
  }
  func.func @transform_1(%arg0: i32) -> (i32, i32, i32) {
    %c0_i32 = arith.constant 0 : i32
    %c0_i32_0 = arith.constant 0 : i32
    %c0_i32_1 = arith.constant 0 : i32
    %c0_i32_2 = arith.constant 0 : i32
    return %c0_i32, %c0_i32_0, %c0_i32_1 : i32, i32, i32
  }
  func.func @transform_2(%arg0: i32) -> (i32, i32) {
    %c0_i32 = arith.constant 0 : i32
    %c0_i32_0 = arith.constant 0 : i32
    %c0_i32_1 = arith.constant 0 : i32
    return %c0_i32, %c0_i32_0 : i32, i32
  }
  func.func @transform_3(%arg0: i32) -> (i32, i32, i32) {
    %c0_i32 = arith.constant 0 : i32
    %c0_i32_0 = arith.constant 0 : i32
    %c0_i32_1 = arith.constant 0 : i32
    %c0_i32_2 = arith.constant 0 : i32
    return %c0_i32, %c0_i32_0, %c0_i32_1 : i32, i32, i32
  }
  func.func @transform_4(%arg0: i32) -> (i32, i32) {
    %c0_i32 = arith.constant 0 : i32
    %c0_i32_0 = arith.constant 0 : i32
    %c0_i32_1 = arith.constant 0 : i32
    return %c0_i32, %c0_i32_0 : i32, i32
  }
  func.func @transform_5(%arg0: i32) -> (i32, i32, i32) {
    %c0_i32 = arith.constant 0 : i32
    %c0_i32_0 = arith.constant 0 : i32
    %c0_i32_1 = arith.constant 0 : i32
    %c0_i32_2 = arith.constant 0 : i32
    return %c0_i32, %c0_i32_0, %c0_i32_1 : i32, i32, i32
  }
  func.func @transform_6(%arg0: i32) -> (i32, i32) {
    %c0_i32 = arith.constant 0 : i32
    %c0_i32_0 = arith.constant 0 : i32
    %c0_i32_1 = arith.constant 0 : i32
    return %c0_i32, %c0_i32_0 : i32, i32
  }
  func.func @transform_7(%arg0: i32) -> (i32, i32, i32) {
    %c0_i32 = arith.constant 0 : i32
    %c0_i32_0 = arith.constant 0 : i32
    %c0_i32_1 = arith.constant 0 : i32
    %c0_i32_2 = arith.constant 0 : i32
    return %c0_i32, %c0_i32_0, %c0_i32_1 : i32, i32, i32
  }
  func.func @transform_8(%arg0: i32) -> (i32, i32, i32) {
    %c0_i32 = arith.constant 0 : i32
    %c0_i32_0 = arith.constant 0 : i32
    %c0_i32_1 = arith.constant 0 : i32
    %c0_i32_2 = arith.constant 0 : i32
    return %c0_i32, %c0_i32_0, %c0_i32_1 : i32, i32, i32
  }
  func.func @transform_9(%arg0: i32) -> (i32, i32, i32) {
    %c0_i32 = arith.constant 0 : i32
    %c0_i32_0 = arith.constant 0 : i32
    %c0_i32_1 = arith.constant 0 : i32
    %c0_i32_2 = arith.constant 0 : i32
    return %c0_i32, %c0_i32_0, %c0_i32_1 : i32, i32, i32
  }
  func.func @transform_10(%arg0: i32) -> (i32, i32) {
    %c0_i32 = arith.constant 0 : i32
    %c0_i32_0 = arith.constant 0 : i32
    %c0_i32_1 = arith.constant 0 : i32
    return %c0_i32, %c0_i32_0 : i32, i32
  }
  func.func @transform_11(%arg0: i32) -> (i32, i32) {
    %c0_i32 = arith.constant 0 : i32
    %c0_i32_0 = arith.constant 0 : i32
    %c0_i32_1 = arith.constant 0 : i32
    return %c0_i32, %c0_i32_0 : i32, i32
  }
  func.func @transform_12(%arg0: i32) -> (i32, i32) {
    %c0_i32 = arith.constant 0 : i32
    %c0_i32_0 = arith.constant 0 : i32
    %c0_i32_1 = arith.constant 0 : i32
    return %c0_i32, %c0_i32_0 : i32, i32
  }
  func.func @transform_13(%arg0: i32) -> (i32, i32) {
    %c0_i32 = arith.constant 0 : i32
    %c0_i32_0 = arith.constant 0 : i32
    %c0_i32_1 = arith.constant 0 : i32
    return %c0_i32, %c0_i32_0 : i32, i32
  }
  func.func @transform_14(%arg0: i32) -> (i32, i32) {
    %c0_i32 = arith.constant 0 : i32
    %c0_i32_0 = arith.constant 0 : i32
    %c0_i32_1 = arith.constant 0 : i32
    return %c0_i32, %c0_i32_0 : i32, i32
  }
  func.func @transform_15(%arg0: i32) -> (i32, i32) {
    %c0_i32 = arith.constant 0 : i32
    %c0_i32_0 = arith.constant 0 : i32
    return %arg0, %c0_i32 : i32, i32
  }
}

</mosaic_0001>

<bundles_post_ra>
// kernel: lenet_forward.1
= control target key start
LH: loop header
LB: loop body
LE: loop exit
PB: predicated region body
PF: predicated region fallthrough
CT: control target
= control target key end

     0   :  { %20 = vsyncpa [#allocation3], 0  ;;  %s11306_s0 = inlined_call_operand.vmem [shape: f32[512,96], index: 0, kind: input, shape index: {}]   ;;  %s11307_s1 = inlined_call_operand.vmem [shape: bf16[5,96,192], index: 1, kind: input, shape index: {}]   ;;  %s11308_s2 = inlined_call_operand.vmem [shape: f32[1,192], index: 2, kind: input, shape index: {}]   ;;  %s11309_s3 = inlined_call_operand.vmem [shape: bf16[2,192,84], index: 3, kind: input, shape index: {}]   ;;  %s11310_s4 = inlined_call_operand.vmem [shape: bf16[128,256], index: 4, kind: input, shape index: {}]   ;;  %s11311_s5 = inlined_call_operand.vmem [shape: bf16[5,84,224], index: 5, kind: input, shape index: {}]   ;;  %s11312_s6 = inlined_call_operand.vmem [shape: f32[1,224], index: 6, kind: input, shape index: {}]   ;;  %s11313_s7 = inlined_call_operand.vmem [shape: bf16[2,224,80], index: 7, kind: input, shape index: {}]   ;;  %s11314_s8 = inlined_call_operand.vmem [shape: bf16[5,8,128], index: 8, kind: input, shape index: {}]   ;;  %s11315_s9 = inlined_call_operand.vmem [shape: bf16[5,80,120], index: 9, kind: input, shape index: {}]   ;;  %s11316_s10 = inlined_call_operand.vmem [shape: f32[1,120], index: 10, kind: input, shape index: {}]   ;;  %s11317_s11 = inlined_call_operand.vmem [shape: bf16[120,84], index: 11, kind: input, shape index: {}]   ;;  %s11318_s12 = inlined_call_operand.vmem [shape: f32[1,84], index: 12, kind: input, shape index: {}]   ;;  %s11319_s13 = inlined_call_operand.vmem [shape: bf16[84,10], index: 13, kind: input, shape index: {}]   ;;  %s11320_s14 = inlined_call_operand.vmem [shape: f32[1,10], index: 14, kind: input, shape index: {}]   ;;  %s11321_s15 = inlined_call_operand.hbm [shape: f32[16,10], index: 15, kind: output, shape index: {}]  }
   0x1   :  { %22 = vsyncpa [#allocation3 + $0x1], 0  ;;  %s8426_s18 = smov 0   ;;  %s8428_s19 = smov 0  }
   0x2   :  { %s8430_s20 = smov 0   ;;  %s8432_s21 = smov 0  }
   0x3 LB: > { %11346 = sst [smem:[#allocation5_spill]] %s8328_s18  ;;  %s8447_s22 = sadd.s32 4294967295, %s8340_s21   ;;  %s8340_s21 = sphi %s8432_s21, %s11413_s21   ;;  %s8336_s20 = sphi %s8430_s20, %s11415_s20   ;;  %s8332_s19 = sphi %s8428_s19, %s11417_s19   ;;  %s8328_s18 = sphi %s8426_s18, %s11416_s18  }
   0x4   : > { %11347 = sst [smem:[#allocation6_spill]] %s8336_s20  ;;  %s6563_s23 = sadd.s32 4294967294, %s8340_s21  }
   0x5   : > { %s8451_s24 = sadd.s32 1, %s8340_s21   ;;  %s355_s25 = sadd.s32 1, %s8336_s20 }
   0x6   : > { %11348 = sst [smem:[#allocation7_spill]] %s8451_s24  ;;  %s352_s26 = ssub.s32 %s8340_s21, %s8451_s24 }
   0x7   : > { %p365_p0 = scmp.ne.s32.totalorder %s8336_s20, %s8332_s19  ;;  %p353_p1 = scmp.eq.s32.totalorder %s352_s26, 0 }
   0x8   : > { %p366_p2 = scmp.eq.s32.totalorder %s8447_s22, 1  ;;  %p371_p3 = scmp.ne.s32.totalorder %s8332_s19, %s8328_s18 }
   0x9   : > { %p372_p4 = scmp.eq.s32.totalorder %s6563_s23, 1  ;;  %p6566_p7 = scmp.ge.s32.totalorder %s8340_s21, 1 }
   0xa   : > { %s8462_s27 = scalar_select %p353_p1, %s8336_s20, %s355_s25  }
   0xb   : > { %p8464_p5 = por %p366_p2, %p365_p0  ;;  %p8468_p6 = por %p372_p4, %p371_p3 }
   0xc   : > { %11349 = sst [smem:[#allocation8_spill]] %s8462_s27  ;;  %p441_p8 = scmp.lt.s32.totalorder %s8340_s21, 3 }
   0xd   : > { %s11351_s29 = scalar_select %p8468_p6, 1, 0 }
   0xe   : > { %p442_p9 = pnand %p6566_p7, %p441_p8 }
   0xf   : > { %11352 = sst [smem:[#allocation9_spill]] %s11351_s29 }
  0x10   : > { %445 = sbr.rel (%p442_p9) target bundleno = 3440 (0xd70), region = 80 }
  0x17   : > { %v7959_v0 = vld [vmem:[%s11307_s1 + $0x64] ss:$8 sps:$4 sm:$0xff]   ;;  %s6568_s17 = sshll.u32 %s8447_s22, 5  ;;  %v7961_v1 = vld [vmem:[%s11307_s1 + $0x60] ss:$8 sps:$4 sm:$0xff]   ;;  %v11333_v2 = vmov 0   ;;  %v588_v8 = vlaneseq }
  0x18   : > { %793 = vmatprep.mubr.bf16.mxu0 %v11333_v2  ;;  %p490_p10 = scmp.lt.s32.totalorder %s6568_s17, 63  ;;  %2949 = vmatprep.subr.bf16.mxu1 %v11333_v2  ;;  %v7962_v3 = vld [vmem:[%s11307_s1 + $0x74] ss:$8 sps:$4 sm:$0xff]   ;;  %v7964_v4 = vld [vmem:[%s11307_s1 + $0x70] ss:$8 sps:$4 sm:$0xff]   ;;  %vm712_vm1 = vcmask 785408  }
  0x19   : > { %761 = vmatprep.subr.bf16.mxu0 %v7959_v0  ;;  %v7965_v5 = vld [vmem:[%s11307_s1 + $0x84] ss:$8 sps:$4 sm:$0xff]   ;;  %v7967_v6 = vld [vmem:[%s11307_s1 + $0x80] ss:$8 sps:$4 sm:$0xff]   ;;  %v7968_v7 = vld [vmem:[%s11307_s1 + $0x94] ss:$8 sps:$4 sm:$0xff]  }
  0x1a   : > { %762 = vmatpush1.bf16.msra.mxu0 %v7961_v1  ;;  %s11419_s17 = smov (!%p490_p10, %s6568_s17), 63  ;;  %v7970_v9 = vld [vmem:[%s11307_s1 + $0x90] ss:$8 sps:$4 sm:$0xff]   ;;  %v7971_v10 = vld [vmem:[%s11307_s1 + $0xa4] ss:$8 sps:$4 sm:$0xff]   ;;  %v8518_v14 = vshrl.u32 %v588_v8, 7 }
  0x1b   : > { %763 = vmatprep.subr.bf16.mxu0 %v7962_v3  ;;  %s6569_s20 = sshll.u32 %s11419_s17, 3  ;;  %v7973_v15 = vld [vmem:[%s11307_s1 + $0xa0] ss:$8 sps:$4 sm:$0xff]   ;;  %v7974_v19 = vld [vmem:[%s11307_s1 + $0xb4] ss:$8 sps:$4 sm:$0xff]   ;;  %vm2900_vm5 = vcmask 523264  }
  0x1c   : > { %s8501_s18 = scalar_lea.vmem %s11306_s0, %s6569_s20  ;;  %vm590_vm0 = vcmp.lt.s32.totalorder %v8518_v14, 7  ;;  %v7976_v20 = vld [vmem:[%s11307_s1 + $0xb0] ss:$8 sps:$4 sm:$0xff]   ;;  %v7979_v25 = vld [vmem:[%s11307_s1 + $0x4] ss:$8 sps:$4 sm:$0xff]   ;;  %vm1287_vm2 = vcmp.lt.s32.totalorder %v8518_v14, 6 }
  0x1d   : > { %v8510_v11 = vld [vmem:[%s8501_s18] sm:$0xff]  ;;  %v8513_v12 = vld [vmem:[%s8501_s18 + $0x8] sm:$0xff]  ;;  %v8516_v13 = vld [vmem:[%s8501_s18 + $0x10] sm:$0xff]  ;;  %vm1746_vm3 = vcmp.lt.s32.totalorder %v8518_v14, 5  ;;  %vm2205_vm4 = vcmp.lt.s32.totalorder %v8518_v14, 4  ;;  %vm3856_vm6 = vcmask 1041408  }
  0x1e   : > { %764 = vmatpush1.bf16.msra.mxu0 %v7964_v4  ;;  %v556_v16 = vrot.slane %v8510_v11, 1  ;;  %v557_v17 = vrot.slane %v8513_v12, 1  ;;  %v558_v18 = vrot.slane %v8516_v13, 1  ;;  %v8540_v23 = vld [vmem:[%s8501_s18 + $0x18] sm:$0xff]  ;;  %v8543_v24 = vld [vmem:[%s8501_s18 + $0x20] sm:$0xff]  ;;  %v8558_v31 = vld [vmem:[%s8501_s18 + $0x28] sm:$0xff] }
  0x1f   : > { %765 = vmatprep.subr.bf16.mxu0 %v7965_v5  ;;  %v559_v27 = vrot.slane %v8540_v23, 1  ;;  %v560_v28 = vrot.slane %v8543_v24, 1  ;;  %v7977_v29 = vld [vmem:[%s11307_s1] ss:$8 sps:$4 sm:$0xff]   ;;  %v7982_v30 = vld [vmem:[%s11307_s1 + $0x14] ss:$8 sps:$4 sm:$0xff]  }
  0x20   : > { %v620_v21 = vsel %vm590_vm0, %v557_v17, %v558_v18  ;;  %v621_v22 = vsel %vm590_vm0, %v556_v16, %v557_v17  ;;  %v8561_v32 = vld [vmem:[%s8501_s18 + $0x30] sm:$0xff]  ;;  %v7985_v36 = vld [vmem:[%s11307_s1 + $0x24] ss:$8 sps:$4 sm:$0xff]   ;;  %v7983_v37 = vld [vmem:[%s11307_s1 + $0x20] ss:$8 sps:$4 sm:$0xff]   ;;  %v561_v40 = vrot.slane %v8558_v31, 1 }
  0x21   : > { %v636_v26 = vpack.c.bf16 %v620_v21, %v621_v22  ;;  %v618_v33 = vsel %vm590_vm0, %v559_v27, %v560_v28  ;;  %v619_v34 = vsel %vm590_vm0, %v558_v18, %v559_v27  ;;  %v7980_v35 = vld [vmem:[%s11307_s1 + $0x10] ss:$8 sps:$4 sm:$0xff]   ;;  %v7988_v39 = vld [vmem:[%s11307_s1 + $0x34] ss:$8 sps:$4 sm:$0xff]   ;;  %v562_v41 = vrot.slane %v8561_v32, 1  ;;  %v8586_v43 = vld [vmem:[%s8501_s18 + $0x40] sm:$0xff] }
  0x22   : > { %766 = vmatpush1.bf16.msra.mxu0 %v7967_v6  ;;  %v637_v38 = vpack.c.bf16 %v618_v33, %v619_v34  ;;  %v8583_v42 = vld [vmem:[%s8501_s18 + $0x38] sm:$0xff]  ;;  %v8589_v44 = vld [vmem:[%s8501_s18 + $0x48] sm:$0xff]  ;;  %v8596_v46 = vld [vmem:[%s8501_s18 + $0x50] sm:$0xff]  ;;  %v617_v51 = vsel %vm590_vm0, %v560_v28, %v561_v40  ;;  %v564_v55 = vrot.slane %v8586_v43, 1  ;;  %vm3831_vm7 = vcmask 687104   ;;  %s486_s16 = sand.u32 1, %s8332_s19  }
  0x23   : > { %767 = vmatprep.subr.bf16.mxu0 %v7968_v7  ;;  %v7986_v45 = vld [vmem:[%s11307_s1 + $0x30] ss:$8 sps:$4 sm:$0xff]   ;;  %v8602_v48 = vld [vmem:[%s8501_s18 + $0x60] sm:$0xff]  ;;  %v616_v50 = vsel %vm590_vm0, %v561_v40, %v562_v41  ;;  %v563_v54 = vrot.slane %v8583_v42, 1  ;;  %v565_v56 = vrot.slane %v8589_v44, 1  ;;  %v566_v58 = vrot.slane %v8596_v46, 1 }
  0x24   : > { %v8599_v47 = vld [vmem:[%s8501_s18 + $0x58] sm:$0xff]  ;;  %v7991_v49 = vld [vmem:[%s11307_s1 + $0x44] ss:$8 sps:$4 sm:$0xff]   ;;  %v7989_v52 = vld [vmem:[%s11307_s1 + $0x40] ss:$8 sps:$4 sm:$0xff]   ;;  %v638_v53 = vpack.c.bf16 %v616_v50, %v617_v51  ;;  %v568_v60 = vrot.slane %v8602_v48, 1 }
  0x25   : > { %v7994_v57 = vld [vmem:[%s11307_s1 + $0x54] ss:$8 sps:$4 sm:$0xff]   ;;  %v567_v59 = vrot.slane %v8599_v47, 1  ;;  %v7992_v61 = vld [vmem:[%s11307_s1 + $0x50] ss:$8 sps:$4 sm:$0xff]   ;;  %v614_v62 = vsel %vm590_vm0, %v563_v54, %v564_v55  ;;  %v615_v63 = vsel %vm590_vm0, %v562_v41, %v563_v54  ;;  %v612_v1 = vsel %vm590_vm0, %v565_v56, %v566_v58  ;;  %v8641_v5 = vld [vmem:[%s8501_s18 + $0x68] sm:$0xff] }
  0x26   : > { %768 = vmatpush1.bf16.msra.mxu0 %v7970_v9  ;;  %v639_v0 = vpack.c.bf16 %v614_v62, %v615_v63  ;;  %v613_v3 = vsel %vm590_vm0, %v564_v55, %v565_v56  ;;  %v8644_v6 = vld [vmem:[%s8501_s18 + $0x70] sm:$0xff]  ;;  %v8655_v17 = vld [vmem:[%s8501_s18 + $0x78] sm:$0xff]  ;;  %v8658_v18 = vld [vmem:[%s8501_s18 + $0x80] sm:$0xff]  ;;  %vm8344_vm8 = vmmov 0   ;;  %vm5763_vm9 = vcmask 654336   ;;  %s7169_s24 = sshll.u32 %s8447_s22, 7 }
  0x27   : > { %769 = vmatprep.subr.bf16.mxu0 %v7971_v10  ;;  %v640_v4 = vpack.c.bf16 %v612_v1, %v613_v3  ;;  %v610_v7 = vsel %vm590_vm0, %v567_v59, %v568_v60  ;;  %v611_v8 = vsel %vm590_vm0, %v566_v58, %v567_v59  ;;  %v569_v10 = vrot.slane %v8641_v5, 1  ;;  %v8666_v22 = vld [vmem:[%s8501_s18 + $0x88] sm:$0xff]  ;;  %v8674_v28 = vld [vmem:[%s8501_s18 + $0x98] sm:$0xff]  ;;  %v8683_v33 = vld [vmem:[%s8501_s18 + $0xb0] sm:$0xff]  ;;  %s11264_s26 = scalar_lea.hbm %s11321_s15, %s7169_s24  ;;  %s6491_s22 = scalar_lea.sflag [#allocation3], %s486_s16 }
  0x28   : > { %v641_v9 = vpack.c.bf16 %v610_v7, %v611_v8  ;;  %v572_v27 = vrot.slane %v8658_v18, 1  ;;  %v8686_v34 = vld [vmem:[%s8501_s18 + $0xb8] sm:$0xff]  ;;  %v575_v40 = vrot.slane %v8674_v28, 1  ;;  %v8718_v58 = vld [vmem:[%s8501_s18 + $0xc8] sm:$0xff]  ;;  %v8721_v59 = vld [vmem:[%s8501_s18 + $0xd0] sm:$0xff]  ;;  %vm6345_vm10 = vcmask 1043456  }
  0x29   : > { %v579_v50 = vrot.slane %v8686_v34, 1  ;;  %v582_v62 = vrot.slane %v8721_v59, 1  ;;  %v7997_v63 = vld [vmem:[%s11307_s1 + $0xc4] ss:$8 sps:$4 sm:$0xff]   ;;  %v8741_v8 = vld [vmem:[%s8501_s18 + $0xd8] sm:$0xff]  ;;  %vm6341_vm11 = vcmask 982016  }
  0x2a   : > { %770 = vmatpush1.bf16.msra.mxu0 %v7973_v15  ;;  %v570_v15 = vrot.slane %v8644_v6, 1  ;;  %vm6488_vm12 = vcmask 80896  }
  0x2b   : > { %771 = vmatprep.subr.bf16.mxu0 %v7974_v19 }
  0x2c   : > { %v608_v19 = vsel %vm590_vm0, %v569_v10, %v570_v15 }
  0x2e   : > { %772 = vmatpush1.bf16.msra.mxu0 %v7976_v20  ;;  %v609_v20 = vsel %vm590_vm0, %v568_v60, %v569_v10 }
  0x2f   : > { %1062 = vmatprep.subr.bf16.mxu0 %v7979_v25  ;;  %v642_v21 = vpack.c.bf16 %v608_v19, %v609_v20  ;;  %v8669_v25 = vld [vmem:[%s8501_s18 + $0x90] sm:$0xff] }
  0x31   : > { %6594 = vmatmul.mubr.msk.bf16.vlgmr.msra.gmra.mrb[0].mxu0 %vm712_vm1, %v636_v26  ;;  %v571_v26 = vrot.slane %v8655_v17, 1 }
  0x32   : > { %803 = vmatprep.mubr.bf16.mxu0 %v11333_v2  ;;  %1063 = vmatpush1.bf16.msra.mxu0 %v7977_v29  ;;  %v8677_v29 = vld [vmem:[%s8501_s18 + $0xa0] sm:$0xff] }
  0x33   : > { %1064 = vmatprep.subr.bf16.mxu0 %v7982_v30  ;;  %v8680_v30 = vld [vmem:[%s8501_s18 + $0xa8] sm:$0xff]  ;;  %v576_v41 = vrot.slane %v8677_v29, 1 }
  0x35   : > { %v602_v56 = vsel %vm590_vm0, %v575_v40, %v576_v41 }
  0x36   : > { %1065 = vmatpush1.bf16.msra.mxu0 %v7980_v35  ;;  %v8689_v35 = vld [vmem:[%s8501_s18 + $0xc0] sm:$0xff] }
  0x37   : > { %1066 = vmatprep.subr.bf16.mxu0 %v7985_v36  ;;  %v606_v36 = vsel %vm590_vm0, %v571_v26, %v572_v27  ;;  %v580_v51 = vrot.slane %v8689_v35, 1 }
  0x39   : > { %6595 = vmatmul.mubr.msk.bf16.gmra.mrb[4].mxu0 %vm712_vm1, %v637_v38  ;;  %v573_v38 = vrot.slane %v8666_v22, 1 }
  0x3a   : > { %813 = vmatprep.mubr.bf16.mxu0 %v11333_v2  ;;  %1067 = vmatpush1.bf16.msra.mxu0 %v7983_v37  ;;  %v607_v37 = vsel %vm590_vm0, %v570_v15, %v571_v26  ;;  %v583_v15 = vrot.slane %v8741_v8, 1 }
  0x3b   : > { %1068 = vmatprep.subr.bf16.mxu0 %v7988_v39  ;;  %v574_v39 = vrot.slane %v8669_v25, 1  ;;  %v605_v54 = vsel %vm590_vm0, %v572_v27, %v573_v38 }
  0x3e   : > { %1069 = vmatpush1.bf16.msra.mxu0 %v7986_v45  ;;  %v577_v45 = vrot.slane %v8680_v30, 1 }
  0x3f   : > { %1070 = vmatprep.subr.bf16.mxu0 %v7991_v49  ;;  %v578_v49 = vrot.slane %v8683_v33, 1 }
  0x40   : > { %v601_v1 = vsel %vm590_vm0, %v576_v41, %v577_v45 }
  0x41   : > { %6596 = vmatmul.mubr.msk.bf16.gmra.mrb[8].mxu0 %vm712_vm1, %v638_v53  ;;  %v604_v53 = vsel %vm590_vm0, %v573_v38, %v574_v39  ;;  %v599_v7 = vsel %vm590_vm0, %v578_v49, %v579_v50  ;;  %v8764_v38 = vld [vmem:[%s8501_s18 + $0xf0] sm:$0xff] }
  0x42   : > { %823 = vmatprep.mubr.bf16.mxu0 %v11333_v2  ;;  %1071 = vmatpush1.bf16.msra.mxu0 %v7989_v52  ;;  %v643_v52 = vpack.c.bf16 %v606_v36, %v607_v37  ;;  %v644_v55 = vpack.c.bf16 %v604_v53, %v605_v54  ;;  %v595_v36 = vsel %vm590_vm0, %v582_v62, %v583_v15  ;;  %v8761_v37 = vld [vmem:[%s8501_s18 + $0xe8] sm:$0xff]  ;;  %v586_v41 = vrot.slane %v8764_v38, 1 }
  0x43   : > { %1072 = vmatprep.subr.bf16.mxu0 %v7994_v57  ;;  %v603_v57 = vsel %vm590_vm0, %v574_v39, %v575_v40  ;;  %v585_v40 = vrot.slane %v8761_v37, 1 }
  0x44   : > { %v645_v60 = vpack.c.bf16 %v602_v56, %v603_v57  ;;  %v540_v56 = vpack.c.bf16 %v8513_v12, %v8510_v11  ;;  %v7995_v57 = vld [vmem:[%s11307_s1 + $0xc0] ss:$8 sps:$4 sm:$0xff]   ;;  %v8003_v11 = vld [vmem:[%s11307_s1 + $0xe4] ss:$8 sps:$4 sm:$0xff]   ;;  %v541_v12 = vpack.c.bf16 %v8540_v23, %v8516_v13  ;;  %v542_v23 = vpack.c.bf16 %v8558_v31, %v8543_v24 }
  0x45   : > { %v8009_v13 = vld [vmem:[%s11307_s1 + $0x104] ss:$8 sps:$4 sm:$0xff]   ;;  %v543_v24 = vpack.c.bf16 %v8583_v42, %v8561_v32  ;;  %v544_v31 = vpack.c.bf16 %v8589_v44, %v8586_v43  ;;  %v546_v32 = vpack.c.bf16 %v8641_v5, %v8602_v48  ;;  %v547_v44 = vpack.c.bf16 %v8655_v17, %v8644_v6 }
  0x46   : > { %1073 = vmatpush1.bf16.msra.mxu0 %v7992_v61  ;;  %v581_v61 = vrot.slane %v8718_v58, 1  ;;  %v8015_v48 = vld [vmem:[%s11307_s1 + $0x124] ss:$8 sps:$4 sm:$0xff]  }
  0x47   : > { %1457 = vmatprep.subr.bf16.mxu0 %v7997_v63  ;;  %v8004_v63 = vld [vmem:[%s11307_s1 + $0xf0] ss:$8 sps:$4 sm:$0xff]  }
  0x48   : > { %v596_v20 = vsel %vm590_vm0, %v581_v61, %v582_v62  ;;  %v8006_v62 = vld [vmem:[%s11307_s1 + $0xf4] ss:$8 sps:$4 sm:$0xff]  }
  0x49   : > { %6597 = vmatmul.mubr.msk.bf16.gmra.mrb[12].mxu0 %vm712_vm1, %v639_v0  ;;  %v600_v0 = vsel %vm590_vm0, %v577_v45, %v578_v49  ;;  %v592_v45 = vsel %vm590_vm0, %v585_v40, %v586_v41 }
  0x4a   : > { %833 = vmatprep.mubr.bf16.mxu0 %v11333_v2  ;;  %v646_v3 = vpack.c.bf16 %v600_v0, %v601_v1  ;;  %v8007_v0 = vld [vmem:[%s11307_s1 + $0x100] ss:$8 sps:$4 sm:$0xff]   ;;  %v8012_v1 = vld [vmem:[%s11307_s1 + $0x114] ss:$8 sps:$4 sm:$0xff]  }
  0x51   : > { %6598 = vmatmul.mubr.msk.bf16.gmra.mrb[16].mxu0 %vm712_vm1, %v640_v4  ;;  %v598_v4 = vsel %vm590_vm0, %v579_v50, %v580_v51  ;;  %v8775_v50 = vld [vmem:[%s8501_s18 + $0xf8] sm:$0xff] }
  0x52   : > { %843 = vmatprep.mubr.bf16.mxu0 %v11333_v2  ;;  %v647_v10 = vpack.c.bf16 %v598_v4, %v599_v7  ;;  %v545_v4 = vpack.c.bf16 %v8599_v47, %v8596_v46  ;;  %v548_v46 = vpack.c.bf16 %v8666_v22, %v8658_v18  ;;  %v549_v47 = vpack.c.bf16 %v8674_v28, %v8669_v25 }
  0x53   : > { %v550_v7 = vpack.c.bf16 %v8680_v30, %v8677_v29 }
  0x59   : > { %6599 = vmatmul.mubr.msk.bf16.gmra.mrb[20].mxu0 %vm712_vm1, %v641_v9  ;;  %v8744_v9 = vld [vmem:[%s8501_s18 + $0xe0] sm:$0xff] }
  0x5a   : > { %853 = vmatprep.mubr.bf16.mxu0 %v11333_v2  ;;  %v584_v19 = vrot.slane %v8744_v9, 1 }
  0x5c   : > { %v594_v27 = vsel %vm590_vm0, %v583_v15, %v584_v19  ;;  %v593_v49 = vsel %vm590_vm0, %v584_v19, %v585_v40  ;;  %v552_v15 = vpack.c.bf16 %v8718_v58, %v8689_v35  ;;  %v553_v19 = vpack.c.bf16 %v8741_v8, %v8721_v59  ;;  %v8895_v40 = vld [vmem:[%s8501_s18 + $0x10] sm:$0xff] }
  0x5d   : > { %v649_v39 = vpack.c.bf16 %v594_v27, %v595_v36  ;;  %v8891_v36 = vld [vmem:[%s8501_s18 + $0x8] sm:$0xff] }
  0x61   : > { %6600 = vmatmul.mubr.msk.bf16.gmra.mrb[24].mxu0 %vm712_vm1, %v642_v21  ;;  %v597_v21 = vsel %vm590_vm0, %v580_v51, %v581_v61  ;;  %v650_v51 = vpack.c.bf16 %v592_v45, %v593_v49  ;;  %v8001_v61 = vld [vmem:[%s11307_s1 + $0xe0] ss:$8 sps:$4 sm:$0xff]  }
  0x62   : > { %863 = vmatprep.mubr.bf16.mxu0 %v11333_v2  ;;  %v648_v26 = vpack.c.bf16 %v596_v20, %v597_v21  ;;  %v554_v20 = vpack.c.bf16 %v8761_v37, %v8744_v9  ;;  %v555_v21 = vpack.c.bf16 %v8775_v50, %v8764_v38 }
  0x69   : > { %6601 = vmatmul.mubr.msk.bf16.gmra.mrb[28].mxu0 %vm712_vm1, %v643_v52  ;;  %v587_v52 = vrot.slane %v8775_v50, 1 }
  0x6a   : > { %873 = vmatprep.mubr.bf16.mxu0 %v11333_v2 }
  0x6b   : > { %v591_v53 = vsel %vm590_vm0, %v586_v41, %v587_v52  ;;  %v622_v54 = vsel %vm590_vm0, %v587_v52, %v556_v16  ;;  %v7998_v16 = vld [vmem:[%s11307_s1 + $0xd0] ss:$8 sps:$4 sm:$0xff]   ;;  %v1257_v41 = vrot.slane %v8895_v40, 2 }
  0x6c   : > { %v8908_v52 = vld [vmem:[%s8501_s18 + $0x18] sm:$0xff] }
  0x71   : > { %6602 = vmatmul.mubr.msk.bf16.gmra.mrb[32].mxu0 %vm712_vm1, %v644_v55  ;;  %v651_v55 = vpack.c.bf16 %v622_v54, %v591_v53  ;;  %v1258_v53 = vrot.slane %v8908_v52, 2  ;;  %v8912_v54 = vld [vmem:[%s8501_s18 + $0x20] sm:$0xff] }
  0x72   : > { %883 = vmatprep.mubr.bf16.mxu0 %v11333_v2 }
  0x79   : > { %6603 = vmatmul.mubr.msk.bf16.gmra.mrb[36].mxu0 %vm712_vm1, %v645_v60  ;;  %v8000_v60 = vld [vmem:[%s11307_s1 + $0xd4] ss:$8 sps:$4 sm:$0xff]  }
  0x7a   : > { %893 = vmatprep.mubr.bf16.mxu0 %v11333_v2 }
  0x81   : > { %6604 = vmatmul.mubr.msk.bf16.gmra.mrb[40].mxu0 %vm712_vm1, %v646_v3  ;;  %v8010_v3 = vld [vmem:[%s11307_s1 + $0x110] ss:$8 sps:$4 sm:$0xff]  }
  0x82   : > { %903 = vmatprep.mubr.bf16.mxu0 %v11333_v2 }
  0x89   : > { %6605 = vmatmul.mubr.msk.bf16.gmra.mrb[44].mxu0 %vm712_vm1, %v647_v10  ;;  %v551_v10 = vpack.c.bf16 %v8686_v34, %v8683_v33 }
  0x8a   : > { %913 = vmatprep.mubr.bf16.mxu0 %v11333_v2 }
  0x91   : > { %6606 = vmatmul.mubr.msk.bf16.gmra.mrb[48].mxu0 %vm712_vm1, %v648_v26  ;;  %v8887_v26 = vld [vmem:[%s8501_s18] sm:$0xff] }
  0x92   : > { %923 = vmatprep.mubr.bf16.mxu0 %v11333_v2  ;;  %v1255_v27 = vrot.slane %v8887_v26, 2 }
  0x99   : > { %6607 = vmatmul.mubr.msk.bf16.gmra.mrb[52].mxu0 %vm712_vm1, %v649_v39  ;;  %v1256_v39 = vrot.slane %v8891_v36, 2 }
  0x9a   : > { %933 = vmatprep.mubr.bf16.mxu0 %v11333_v2 }
  0x9b   : > { %v1317_v45 = vsel %vm1287_vm2, %v1256_v39, %v1257_v41  ;;  %v1318_v49 = vsel %vm1287_vm2, %v1255_v27, %v1256_v39 }
  0xa1   : > { %6608 = vmatmul.mubr.msk.bf16.gmra.mrb[56].mxu0 %vm712_vm1, %v650_v51  ;;  %v1333_v51 = vpack.c.bf16 %v1317_v45, %v1318_v49  ;;  %v8991_v49 = vld [vmem:[%s8501_s18 + $0x58] sm:$0xff] }
  0xa2   : > { %943 = vmatprep.mubr.bf16.mxu0 %v11333_v2 }
  0xa9   : > { %6609 = vmatmul.mubr.msk.bf16.gmra.mrb[60].mxu0 %vm712_vm1, %v651_v55  ;;  %v1259_v55 = vrot.slane %v8912_v54, 2 }
  0xaa   : > { %1094 = vmatprep.mubr.bf16.mxu0 %v11333_v2 }
  0xb1   : > { %6622 = vmatmul.mubr.msk.bf16.vlgmr.msra.gmra.mrb[0].mxu0 %vm712_vm1, %v540_v56  ;;  %v8013_v56 = vld [vmem:[%s11307_s1 + $0x120] ss:$8 sps:$4 sm:$0xff]  }
  0xb2   : > { %1104 = vmatprep.mubr.bf16.mxu0 %v11333_v2  ;;  %1458 = vmatpush1.bf16.msra.mxu0 %v7995_v57  ;;  %v8018_v57 = vld [vmem:[%s11307_s1 + $0x134] ss:$8 sps:$4 sm:$0xff]  }
  0xb3   : > { %1459 = vmatprep.subr.bf16.mxu0 %v8000_v60  ;;  %v1315_v60 = vsel %vm1287_vm2, %v1258_v53, %v1259_v55 }
  0xb6   : > { %1460 = vmatpush1.bf16.msra.mxu0 %v7998_v16  ;;  %v1316_v16 = vsel %vm1287_vm2, %v1257_v41, %v1258_v53  ;;  %v8995_v53 = vld [vmem:[%s8501_s18 + $0x60] sm:$0xff] }
  0xb7   : > { %1461 = vmatprep.subr.bf16.mxu0 %v8003_v11  ;;  %v8016_v11 = vld [vmem:[%s11307_s1 + $0x130] ss:$8 sps:$4 sm:$0xff]  }
  0xb9   : > { %6623 = vmatmul.mubr.msk.bf16.gmra.mrb[4].mxu0 %vm712_vm1, %v541_v12  ;;  %v8021_v12 = vld [vmem:[%s11307_s1 + $0x144] ss:$8 sps:$4 sm:$0xff]  }
  0xba   : > { %1114 = vmatprep.mubr.bf16.mxu0 %v11333_v2  ;;  %1462 = vmatpush1.bf16.msra.mxu0 %v8001_v61  ;;  %v1334_v61 = vpack.c.bf16 %v1315_v60, %v1316_v16  ;;  %v1268_v16 = vrot.slane %v8641_v5, 2 }
  0xbb   : > { %1463 = vmatprep.subr.bf16.mxu0 %v8006_v62  ;;  %v8934_v62 = vld [vmem:[%s8501_s18 + $0x28] sm:$0xff] }
  0xbe   : > { %1464 = vmatpush1.bf16.msra.mxu0 %v8004_v63  ;;  %v1260_v63 = vrot.slane %v8934_v62, 2 }
  0xbf   : > { %1465 = vmatprep.subr.bf16.mxu0 %v8009_v13  ;;  %v8938_v13 = vld [vmem:[%s8501_s18 + $0x30] sm:$0xff] }
  0xc1   : > { %6624 = vmatmul.mubr.msk.bf16.gmra.mrb[8].mxu0 %vm712_vm1, %v542_v23  ;;  %v1261_v23 = vrot.slane %v8938_v13, 2 }
  0xc2   : > { %1124 = vmatprep.mubr.bf16.mxu0 %v11333_v2  ;;  %1466 = vmatpush1.bf16.msra.mxu0 %v8007_v0  ;;  %v8019_v0 = vld [vmem:[%s11307_s1 + $0x140] ss:$8 sps:$4 sm:$0xff]  }
  0xc3   : > { %1467 = vmatprep.subr.bf16.mxu0 %v8012_v1  ;;  %v8024_v1 = vld [vmem:[%s11307_s1 + $0x154] ss:$8 sps:$4 sm:$0xff]  }
  0xc6   : > { %1468 = vmatpush1.bf16.msra.mxu0 %v8010_v3  ;;  %v1313_v3 = vsel %vm1287_vm2, %v1260_v63, %v1261_v23 }
  0xc7   : > { %1916 = vmatprep.subr.bf16.mxu0 %v8015_v48  ;;  %v8030_v48 = vld [vmem:[%s11307_s1 + $0x174] ss:$8 sps:$4 sm:$0xff]  }
  0xc9   : > { %6625 = vmatmul.mubr.msk.bf16.gmra.mrb[12].mxu0 %vm712_vm1, %v543_v24  ;;  %v1314_v24 = vsel %vm1287_vm2, %v1259_v55, %v1260_v63  ;;  %v1267_v55 = vrot.slane %v8995_v53, 2 }
  0xca   : > { %1134 = vmatprep.mubr.bf16.mxu0 %v11333_v2 }
  0xd1   : > { %6626 = vmatmul.mubr.msk.bf16.gmra.mrb[16].mxu0 %vm712_vm1, %v544_v31  ;;  %v8022_v31 = vld [vmem:[%s11307_s1 + $0x150] ss:$8 sps:$4 sm:$0xff]  }
  0xd2   : > { %1144 = vmatprep.mubr.bf16.mxu0 %v11333_v2 }
  0xd9   : > { %6627 = vmatmul.mubr.msk.bf16.gmra.mrb[20].mxu0 %vm712_vm1, %v545_v4  ;;  %v8027_v4 = vld [vmem:[%s11307_s1 + $0x164] ss:$8 sps:$4 sm:$0xff]  }
  0xda   : > { %1154 = vmatprep.mubr.bf16.mxu0 %v11333_v2 }
  0xe1   : > { %6628 = vmatmul.mubr.msk.bf16.gmra.mrb[24].mxu0 %vm712_vm1, %v546_v32  ;;  %v1335_v32 = vpack.c.bf16 %v1313_v3, %v1314_v24  ;;  %v1272_v3 = vrot.slane %v8666_v22, 2  ;;  %v1273_v24 = vrot.slane %v8669_v25, 2 }
  0xe2   : > { %1164 = vmatprep.mubr.bf16.mxu0 %v11333_v2 }
  0xe9   : > { %6629 = vmatmul.mubr.msk.bf16.gmra.mrb[28].mxu0 %vm712_vm1, %v547_v44  ;;  %v1262_v44 = vrot.slane %v8583_v42, 2 }
  0xea   : > { %1174 = vmatprep.mubr.bf16.mxu0 %v11333_v2 }
  0xf1   : > { %6630 = vmatmul.mubr.msk.bf16.gmra.mrb[32].mxu0 %vm712_vm1, %v548_v46  ;;  %v1263_v46 = vrot.slane %v8586_v43, 2  ;;  %v1312_v43 = vsel %vm1287_vm2, %v1261_v23, %v1262_v44  ;;  %v1270_v23 = vrot.slane %v8655_v17, 2  ;;  %v1301_v17 = vsel %vm1287_vm2, %v1272_v3, %v1273_v24 }
  0xf2   : > { %1184 = vmatprep.mubr.bf16.mxu0 %v11333_v2 }
  0xf3   : > { %v1311_v42 = vsel %vm1287_vm2, %v1262_v44, %v1263_v46 }
  0xf9   : > { %6631 = vmatmul.mubr.msk.bf16.gmra.mrb[36].mxu0 %vm712_vm1, %v549_v47  ;;  %v8025_v47 = vld [vmem:[%s11307_s1 + $0x160] ss:$8 sps:$4 sm:$0xff]  }
  0xfa   : > { %1194 = vmatprep.mubr.bf16.mxu0 %v11333_v2 }
 0x101   : > { %6632 = vmatmul.mubr.msk.bf16.gmra.mrb[40].mxu0 %vm712_vm1, %v550_v7  ;;  %v8028_v7 = vld [vmem:[%s11307_s1 + $0x170] ss:$8 sps:$4 sm:$0xff]  }
 0x102   : > { %1204 = vmatprep.mubr.bf16.mxu0 %v11333_v2 }
 0x109   : > { %6633 = vmatmul.mubr.msk.bf16.gmra.mrb[44].mxu0 %vm712_vm1, %v551_v10  ;;  %v1336_v10 = vpack.c.bf16 %v1311_v42, %v1312_v43 }
 0x10a   : > { %1214 = vmatprep.mubr.bf16.mxu0 %v11333_v2 }
 0x111   : > { %6634 = vmatmul.mubr.msk.bf16.gmra.mrb[48].mxu0 %vm712_vm1, %v552_v15  ;;  %v8977_v15 = vld [vmem:[%s8501_s18 + $0x48] sm:$0xff] }
 0x112   : > { %1224 = vmatprep.mubr.bf16.mxu0 %v11333_v2 }
 0x119   : > { %6635 = vmatmul.mubr.msk.bf16.gmra.mrb[52].mxu0 %vm712_vm1, %v553_v19  ;;  %v1264_v19 = vrot.slane %v8977_v15, 2 }
 0x11a   : > { %1234 = vmatprep.mubr.bf16.mxu0 %v11333_v2 }
 0x11b   : > { %v1310_v41 = vsel %vm1287_vm2, %v1263_v46, %v1264_v19  ;;  %v1276_v46 = vrot.slane %v8680_v30, 2  ;;  %v1278_v30 = vrot.slane %v8686_v34, 2 }
 0x121   : > { %6636 = vmatmul.mubr.msk.bf16.gmra.mrb[56].mxu0 %vm712_vm1, %v554_v20  ;;  %v8981_v20 = vld [vmem:[%s8501_s18 + $0x50] sm:$0xff] }
 0x122   : > { %1244 = vmatprep.mubr.bf16.mxu0 %v11333_v2 }
 0x129   : > { %6637 = vmatmul.mubr.msk.bf16.gmra.mrb[60].mxu0 %vm712_vm1, %v555_v21  ;;  %v1265_v21 = vrot.slane %v8981_v20, 2 }
 0x12a   : > { %1489 = vmatprep.mubr.bf16.mxu0 %v11333_v2 }
 0x12b   : > { %v1309_v39 = vsel %vm1287_vm2, %v1264_v19, %v1265_v21  ;;  %v1280_v19 = vrot.slane %v8718_v58, 2 }
 0x12c   : > { %v1337_v45 = vpack.c.bf16 %v1309_v39, %v1310_v41  ;;  %v1282_v41 = vrot.slane %v8741_v8, 2 }
 0x131   : > { %6662 = vmatmul.mubr.msk.bf16.vlgmr.msra.gmra.mrb[0].mxu0 %vm712_vm1, %v1333_v51  ;;  %v1266_v51 = vrot.slane %v8991_v49, 2 }
 0x132   : > { %1499 = vmatprep.mubr.bf16.mxu0 %v11333_v2  ;;  %1917 = vmatpush1.bf16.msra.mxu0 %v8013_v56 }
 0x133   : > { %1918 = vmatprep.subr.bf16.mxu0 %v8018_v57  ;;  %v1307_v56 = vsel %vm1287_vm2, %v1266_v51, %v1267_v55  ;;  %v1308_v57 = vsel %vm1287_vm2, %v1265_v21, %v1266_v51  ;;  %v1281_v21 = vrot.slane %v8721_v59, 2 }
 0x134   : > { %v1338_v60 = vpack.c.bf16 %v1307_v56, %v1308_v57  ;;  %v1284_v57 = vrot.slane %v8761_v37, 2 }
 0x135   : > { %v1293_v34 = vsel %vm1287_vm2, %v1280_v19, %v1281_v21 }
 0x136   : > { %1919 = vmatpush1.bf16.msra.mxu0 %v8016_v11  ;;  %v1269_v11 = vrot.slane %v8644_v6, 2 }
 0x137   : > { %1920 = vmatprep.subr.bf16.mxu0 %v8021_v12 }
 0x138   : > { %v1305_v12 = vsel %vm1287_vm2, %v1268_v16, %v1269_v11  ;;  %v1304_v6 = vsel %vm1287_vm2, %v1269_v11, %v1270_v23 }
 0x139   : > { %6663 = vmatmul.mubr.msk.bf16.gmra.mrb[4].mxu0 %vm712_vm1, %v1334_v61  ;;  %v1306_v61 = vsel %vm1287_vm2, %v1267_v55, %v1268_v16  ;;  %v1292_v55 = vsel %vm1287_vm2, %v1281_v21, %v1282_v41  ;;  %v9145_v21 = vld [vmem:[%s8501_s18 + $0x40] sm:$0xff] }
 0x13a   : > { %1509 = vmatprep.mubr.bf16.mxu0 %v11333_v2  ;;  %1921 = vmatpush1.bf16.msra.mxu0 %v8019_v0  ;;  %v1339_v63 = vpack.c.bf16 %v1305_v12, %v1306_v61  ;;  %v1271_v0 = vrot.slane %v8658_v18, 2  ;;  %v1286_v61 = vrot.slane %v8775_v50, 2 }
 0x13b   : > { %1922 = vmatprep.subr.bf16.mxu0 %v8024_v1 }
 0x13c   : > { %v1303_v5 = vsel %vm1287_vm2, %v1270_v23, %v1271_v0  ;;  %v1302_v18 = vsel %vm1287_vm2, %v1271_v0, %v1272_v3  ;;  %v1319_v23 = vsel %vm1287_vm2, %v1286_v61, %v1255_v27 }
 0x13d   : > { %v1340_v1 = vpack.c.bf16 %v1303_v5, %v1304_v6  ;;  %v1714_v5 = vrot.slane %v8887_v26, 3  ;;  %v1715_v6 = vrot.slane %v8891_v36, 3 }
 0x13e   : > { %1923 = vmatpush1.bf16.msra.mxu0 %v8022_v31  ;;  %v1341_v31 = vpack.c.bf16 %v1301_v17, %v1302_v18  ;;  %v1717_v17 = vrot.slane %v8908_v52, 3  ;;  %v1718_v18 = vrot.slane %v8912_v54, 3 }
 0x13f   : > { %1924 = vmatprep.subr.bf16.mxu0 %v8027_v4  ;;  %v1274_v4 = vrot.slane %v8674_v28, 2  ;;  %v8033_v28 = vld [vmem:[%s11307_s1 + $0x184] ss:$8 sps:$4 sm:$0xff]   ;;  %v1777_v27 = vsel %vm1746_vm3, %v1714_v5, %v1715_v6 }
 0x141   : > { %6664 = vmatmul.mubr.msk.bf16.gmra.mrb[8].mxu0 %vm712_vm1, %v1335_v32  ;;  %v1275_v32 = vrot.slane %v8677_v29, 2  ;;  %v1300_v25 = vsel %vm1287_vm2, %v1273_v24, %v1274_v4 }
 0x142   : > { %1519 = vmatprep.mubr.bf16.mxu0 %v11333_v2  ;;  %1925 = vmatpush1.bf16.msra.mxu0 %v8025_v47  ;;  %v1277_v47 = vrot.slane %v8683_v33, 2  ;;  %v1279_v33 = vrot.slane %v8689_v35, 2 }
 0x143   : > { %1926 = vmatprep.subr.bf16.mxu0 %v8030_v48  ;;  %v1299_v22 = vsel %vm1287_vm2, %v1274_v4, %v1275_v32  ;;  %v1298_v48 = vsel %vm1287_vm2, %v1275_v32, %v1276_v46  ;;  %v8036_v4 = vld [vmem:[%s11307_s1 + $0x194] ss:$8 sps:$4 sm:$0xff]   ;;  %v1774_v32 = vsel %vm1746_vm3, %v1717_v17, %v1718_v18 }
 0x144   : > { %v1342_v44 = vpack.c.bf16 %v1299_v22, %v1300_v25  ;;  %v1297_v29 = vsel %vm1287_vm2, %v1276_v46, %v1277_v47  ;;  %v1295_v43 = vsel %vm1287_vm2, %v1278_v30, %v1279_v33  ;;  %v1294_v35 = vsel %vm1287_vm2, %v1279_v33, %v1280_v19  ;;  %v8034_v25 = vld [vmem:[%s11307_s1 + $0x190] ss:$8 sps:$4 sm:$0xff]  }
 0x145   : > { %v1343_v42 = vpack.c.bf16 %v1297_v29, %v1298_v48  ;;  %v1345_v39 = vpack.c.bf16 %v1293_v34, %v1294_v35  ;;  %v8037_v29 = vld [vmem:[%s11307_s1 + $0x1a0] ss:$8 sps:$4 sm:$0xff]   ;;  %v8042_v48 = vld [vmem:[%s11307_s1 + $0x1b4] ss:$8 sps:$4 sm:$0xff]   ;;  %v8040_v33 = vld [vmem:[%s11307_s1 + $0x1b0] ss:$8 sps:$4 sm:$0xff]  }
 0x146   : > { %1927 = vmatpush1.bf16.msra.mxu0 %v8028_v7  ;;  %v1296_v7 = vsel %vm1287_vm2, %v1277_v47, %v1278_v30  ;;  %v1719_v47 = vrot.slane %v8934_v62, 3  ;;  %v1722_v34 = vrot.slane %v9145_v21, 3  ;;  %v8043_v35 = vld [vmem:[%s11307_s1 + $0x1c0] ss:$8 sps:$4 sm:$0xff]  }
 0x147   : > { %2375 = vmatprep.subr.bf16.mxu0 %v8033_v28  ;;  %v1720_v28 = vrot.slane %v8938_v13, 3 }
 0x148   : > { %v1773_v30 = vsel %vm1746_vm3, %v1718_v18, %v1719_v47 }
 0x149   : > { %6665 = vmatmul.mubr.msk.bf16.gmra.mrb[12].mxu0 %vm712_vm1, %v1336_v10  ;;  %v1344_v10 = vpack.c.bf16 %v1295_v43, %v1296_v7  ;;  %v8045_v43 = vld [vmem:[%s11307_s1 + $0x1c4] ss:$8 sps:$4 sm:$0xff]  }
 0x14a   : > { %1529 = vmatprep.mubr.bf16.mxu0 %v11333_v2 }
 0x151   : > { %6666 = vmatmul.mubr.msk.bf16.gmra.mrb[16].mxu0 %vm712_vm1, %v1337_v45  ;;  %v1283_v45 = vrot.slane %v8744_v9, 2 }
 0x152   : > { %1539 = vmatprep.mubr.bf16.mxu0 %v11333_v2 }
 0x153   : > { %v1291_v51 = vsel %vm1287_vm2, %v1282_v41, %v1283_v45  ;;  %v1290_v11 = vsel %vm1287_vm2, %v1283_v45, %v1284_v57 }
 0x154   : > { %v1346_v56 = vpack.c.bf16 %v1291_v51, %v1292_v55  ;;  %v8046_v51 = vld [vmem:[%s11307_s1 + $0x1d0] ss:$8 sps:$4 sm:$0xff]  }
 0x159   : > { %6667 = vmatmul.mubr.msk.bf16.gmra.mrb[20].mxu0 %vm712_vm1, %v1338_v60  ;;  %v1285_v60 = vrot.slane %v8764_v38, 2 }
 0x15a   : > { %1549 = vmatprep.mubr.bf16.mxu0 %v11333_v2 }
 0x15b   : > { %v1289_v16 = vsel %vm1287_vm2, %v1284_v57, %v1285_v60  ;;  %v1724_v57 = vrot.slane %v8981_v20, 3 }
 0x15c   : > { %v1347_v12 = vpack.c.bf16 %v1289_v16, %v1290_v11 }
 0x161   : > { %6668 = vmatmul.mubr.msk.bf16.gmra.mrb[24].mxu0 %vm712_vm1, %v1339_v63  ;;  %v1288_v63 = vsel %vm1287_vm2, %v1285_v60, %v1286_v61  ;;  %v1726_v61 = vrot.slane %v8995_v53, 3 }
 0x162   : > { %1559 = vmatprep.mubr.bf16.mxu0 %v11333_v2  ;;  %v1348_v0 = vpack.c.bf16 %v1319_v23, %v1288_v63 }
 0x169   : > { %6669 = vmatmul.mubr.msk.bf16.gmra.mrb[28].mxu0 %vm712_vm1, %v1340_v1  ;;  %v1716_v1 = vrot.slane %v8895_v40, 3 }
 0x16a   : > { %1569 = vmatprep.mubr.bf16.mxu0 %v11333_v2 }
 0x16b   : > { %v1776_v3 = vsel %vm1746_vm3, %v1715_v6, %v1716_v1  ;;  %v1775_v22 = vsel %vm1746_vm3, %v1716_v1, %v1717_v17  ;;  %v9181_v6 = vld [vmem:[%s8501_s18 + $0x68] sm:$0xff] }
 0x16c   : > { %v1792_v24 = vpack.c.bf16 %v1776_v3, %v1777_v27  ;;  %v1793_v46 = vpack.c.bf16 %v1774_v32, %v1775_v22  ;;  %v1727_v1 = vrot.slane %v9181_v6, 3  ;;  %v9185_v3 = vld [vmem:[%s8501_s18 + $0x70] sm:$0xff]  ;;  %v9199_v32 = vld [vmem:[%s8501_s18 + $0x80] sm:$0xff] }
 0x16d   : > { %v1728_v27 = vrot.slane %v9185_v3, 3  ;;  %v1730_v22 = vrot.slane %v9199_v32, 3 }
 0x16e   : > { %v1765_v17 = vsel %vm1746_vm3, %v1726_v61, %v1727_v1 }
 0x171   : > { %6670 = vmatmul.mubr.msk.bf16.gmra.mrb[32].mxu0 %vm712_vm1, %v1341_v31  ;;  %v8031_v31 = vld [vmem:[%s11307_s1 + $0x180] ss:$8 sps:$4 sm:$0xff]  }
 0x172   : > { %1579 = vmatprep.mubr.bf16.mxu0 %v11333_v2 }
 0x179   : > { %6671 = vmatmul.mubr.msk.bf16.gmra.mrb[36].mxu0 %vm712_vm1, %v1342_v44  ;;  %v8039_v44 = vld [vmem:[%s11307_s1 + $0x1a4] ss:$8 sps:$4 sm:$0xff]  }
 0x17a   : > { %1589 = vmatprep.mubr.bf16.mxu0 %v11333_v2 }
 0x181   : > { %6672 = vmatmul.mubr.msk.bf16.gmra.mrb[40].mxu0 %vm712_vm1, %v1343_v42  ;;  %v1772_v42 = vsel %vm1746_vm3, %v1719_v47, %v1720_v28  ;;  %v9209_v47 = vld [vmem:[%s8501_s18 + $0x88] sm:$0xff] }
 0x182   : > { %1599 = vmatprep.mubr.bf16.mxu0 %v11333_v2  ;;  %v1794_v7 = vpack.c.bf16 %v1772_v42, %v1773_v30 }
 0x189   : > { %6673 = vmatmul.mubr.msk.bf16.gmra.mrb[44].mxu0 %vm712_vm1, %v1344_v10  ;;  %v9141_v10 = vld [vmem:[%s8501_s18 + $0x38] sm:$0xff] }
 0x18a   : > { %1609 = vmatprep.mubr.bf16.mxu0 %v11333_v2  ;;  %v1721_v19 = vrot.slane %v9141_v10, 3 }
 0x18c   : > { %v1770_v41 = vsel %vm1746_vm3, %v1721_v19, %v1722_v34  ;;  %v1771_v45 = vsel %vm1746_vm3, %v1720_v28, %v1721_v19  ;;  %v1731_v28 = vrot.slane %v9209_v47, 3  ;;  %v9227_v19 = vld [vmem:[%s8501_s18 + $0xa0] sm:$0xff] }
 0x18d   : > { %v1795_v55 = vpack.c.bf16 %v1770_v41, %v1771_v45  ;;  %v9237_v45 = vld [vmem:[%s8501_s18 + $0xa8] sm:$0xff] }
 0x18e   : > { %v1761_v30 = vsel %vm1746_vm3, %v1730_v22, %v1731_v28 }
 0x191   : > { %6674 = vmatmul.mubr.msk.bf16.gmra.mrb[48].mxu0 %vm712_vm1, %v1345_v39  ;;  %v8048_v39 = vld [vmem:[%s11307_s1 + $0x1d4] ss:$8 sps:$4 sm:$0xff]  }
 0x192   : > { %1619 = vmatprep.mubr.bf16.mxu0 %v11333_v2 }
 0x199   : > { %6675 = vmatmul.mubr.msk.bf16.gmra.mrb[52].mxu0 %vm712_vm1, %v1346_v56  ;;  %v1723_v56 = vrot.slane %v8977_v15, 3 }
 0x19a   : > { %1629 = vmatprep.mubr.bf16.mxu0 %v11333_v2 }
 0x19b   : > { %v1768_v60 = vsel %vm1746_vm3, %v1723_v56, %v1724_v57  ;;  %v1769_v16 = vsel %vm1746_vm3, %v1722_v34, %v1723_v56  ;;  %v1734_v34 = vrot.slane %v9227_v19, 3 }
 0x19c   : > { %v1796_v11 = vpack.c.bf16 %v1768_v60, %v1769_v16 }
 0x1a1   : > { %6676 = vmatmul.mubr.msk.bf16.gmra.mrb[56].mxu0 %vm712_vm1, %v1347_v12  ;;  %v1725_v12 = vrot.slane %v8991_v49, 3 }
 0x1a2   : > { %1639 = vmatprep.mubr.bf16.mxu0 %v11333_v2 }
 0x1a3   : > { %v1766_v63 = vsel %vm1746_vm3, %v1725_v12, %v1726_v61  ;;  %v1767_v23 = vsel %vm1746_vm3, %v1724_v57, %v1725_v12  ;;  %v9255_v61 = vld [vmem:[%s8501_s18 + $0xc0] sm:$0xff] }
 0x1a9   : > { %6677 = vmatmul.mubr.msk.bf16.gmra.mrb[60].mxu0 %vm712_vm1, %v1348_v0  ;;  %v1797_v0 = vpack.c.bf16 %v1766_v63, %v1767_v23  ;;  %v1738_v63 = vrot.slane %v9255_v61, 3 }
 0x1aa   : > { %1948 = vmatprep.mubr.bf16.mxu0 %v11333_v2 }
 0x1b1   : > { %6702 = vmatmul.mubr.msk.bf16.vlgmr.msra.gmra.mrb[0].mxu0 %vm712_vm1, %v1792_v24  ;;  %v1764_v24 = vsel %vm1746_vm3, %v1727_v1, %v1728_v27 }
 0x1b2   : > { %1958 = vmatprep.mubr.bf16.mxu0 %v11333_v2  ;;  %2376 = vmatpush1.bf16.msra.mxu0 %v8031_v31  ;;  %v1798_v18 = vpack.c.bf16 %v1764_v24, %v1765_v17  ;;  %v9195_v31 = vld [vmem:[%s8501_s18 + $0x78] sm:$0xff]  ;;  %v1740_v24 = vrot.slane %v8721_v59, 3 }
 0x1b3   : > { %2377 = vmatprep.subr.bf16.mxu0 %v8036_v4  ;;  %v1729_v4 = vrot.slane %v9195_v31, 3 }
 0x1b6   : > { %2378 = vmatpush1.bf16.msra.mxu0 %v8034_v25  ;;  %v1762_v25 = vsel %vm1746_vm3, %v1729_v4, %v1730_v22  ;;  %v1741_v22 = vrot.slane %v8741_v8, 3 }
 0x1b7   : > { %2379 = vmatprep.subr.bf16.mxu0 %v8039_v44  ;;  %v1763_v44 = vsel %vm1746_vm3, %v1728_v27, %v1729_v4  ;;  %v1739_v27 = vrot.slane %v8718_v58, 3 }
 0x1b8   : > { %v1751_v59 = vsel %vm1746_vm3, %v1740_v24, %v1741_v22 }
 0x1b9   : > { %6703 = vmatmul.mubr.msk.bf16.gmra.mrb[4].mxu0 %vm712_vm1, %v1793_v46  ;;  %v1799_v46 = vpack.c.bf16 %v1762_v25, %v1763_v44  ;;  %v1752_v17 = vsel %vm1746_vm3, %v1739_v27, %v1740_v24  ;;  %v1742_v25 = vrot.slane %v8744_v9, 3  ;;  %v2180_v24 = vrot.slane %v9141_v10, 4  ;;  %v8056_v10 = vld [vmem:[%s11309_s3 + $0x38] sm:$0xff]  }
 0x1ba   : > { %1968 = vmatprep.mubr.bf16.mxu0 %v11333_v2  ;;  %2380 = vmatpush1.bf16.msra.mxu0 %v8037_v29  ;;  %v9213_v29 = vld [vmem:[%s8501_s18 + $0x90] sm:$0xff] }
 0x1bb   : > { %2381 = vmatprep.subr.bf16.mxu0 %v8042_v48  ;;  %v1732_v48 = vrot.slane %v9213_v29, 3  ;;  %v1750_v58 = vsel %vm1746_vm3, %v1741_v22, %v1742_v25 }
 0x1bc   : > { %v1805_v44 = vpack.c.bf16 %v1750_v58, %v1751_v59  ;;  %v2183_v58 = vrot.slane %v8981_v20, 4  ;;  %v8057_v59 = vld [vmem:[%s11309_s3 + $0x40] sm:$0xff]   ;;  %v2184_v20 = vrot.slane %v8991_v49, 4 }
 0x1bd   : > { %v1760_v42 = vsel %vm1746_vm3, %v1731_v28, %v1732_v48  ;;  %v1744_v28 = vrot.slane %v8764_v38, 3 }
 0x1be   : > { %2382 = vmatpush1.bf16.msra.mxu0 %v8040_v33  ;;  %v1800_v33 = vpack.c.bf16 %v1760_v42, %v1761_v30  ;;  %v1745_v42 = vrot.slane %v8775_v50, 3 }
 0x1bf   : > { %2383 = vmatprep.subr.bf16.mxu0 %v8045_v43  ;;  %v9223_v43 = vld [vmem:[%s8501_s18 + $0x98] sm:$0xff] }
 0x1c0   : > { %v1747_v30 = vsel %vm1746_vm3, %v1744_v28, %v1745_v42 }
 0x1c1   : > { %6704 = vmatmul.mubr.msk.bf16.gmra.mrb[8].mxu0 %vm712_vm1, %v1794_v7  ;;  %v1733_v7 = vrot.slane %v9223_v43, 3 }
 0x1c2   : > { %1978 = vmatprep.mubr.bf16.mxu0 %v11333_v2  ;;  %2384 = vmatpush1.bf16.msra.mxu0 %v8043_v35 }
 0x1c3   : > { %2385 = vmatprep.subr.bf16.mxu0 %v8048_v39  ;;  %v1758_v35 = vsel %vm1746_vm3, %v1733_v7, %v1734_v34  ;;  %v1759_v39 = vsel %vm1746_vm3, %v1732_v48, %v1733_v7 }
 0x1c4   : > { %v1801_v41 = vpack.c.bf16 %v1758_v35, %v1759_v39  ;;  %v2174_v35 = vrot.slane %v8891_v36, 4  ;;  %v2175_v39 = vrot.slane %v8895_v40, 4  ;;  %v8050_v40 = vld [vmem:[%s11309_s3 + $0x8] sm:$0xff]  }
 0x1c6   : > { %2386 = vmatpush1.bf16.msra.mxu0 %v8046_v51  ;;  %v1735_v51 = vrot.slane %v9237_v45, 3 }
 0x1c7   : > { %5248 = vmatprep.subr.bf16.mxu0 %v11333_v2 }
 0x1c8   : > { %v1757_v60 = vsel %vm1746_vm3, %v1734_v34, %v1735_v51  ;;  %v2173_v34 = vrot.slane %v8887_v26, 4 }
 0x1c9   : > { %6705 = vmatmul.mubr.msk.bf16.gmra.mrb[12].mxu0 %vm712_vm1, %v1795_v55  ;;  %v9241_v55 = vld [vmem:[%s8501_s18 + $0xb0] sm:$0xff] }
 0x1ca   : > { %1988 = vmatprep.mubr.bf16.mxu0 %v11333_v2  ;;  %v1736_v56 = vrot.slane %v9241_v55, 3  ;;  %v2236_v36 = vsel %vm2205_vm4, %v2173_v34, %v2174_v35 }
 0x1cc   : > { %v1756_v57 = vsel %vm1746_vm3, %v1735_v51, %v1736_v56 }
 0x1cd   : > { %v1802_v16 = vpack.c.bf16 %v1756_v57, %v1757_v60  ;;  %v2177_v57 = vrot.slane %v8912_v54, 4  ;;  %v8051_v60 = vld [vmem:[%s11309_s3 + $0x10] sm:$0xff]  }
 0x1d1   : > { %6706 = vmatmul.mubr.msk.bf16.gmra.mrb[16].mxu0 %vm712_vm1, %v1796_v11  ;;  %v9251_v11 = vld [vmem:[%s8501_s18 + $0xb8] sm:$0xff] }
 0x1d2   : > { %1998 = vmatprep.mubr.bf16.mxu0 %v11333_v2  ;;  %v1737_v12 = vrot.slane %v9251_v11, 3 }
 0x1d4   : > { %v1754_v23 = vsel %vm1746_vm3, %v1737_v12, %v1738_v63 }
 0x1d9   : > { %6707 = vmatmul.mubr.msk.bf16.gmra.mrb[20].mxu0 %vm712_vm1, %v1797_v0  ;;  %v1755_v0 = vsel %vm1746_vm3, %v1736_v56, %v1737_v12  ;;  %v2176_v56 = vrot.slane %v8908_v52, 4  ;;  %v8052_v52 = vld [vmem:[%s11309_s3 + $0x18] sm:$0xff]  }
 0x1da   : > { %2008 = vmatprep.mubr.bf16.mxu0 %v11333_v2  ;;  %v1803_v1 = vpack.c.bf16 %v1754_v23, %v1755_v0  ;;  %v2179_v23 = vrot.slane %v8938_v13, 4  ;;  %v8053_v0 = vld [vmem:[%s11309_s3 + $0x20] sm:$0xff]  }
 0x1db   : > { %v2234_v12 = vsel %vm2205_vm4, %v2175_v39, %v2176_v56 }
 0x1dc   : > { %v2230_v22 = vsel %vm2205_vm4, %v2179_v23, %v2180_v24 }
 0x1e1   : > { %6708 = vmatmul.mubr.msk.bf16.gmra.mrb[24].mxu0 %vm712_vm1, %v1798_v18  ;;  %v1753_v18 = vsel %vm1746_vm3, %v1738_v63, %v1739_v27  ;;  %v2178_v63 = vrot.slane %v8934_v62, 4  ;;  %v8054_v62 = vld [vmem:[%s11309_s3 + $0x28] sm:$0xff]  }
 0x1e2   : > { %2018 = vmatprep.mubr.bf16.mxu0 %v11333_v2  ;;  %v1804_v4 = vpack.c.bf16 %v1752_v17, %v1753_v18  ;;  %v2181_v17 = vrot.slane %v9145_v21, 4  ;;  %v8055_v18 = vld [vmem:[%s11309_s3 + $0x30] sm:$0xff]  }
 0x1e3   : > { %v2232_v27 = vsel %vm2205_vm4, %v2177_v57, %v2178_v63 }
 0x1e9   : > { %6709 = vmatmul.mubr.msk.bf16.gmra.mrb[28].mxu0 %vm712_vm1, %v1799_v46  ;;  %v1743_v46 = vrot.slane %v8761_v37, 3 }
 0x1ea   : > { %2028 = vmatprep.mubr.bf16.mxu0 %v11333_v2 }
 0x1eb   : > { %v1748_v8 = vsel %vm1746_vm3, %v1743_v46, %v1744_v28  ;;  %v1749_v9 = vsel %vm1746_vm3, %v1742_v25, %v1743_v46  ;;  %v2182_v25 = vrot.slane %v8977_v15, 4  ;;  %v2185_v28 = vrot.slane %v8995_v53, 4 }
 0x1ec   : > { %v1806_v48 = vpack.c.bf16 %v1748_v8, %v1749_v9  ;;  %v2226_v9 = vsel %vm2205_vm4, %v2183_v58, %v2184_v20 }
 0x1ed   : > { %v2228_v46 = vsel %vm2205_vm4, %v2181_v17, %v2182_v25  ;;  %v2225_v8 = vsel %vm2205_vm4, %v2184_v20, %v2185_v28  ;;  %v2204_v20 = vrot.slane %v8775_v50, 4  ;;  %v2632_v50 = vld [vmem:[%s11308_s2] sm:$0x3] }
 0x1f1   : > { %6710 = vmatmul.mubr.msk.bf16.gmra.mrb[32].mxu0 %vm712_vm1, %v1800_v33  ;;  %v1778_v33 = vsel %vm1746_vm3, %v1745_v42, %v1714_v5  ;;  %v2235_v5 = vsel %vm2205_vm4, %v2174_v35, %v2175_v39  ;;  %v2186_v42 = vrot.slane %v9181_v6, 4  ;;  %v2189_v35 = vrot.slane %v9199_v32, 4 }
 0x1f2   : > { %2038 = vmatprep.mubr.bf16.mxu0 %v11333_v2  ;;  %v1807_v7 = vpack.c.bf16 %v1778_v33, %v1747_v30  ;;  %v2251_v51 = vpack.c.bf16 %v2235_v5, %v2236_v36  ;;  %v2187_v30 = vrot.slane %v9185_v3, 4  ;;  %v2191_v5 = vrot.slane %v9213_v29, 4 }
 0x1f3   : > { %v2224_v53 = vsel %vm2205_vm4, %v2185_v28, %v2186_v42 }
 0x1f4   : > { %v2223_v49 = vsel %vm2205_vm4, %v2186_v42, %v2187_v30 }
 0x1f5   : > { %v2257_v33 = vpack.c.bf16 %v2223_v49, %v2224_v53 }
 0x1f9   : > { %6711 = vmatmul.mubr.msk.bf16.gmra.mrb[36].mxu0 %vm712_vm1, %v1801_v41  ;;  %v8049_v41 = vld [vmem:[%s11309_s3] sm:$0xff]  }
 0x1fa   : > { %2048 = vmatprep.mubr.bf16.mxu0 %v11333_v2  ;;  %2950 = vmatpush1.bf16.msra.mxu1 %v8049_v41  ;;  %v2190_v41 = vrot.slane %v9209_v47, 4 }
 0x1fb   : > { %2951 = vmatprep.subr.bf16.mxu1 %v11333_v2 }
 0x1fc   : > { %v2220_v32 = vsel %vm2205_vm4, %v2189_v35, %v2190_v41 }
 0x1fe   : > { %2952 = vmatpush1.bf16.msra.mxu1 %v8050_v40  ;;  %v2192_v40 = vrot.slane %v9223_v43, 4 }
 0x1ff   : > { %2953 = vmatprep.subr.bf16.mxu1 %v11333_v2 }
 0x200   : > { %v2218_v29 = vsel %vm2205_vm4, %v2191_v5, %v2192_v40 }
 0x201   : > { %6712 = vmatmul.mubr.msk.bf16.gmra.mrb[40].mxu0 %vm712_vm1, %v1802_v16  ;;  %v2233_v16 = vsel %vm2205_vm4, %v2176_v56, %v2177_v57  ;;  %v2194_v57 = vrot.slane %v9237_v45, 4 }
 0x202   : > { %2058 = vmatprep.mubr.bf16.mxu0 %v11333_v2  ;;  %2954 = vmatpush1.bf16.msra.mxu1 %v8051_v60  ;;  %v2252_v54 = vpack.c.bf16 %v2233_v16, %v2234_v12  ;;  %v2195_v60 = vrot.slane %v9241_v55, 4  ;;  %v2196_v12 = vrot.slane %v9251_v11, 4  ;;  %v8274_v11 = vld [vmem:[%s8501_s18 + $0xc8] sm:$0xff] }
 0x203   : > { %2955 = vmatprep.subr.bf16.mxu1 %v11333_v2 }
 0x204   : > { %v2215_v43 = vsel %vm2205_vm4, %v2194_v57, %v2195_v60  ;;  %v2214_v55 = vsel %vm2205_vm4, %v2195_v60, %v2196_v12 }
 0x206   : > { %2956 = vmatpush1.bf16.msra.mxu1 %v8052_v52  ;;  %v2197_v52 = vrot.slane %v9255_v61, 4  ;;  %v2198_v61 = vrot.slane %v8274_v11, 4 }
 0x207   : > { %2957 = vmatprep.subr.bf16.mxu1 %v11333_v2 }
 0x208   : > { %v2213_v45 = vsel %vm2205_vm4, %v2196_v12, %v2197_v52 }
 0x209   : > { %6713 = vmatmul.mubr.msk.bf16.gmra.mrb[44].mxu0 %vm712_vm1, %v1803_v1  ;;  %v2231_v1 = vsel %vm2205_vm4, %v2178_v63, %v2179_v23  ;;  %v2262_v63 = vpack.c.bf16 %v2213_v45, %v2214_v55  ;;  %v8275_v23 = vld [vmem:[%s8501_s18 + $0xd0] sm:$0xff] }
 0x20a   : > { %2068 = vmatprep.mubr.bf16.mxu0 %v11333_v2  ;;  %2958 = vmatpush1.bf16.msra.mxu1 %v8053_v0  ;;  %v2253_v13 = vpack.c.bf16 %v2231_v1, %v2232_v27  ;;  %v2199_v0 = vrot.slane %v8275_v23, 4  ;;  %v8059_v1 = vld [vmem:[%s11309_s3 + $0x50] sm:$0xff]  }
 0x20b   : > { %2959 = vmatprep.subr.bf16.mxu1 %v11333_v2 }
 0x20c   : > { %v2211_v27 = vsel %vm2205_vm4, %v2198_v61, %v2199_v0 }
 0x20e   : > { %2960 = vmatpush1.bf16.msra.mxu1 %v8054_v62  ;;  %v2212_v62 = vsel %vm2205_vm4, %v2197_v52, %v2198_v61 }
 0x20f   : > { %2961 = vmatprep.subr.bf16.mxu1 %v11333_v2 }
 0x211   : > { %6714 = vmatmul.mubr.msk.bf16.gmra.mrb[48].mxu0 %vm712_vm1, %v1804_v4  ;;  %v2229_v4 = vsel %vm2205_vm4, %v2180_v24, %v2181_v17  ;;  %v2263_v24 = vpack.c.bf16 %v2211_v27, %v2212_v62  ;;  %v8276_v17 = vld [vmem:[%s8501_s18 + $0xd8] sm:$0xff] }
 0x212   : > { %2078 = vmatprep.mubr.bf16.mxu0 %v11333_v2  ;;  %2962 = vmatpush1.bf16.msra.mxu1 %v8055_v18  ;;  %v2254_v21 = vpack.c.bf16 %v2229_v4, %v2230_v22  ;;  %v2200_v18 = vrot.slane %v8276_v17, 4  ;;  %v8277_v4 = vld [vmem:[%s8501_s18 + $0xe0] sm:$0xff]  ;;  %s6567_s18 = sshll.u32 %s486_s16, 3 }
 0x213   : > { %2963 = vmatprep.subr.bf16.mxu1 %v11333_v2  ;;  %v2201_v22 = vrot.slane %v8277_v4, 4  ;;  %s488_s29 = scalar_lea.vmem [#allocation2], %s6567_s18  ;;  %s8345_s18 = smov [#allocation2]  }
 0x214   : > { %s6504_s20 = sshll.u32 %s488_s29, 4  ;;  %s8282_s17 = sshll.u32 %s8345_s18, 4  ;;  %s11266_s20 = int_to_ptr.vmem [resolvable:$true] %s6504_s20  ;;  %s8283_s17 = int_to_ptr.vmem [resolvable:$false] %s8282_s17 }
 0x215   : > { %s8278_s30 = scalar_lea.vmem %s11266_s20, 128  ;;  %s8284_s23 = scalar_lea.vmem %s8283_s17, 256 }
 0x216   : > { %2964 = vmatpush1.bf16.msra.mxu1 %v8056_v10  ;;  %v2209_v10 = vsel %vm2205_vm4, %v2200_v18, %v2201_v22  ;;  %p8279_p11 = scmp.ne.s32.totalorder %s11266_s20, %s8278_s30  ;;  %p8285_p0 = scmp.lt.s32.totalorder %s11266_s20, %s8283_s17 }
 0x217   : > { %2965 = vmatprep.subr.bf16.mxu1 %v11333_v2  ;;  %p8286_p1 = scmp.lt.s32.totalorder %s8284_s23, %s8278_s30 }
 0x218   : > { %p8280_p12 = pnand %p8279_p11, %p8464_p5 }
 0x219   : > { %6715 = vmatmul.mubr.msk.bf16.gmra.mrb[52].mxu0 %vm712_vm1, %v1805_v44  ;;  %v2227_v44 = vsel %vm2205_vm4, %v2182_v25, %v2183_v58  ;;  %v2202_v58 = vrot.slane %v8761_v37, 4  ;;  %p8287_p2 = por %p8286_p1, %p8285_p0 }
 0x21a   : > { %2088 = vmatprep.mubr.bf16.mxu0 %v11333_v2  ;;  %2966 = vmatpush1.bf16.msra.mxu1 %v8057_v59  ;;  %v2255_v15 = vpack.c.bf16 %v2227_v44, %v2228_v46  ;;  %v2203_v59 = vrot.slane %v8764_v38, 4  ;;  %v2237_v38 = vsel %vm2205_vm4, %v2204_v20, %v2173_v34  ;;  %p8281_p13 = pneg %p8280_p12 }
 0x21b   : > { %2967 = vmatprep.subr.bf16.mxu1 %v11333_v2  ;;  %v2208_v46 = vsel %vm2205_vm4, %v2201_v22, %v2202_v58 }
 0x21c   : > { %v2207_v44 = vsel %vm2205_vm4, %v2202_v58, %v2203_v59  ;;  %v2206_v37 = vsel %vm2205_vm4, %v2203_v59, %v2204_v20  ;;  %p8288_p3 = pnand %p8287_p2, %p8281_p13 }
 0x21d   : > { %v2266_v28 = vpack.c.bf16 %v2237_v38, %v2206_v37  ;;  %v8066_v38 = vld [vmem:[%s11309_s3 + $0x88] sm:$0xff]  }
 0x221   : > { %6716 = vmatmul.mubr.msk.bf16.gmra.mrb[56].mxu0 %vm712_vm1, %v1806_v48  ;;  %v2256_v48 = vpack.c.bf16 %v2225_v8, %v2226_v9  ;;  %v11328_v8 = vsub.s32 0, %v8518_v14  ;;  %v11327_v9 = vsub.s32 1, %v8518_v14 }
 0x222   : > { %2098 = vmatprep.mubr.bf16.mxu0 %v11333_v2 }
 0x223   : > { %v9490_v26 = vrot.slane %v2632_v50, %v11327_v9 }
 0x229   : > { %6717 = vmatmul.mubr.msk.bf16.gmra.mrb[60].mxu0 %vm712_vm1, %v1807_v7  ;;  %v2188_v7 = vrot.slane %v9195_v31, 4  ;;  %v2219_v31 = vsel %vm2205_vm4, %v2190_v41, %v2191_v5 }
 0x22a   : > { %2407 = vmatprep.mubr.bf16.mxu0 %v11333_v2  ;;  %v2259_v36 = vpack.c.bf16 %v2219_v31, %v2220_v32 }
 0x22b   : > { %v2221_v6 = vsel %vm2205_vm4, %v2188_v7, %v2189_v35  ;;  %v2222_v3 = vsel %vm2205_vm4, %v2187_v30, %v2188_v7 }
 0x22c   : > { %v2258_v39 = vpack.c.bf16 %v2221_v6, %v2222_v3 }
 0x231   : > { %6742 = vmatmul.mubr.msk.bf16.vlgmr.msra.gmra.mrb[0].mxu0 %vm712_vm1, %v2251_v51  ;;  %v2193_v51 = vrot.slane %v9227_v19, 4 }
 0x232   : > { %2417 = vmatprep.mubr.bf16.mxu0 %v11333_v2 }
 0x233   : > { %v2217_v47 = vsel %vm2205_vm4, %v2192_v40, %v2193_v51  ;;  %v2216_v19 = vsel %vm2205_vm4, %v2193_v51, %v2194_v57 }
 0x234   : > { %v2260_v56 = vpack.c.bf16 %v2217_v47, %v2218_v29  ;;  %v2261_v16 = vpack.c.bf16 %v2215_v43, %v2216_v19  ;;  %v8062_v43 = vld [vmem:[%s11309_s3 + $0x68] sm:$0xff]  }
 0x239   : > { %6743 = vmatmul.mubr.msk.bf16.gmra.mrb[4].mxu0 %vm712_vm1, %v2252_v54  ;;  %v8058_v54 = vld [vmem:[%s11309_s3 + $0x48] sm:$0xff]  }
 0x23a   : > { %2427 = vmatprep.mubr.bf16.mxu0 %v11333_v2  ;;  %2968 = vmatpush1.bf16.msra.mxu1 %v8058_v54 }
 0x23b   : > { %2969 = vmatprep.subr.bf16.mxu1 %v11333_v2 }
 0x23e   : > { %2970 = vmatpush1.bf16.msra.mxu1 %v8059_v1 }
 0x23f   : > { %2971 = vmatprep.subr.bf16.mxu1 %v11333_v2 }
 0x241   : > { %6744 = vmatmul.mubr.msk.bf16.gmra.mrb[8].mxu0 %vm712_vm1, %v2253_v13  ;;  %v8060_v13 = vld [vmem:[%s11309_s3 + $0x58] sm:$0xff]  }
 0x242   : > { %2437 = vmatprep.mubr.bf16.mxu0 %v11333_v2  ;;  %2972 = vmatpush1.bf16.msra.mxu1 %v8060_v13  ;;  %v8064_v13 = vld [vmem:[%s11309_s3 + $0x78] sm:$0xff]  }
 0x243   : > { %3207 = vmatprep.subr.bf16.mxu1 %v11333_v2 }
 0x249   : > { %6745 = vmatmul.mubr.msk.bf16.gmra.mrb[12].mxu0 %vm712_vm1, %v2254_v21  ;;  %v2210_v21 = vsel %vm2205_vm4, %v2199_v0, %v2200_v18 }
 0x24a   : > { %2447 = vmatprep.mubr.bf16.mxu0 %v11333_v2  ;;  %v2264_v25 = vpack.c.bf16 %v2209_v10, %v2210_v21 }
 0x251   : > { %6746 = vmatmul.mubr.msk.bf16.gmra.mrb[16].mxu0 %vm712_vm1, %v2255_v15  ;;  %v2265_v15 = vpack.c.bf16 %v2207_v44, %v2208_v46 }
 0x252   : > { %2457 = vmatprep.mubr.bf16.mxu0 %v11333_v2 }
 0x259   : > { %6747 = vmatmul.mubr.msk.bf16.gmra.mrb[20].mxu0 %vm712_vm1, %v2256_v48  ;;  %v9486_v48 = vrot.slane %v2632_v50, %v11328_v8  ;;  %v8133_v8 = vld [vmem:[%s11311_s5 + $0xb4] ss:$8 sps:$4 sm:$0xff]  }
 0x25a   : > { %2467 = vmatprep.mubr.bf16.mxu0 %v11333_v2 }
 0x261   : > { %6748 = vmatmul.mubr.msk.bf16.gmra.mrb[24].mxu0 %vm712_vm1, %v2257_v33 }
 0x262   : > { %2477 = vmatprep.mubr.bf16.mxu0 %v11333_v2 }
 0x269   : > { %6749 = vmatmul.mubr.msk.bf16.gmra.mrb[28].mxu0 %vm712_vm1, %v2258_v39 }
 0x26a   : > { %2487 = vmatprep.mubr.bf16.mxu0 %v11333_v2 }
 0x271   : > { %6750 = vmatmul.mubr.msk.bf16.gmra.mrb[32].mxu0 %vm712_vm1, %v2259_v36  ;;  %v8061_v36 = vld [vmem:[%s11309_s3 + $0x60] sm:$0xff]  }
 0x272   : > { %2497 = vmatprep.mubr.bf16.mxu0 %v11333_v2 }
 0x279   : > { %6751 = vmatmul.mubr.msk.bf16.gmra.mrb[36].mxu0 %vm712_vm1, %v2260_v56 }
 0x27a   : > { %2507 = vmatprep.mubr.bf16.mxu0 %v11333_v2 }
 0x281   : > { %6752 = vmatmul.mubr.msk.bf16.gmra.mrb[40].mxu0 %vm712_vm1, %v2261_v16 }
 0x282   : > { %2517 = vmatprep.mubr.bf16.mxu0 %v11333_v2 }
 0x289   : > { %6753 = vmatmul.mubr.msk.bf16.gmra.mrb[44].mxu0 %vm712_vm1, %v2262_v63  ;;  %v8063_v63 = vld [vmem:[%s11309_s3 + $0x70] sm:$0xff]  }
 0x28a   : > { %2527 = vmatprep.mubr.bf16.mxu0 %v11333_v2 }
 0x291   : > { %6754 = vmatmul.mubr.msk.bf16.gmra.mrb[48].mxu0 %vm712_vm1, %v2263_v24 }
 0x292   : > { %2537 = vmatprep.mubr.bf16.mxu0 %v11333_v2 }
 0x299   : > { %6755 = vmatmul.mubr.msk.bf16.gmra.mrb[52].mxu0 %vm712_vm1, %v2264_v25  ;;  %v8065_v25 = vld [vmem:[%s11309_s3 + $0x80] sm:$0xff]  }
 0x29a   : > { %2547 = vmatprep.mubr.bf16.mxu0 %v11333_v2 }
 0x2a1   : > { %6756 = vmatmul.mubr.msk.bf16.gmra.mrb[56].mxu0 %vm712_vm1, %v2265_v15 }
 0x2a2   : > { %2557 = vmatprep.mubr.bf16.mxu0 %v11333_v2 }
 0x2a9   : > { %6757 = vmatmul.mubr.msk.bf16.gmra.mrb[60].mxu0 %vm712_vm1, %v2266_v28 }
 0x304   : > { %v2409_v34 = vpop.f32.mrb[0].mxu0 }
 0x305   : > { %v2644_v42 = vadd.f32 %v9486_v48, %v2409_v34  ;;  %v2411_v30 = vpop.f32.mrb[1].mxu0 }
 0x306   : > { %v2645_v49 = vadd.f32 %v9490_v26, %v2411_v30  ;;  %v2413_v53 = vpop.f32.mrb[2].mxu0 }
 0x307   : > { %v2646_v33 = vadd.f32 %v9486_v48, %v2413_v53  ;;  %v2415_v7 = vpop.f32.mrb[3].mxu0  ;;  %v2708_v6 = vmax.f32 %v2644_v42, 0.0 }
 0x308   : > { %v2647_v35 = vadd.f32 %v9490_v26, %v2415_v7  ;;  %v2709_v39 = vmax.f32 %v2645_v49, 0.0 }
 0x309   : > { %v2710_v3 = vmax.f32 %v2646_v33, 0.0  ;;  %v8067_v33 = vld [vmem:[%s11309_s3 + $0x90] sm:$0xff]  }
 0x30a   : > { %v2711_v41 = vmax.f32 %v2647_v35, 0.0 }
 0x30b   : > { %v9496_v5 = vpack.c.bf16 %v2710_v3, %v2708_v6 }
 0x30c   : > { %v2419_v31 = vpop.f32.mrb[4].mxu0  ;;  %v9498_v32 = vpack.c.bf16 %v2711_v41, %v2709_v39 }
 0x30d   : > { %v2648_v40 = vadd.f32 %v9486_v48, %v2419_v31  ;;  %v2421_v51 = vpop.f32.mrb[5].mxu0 }
 0x30e   : > { %v2649_v47 = vadd.f32 %v9490_v26, %v2421_v51  ;;  %v2423_v29 = vpop.f32.mrb[6].mxu0  ;;  %6770 = vmatprep.mubr.msk.bf16.mxu1 %vm2900_vm5, %v9498_v32 }
 0x30f   : > { %v2650_v56 = vadd.f32 %v9486_v48, %v2423_v29  ;;  %v2425_v57 = vpop.f32.mrb[7].mxu0  ;;  %2982 = vmatmul.mubr.bf16.vlgmr.msra.gmra.mrb[0].mxu1 %v9496_v5  ;;  %v2712_v19 = vmax.f32 %v2648_v40, 0.0 }
 0x310   : > { %v2651_v60 = vadd.f32 %v9490_v26, %v2425_v57  ;;  %3208 = vmatpush1.bf16.msra.mxu1 %v8061_v36  ;;  %v2713_v12 = vmax.f32 %v2649_v47, 0.0  ;;  %v8068_v36 = vld [vmem:[%s11309_s3 + $0x98] sm:$0xff]  }
 0x311   : > { %v2714_v16 = vmax.f32 %v2650_v56, 0.0  ;;  %3209 = vmatprep.subr.bf16.mxu1 %v11333_v2 }
 0x312   : > { %v2715_v52 = vmax.f32 %v2651_v60, 0.0 }
 0x313   : > { %v9514_v45 = vpack.c.bf16 %v2714_v16, %v2712_v19 }
 0x314   : > { %v9516_v55 = vpack.c.bf16 %v2715_v52, %v2713_v12  ;;  %v2429_v54 = vpop.f32.mrb[8].mxu0  ;;  %3210 = vmatpush1.bf16.msra.mxu1 %v8062_v43  ;;  %v8069_v43 = vld [vmem:[%s11309_s3 + $0xa0] sm:$0xff]  }
 0x315   : > { %v2652_v11 = vadd.f32 %v9486_v48, %v2429_v54  ;;  %v2431_v61 = vpop.f32.mrb[9].mxu0  ;;  %3211 = vmatprep.subr.bf16.mxu1 %v11333_v2 }
 0x316   : > { %v2653_v23 = vadd.f32 %v9490_v26, %v2431_v61  ;;  %v2433_v0 = vpop.f32.mrb[10].mxu0  ;;  %6771 = vmatprep.mubr.msk.bf16.mxu1 %vm2900_vm5, %v9516_v55  ;;  %v8070_v61 = vld [vmem:[%s11309_s3 + $0xa8] sm:$0xff]  }
 0x317   : > { %v2654_v1 = vadd.f32 %v9486_v48, %v2433_v0  ;;  %v2435_v27 = vpop.f32.mrb[11].mxu0  ;;  %2990 = vmatmul.mubr.bf16.gmra.mrb[4].mxu1 %v9514_v45  ;;  %v2716_v24 = vmax.f32 %v2652_v11, 0.0 }
 0x318   : > { %v2655_v62 = vadd.f32 %v9490_v26, %v2435_v27  ;;  %3212 = vmatpush1.bf16.msra.mxu1 %v8063_v63  ;;  %v2717_v18 = vmax.f32 %v2653_v23, 0.0 }
 0x319   : > { %v2718_v17 = vmax.f32 %v2654_v1, 0.0  ;;  %3213 = vmatprep.subr.bf16.mxu1 %v11333_v2 }
 0x31a   : > { %v2719_v4 = vmax.f32 %v2655_v62, 0.0 }
 0x31b   : > { %v9533_v22 = vpack.c.bf16 %v2718_v17, %v2716_v24  ;;  %v8071_v17 = vld [vmem:[%s11309_s3 + $0xb0] sm:$0xff]  }
 0x31c   : > { %v9535_v10 = vpack.c.bf16 %v2719_v4, %v2717_v18  ;;  %v2439_v21 = vpop.f32.mrb[12].mxu0  ;;  %3214 = vmatpush1.bf16.msra.mxu1 %v8064_v13 }
 0x31d   : > { %v2656_v58 = vadd.f32 %v9486_v48, %v2439_v21  ;;  %v2441_v59 = vpop.f32.mrb[13].mxu0  ;;  %3215 = vmatprep.subr.bf16.mxu1 %v11333_v2 }
 0x31e   : > { %v2657_v44 = vadd.f32 %v9490_v26, %v2441_v59  ;;  %v2443_v46 = vpop.f32.mrb[14].mxu0  ;;  %6772 = vmatprep.mubr.msk.bf16.mxu1 %vm2900_vm5, %v9535_v10 }
 0x31f   : > { %v2658_v15 = vadd.f32 %v9486_v48, %v2443_v46  ;;  %v2445_v20 = vpop.f32.mrb[15].mxu0  ;;  %2998 = vmatmul.mubr.bf16.gmra.mrb[8].mxu1 %v9533_v22  ;;  %v2720_v28 = vmax.f32 %v2656_v58, 0.0  ;;  %v8072_v46 = vld [vmem:[%s11309_s3 + $0xb8] sm:$0xff]  }
 0x320   : > { %v2659_v37 = vadd.f32 %v9490_v26, %v2445_v20  ;;  %3216 = vmatpush1.bf16.msra.mxu1 %v8065_v25  ;;  %v2721_v34 = vmax.f32 %v2657_v44, 0.0 }
 0x321   : > { %v2722_v50 = vmax.f32 %v2658_v15, 0.0  ;;  %3217 = vmatprep.subr.bf16.mxu1 %v11333_v2 }
 0x322   : > { %v2723_v42 = vmax.f32 %v2659_v37, 0.0 }
 0x323   : > { %v9552_v30 = vpack.c.bf16 %v2722_v50, %v2720_v28 }
 0x324   : > { %v9554_v49 = vpack.c.bf16 %v2723_v42, %v2721_v34  ;;  %v2449_v53 = vpop.f32.mrb[16].mxu0  ;;  %3218 = vmatpush1.bf16.msra.mxu1 %v8066_v38 }
 0x325   : > { %v2660_v7 = vadd.f32 %v9486_v48, %v2449_v53  ;;  %v2451_v35 = vpop.f32.mrb[17].mxu0  ;;  %3219 = vmatprep.subr.bf16.mxu1 %v11333_v2 }
 0x326   : > { %v2661_v6 = vadd.f32 %v9490_v26, %v2451_v35  ;;  %v2453_v3 = vpop.f32.mrb[18].mxu0  ;;  %6773 = vmatprep.mubr.msk.bf16.mxu1 %vm2900_vm5, %v9554_v49 }
 0x327   : > { %v2662_v39 = vadd.f32 %v9486_v48, %v2453_v3  ;;  %v2455_v41 = vpop.f32.mrb[19].mxu0  ;;  %3006 = vmatmul.mubr.bf16.gmra.mrb[12].mxu1 %v9552_v30  ;;  %v2724_v40 = vmax.f32 %v2660_v7, 0.0 }
 0x328   : > { %v2663_v31 = vadd.f32 %v9490_v26, %v2455_v41  ;;  %3220 = vmatpush1.bf16.msra.mxu1 %v8067_v33  ;;  %v2725_v47 = vmax.f32 %v2661_v6, 0.0 }
 0x329   : > { %v2726_v51 = vmax.f32 %v2662_v39, 0.0  ;;  %3221 = vmatprep.subr.bf16.mxu1 %v11333_v2 }
 0x32a   : > { %v2727_v29 = vmax.f32 %v2663_v31, 0.0 }
 0x32b   : > { %v9571_v56 = vpack.c.bf16 %v2726_v51, %v2724_v40 }
 0x32c   : > { %v9573_v57 = vpack.c.bf16 %v2727_v29, %v2725_v47  ;;  %v2459_v60 = vpop.f32.mrb[20].mxu0  ;;  %3222 = vmatpush1.bf16.msra.mxu1 %v8068_v36 }
 0x32d   : > { %v2664_v19 = vadd.f32 %v9486_v48, %v2459_v60  ;;  %v2461_v16 = vpop.f32.mrb[21].mxu0  ;;  %3223 = vmatprep.subr.bf16.mxu1 %v11333_v2 }
 0x32e   : > { %v2665_v12 = vadd.f32 %v9490_v26, %v2461_v16  ;;  %v2463_v52 = vpop.f32.mrb[22].mxu0  ;;  %6774 = vmatprep.mubr.msk.bf16.mxu1 %vm2900_vm5, %v9573_v57 }
 0x32f   : > { %v2666_v54 = vadd.f32 %v9486_v48, %v2463_v52  ;;  %v2465_v63 = vpop.f32.mrb[23].mxu0  ;;  %3014 = vmatmul.mubr.bf16.gmra.mrb[16].mxu1 %v9571_v56  ;;  %v2728_v23 = vmax.f32 %v2664_v19, 0.0 }
 0x330   : > { %v2667_v11 = vadd.f32 %v9490_v26, %v2465_v63  ;;  %3224 = vmatpush1.bf16.msra.mxu1 %v8069_v43  ;;  %v2729_v1 = vmax.f32 %v2665_v12, 0.0 }
 0x331   : > { %v2730_v0 = vmax.f32 %v2666_v54, 0.0  ;;  %3225 = vmatprep.subr.bf16.mxu1 %v11333_v2 }
 0x332   : > { %v2731_v27 = vmax.f32 %v2667_v11, 0.0 }
 0x333   : > { %v9590_v62 = vpack.c.bf16 %v2730_v0, %v2728_v23 }
 0x334   : > { %v9592_v13 = vpack.c.bf16 %v2731_v27, %v2729_v1  ;;  %v2469_v24 = vpop.f32.mrb[24].mxu0  ;;  %3226 = vmatpush1.bf16.msra.mxu1 %v8070_v61 }
 0x335   : > { %v2668_v18 = vadd.f32 %v9486_v48, %v2469_v24  ;;  %v2471_v4 = vpop.f32.mrb[25].mxu0  ;;  %3227 = vmatprep.subr.bf16.mxu1 %v11333_v2 }
 0x336   : > { %v2669_v21 = vadd.f32 %v9490_v26, %v2471_v4  ;;  %v2473_v25 = vpop.f32.mrb[26].mxu0  ;;  %6775 = vmatprep.mubr.msk.bf16.mxu1 %vm2900_vm5, %v9592_v13 }
 0x337   : > { %v2670_v58 = vadd.f32 %v9486_v48, %v2473_v25  ;;  %v2475_v59 = vpop.f32.mrb[27].mxu0  ;;  %3022 = vmatmul.mubr.bf16.gmra.mrb[20].mxu1 %v9590_v62  ;;  %v2732_v15 = vmax.f32 %v2668_v18, 0.0 }
 0x338   : > { %v2671_v44 = vadd.f32 %v9490_v26, %v2475_v59  ;;  %3228 = vmatpush1.bf16.msra.mxu1 %v8071_v17  ;;  %v2733_v37 = vmax.f32 %v2669_v21, 0.0 }
 0x339   : > { %v2734_v20 = vmax.f32 %v2670_v58, 0.0  ;;  %3229 = vmatprep.subr.bf16.mxu1 %v11333_v2 }
 0x33a   : > { %v2735_v38 = vmax.f32 %v2671_v44, 0.0 }
 0x33b   : > { %v9609_v28 = vpack.c.bf16 %v2734_v20, %v2732_v15 }
 0x33c   : > { %v9611_v50 = vpack.c.bf16 %v2735_v38, %v2733_v37  ;;  %v2479_v34 = vpop.f32.mrb[28].mxu0  ;;  %3230 = vmatpush1.bf16.msra.mxu1 %v8072_v46 }
 0x33d   : > { %v2672_v42 = vadd.f32 %v9486_v48, %v2479_v34  ;;  %v2481_v53 = vpop.f32.mrb[29].mxu0 }
 0x33e   : > { %v2673_v33 = vadd.f32 %v9490_v26, %v2481_v53  ;;  %v2483_v7 = vpop.f32.mrb[30].mxu0  ;;  %6776 = vmatprep.mubr.msk.bf16.mxu1 %vm2900_vm5, %v9611_v50 }
 0x33f   : > { %v2674_v35 = vadd.f32 %v9486_v48, %v2483_v7  ;;  %v2485_v6 = vpop.f32.mrb[31].mxu0  ;;  %3030 = vmatmul.mubr.bf16.gmra.mrb[24].mxu1 %v9609_v28  ;;  %v2736_v39 = vmax.f32 %v2672_v42, 0.0 }
 0x340   : > { %v2675_v3 = vadd.f32 %v9490_v26, %v2485_v6  ;;  %v2737_v31 = vmax.f32 %v2673_v33, 0.0 }
 0x341   : > { %v2738_v41 = vmax.f32 %v2674_v35, 0.0 }
 0x342   : > { %v2739_v36 = vmax.f32 %v2675_v3, 0.0 }
 0x343   : > { %v9620_v40 = vpack.c.bf16 %v2738_v41, %v2736_v39 }
 0x344   : > { %v9622_v51 = vpack.c.bf16 %v2739_v36, %v2737_v31  ;;  %v2489_v47 = vpop.f32.mrb[32].mxu0 }
 0x345   : > { %v2676_v29 = vadd.f32 %v9486_v48, %v2489_v47  ;;  %v2491_v60 = vpop.f32.mrb[33].mxu0 }
 0x346   : > { %v2677_v43 = vadd.f32 %v9490_v26, %v2491_v60  ;;  %v2493_v19 = vpop.f32.mrb[34].mxu0  ;;  %6777 = vmatprep.mubr.msk.bf16.mxu1 %vm2900_vm5, %v9622_v51 }
 0x347   : > { %v2678_v16 = vadd.f32 %v9486_v48, %v2493_v19  ;;  %v2495_v12 = vpop.f32.mrb[35].mxu0  ;;  %3038 = vmatmul.mubr.bf16.gmra.mrb[28].mxu1 %v9620_v40  ;;  %v2740_v54 = vmax.f32 %v2676_v29, 0.0 }
 0x348   : > { %v2679_v52 = vadd.f32 %v9490_v26, %v2495_v12  ;;  %v2741_v11 = vmax.f32 %v2677_v43, 0.0 }
 0x349   : > { %v2742_v63 = vmax.f32 %v2678_v16, 0.0 }
 0x34a   : > { %v2743_v61 = vmax.f32 %v2679_v52, 0.0 }
 0x34b   : > { %v9631_v23 = vpack.c.bf16 %v2742_v63, %v2740_v54 }
 0x34c   : > { %v9633_v0 = vpack.c.bf16 %v2743_v61, %v2741_v11  ;;  %v2499_v1 = vpop.f32.mrb[36].mxu0 }
 0x34d   : > { %v2680_v27 = vadd.f32 %v9486_v48, %v2499_v1  ;;  %v2501_v24 = vpop.f32.mrb[37].mxu0 }
 0x34e   : > { %v2681_v17 = vadd.f32 %v9490_v26, %v2501_v24  ;;  %v2503_v18 = vpop.f32.mrb[38].mxu0  ;;  %6778 = vmatprep.mubr.msk.bf16.mxu1 %vm2900_vm5, %v9633_v0 }
 0x34f   : > { %v2682_v4 = vadd.f32 %v9486_v48, %v2503_v18  ;;  %v2505_v21 = vpop.f32.mrb[39].mxu0  ;;  %3046 = vmatmul.mubr.bf16.gmra.mrb[32].mxu1 %v9631_v23  ;;  %v2744_v58 = vmax.f32 %v2680_v27, 0.0 }
 0x350   : > { %v2683_v25 = vadd.f32 %v9490_v26, %v2505_v21  ;;  %v2745_v44 = vmax.f32 %v2681_v17, 0.0 }
 0x351   : > { %v2746_v59 = vmax.f32 %v2682_v4, 0.0 }
 0x352   : > { %v2747_v46 = vmax.f32 %v2683_v25, 0.0 }
 0x353   : > { %v9642_v15 = vpack.c.bf16 %v2746_v59, %v2744_v58 }
 0x354   : > { %v9644_v20 = vpack.c.bf16 %v2747_v46, %v2745_v44  ;;  %v2509_v37 = vpop.f32.mrb[40].mxu0 }
 0x355   : > { %v2684_v38 = vadd.f32 %v9486_v48, %v2509_v37  ;;  %v2511_v34 = vpop.f32.mrb[41].mxu0 }
 0x356   : > { %v2685_v42 = vadd.f32 %v9490_v26, %v2511_v34  ;;  %v2513_v53 = vpop.f32.mrb[42].mxu0  ;;  %6779 = vmatprep.mubr.msk.bf16.mxu1 %vm2900_vm5, %v9644_v20 }
 0x357   : > { %v2686_v33 = vadd.f32 %v9486_v48, %v2513_v53  ;;  %v2515_v7 = vpop.f32.mrb[43].mxu0  ;;  %3054 = vmatmul.mubr.bf16.gmra.mrb[36].mxu1 %v9642_v15  ;;  %v2748_v6 = vmax.f32 %v2684_v38, 0.0 }
 0x358   : > { %v2687_v35 = vadd.f32 %v9490_v26, %v2515_v7  ;;  %v2749_v39 = vmax.f32 %v2685_v42, 0.0 }
 0x359   : > { %v2750_v3 = vmax.f32 %v2686_v33, 0.0 }
 0x35a   : > { %v2751_v41 = vmax.f32 %v2687_v35, 0.0 }
 0x35b   : > { %v9653_v31 = vpack.c.bf16 %v2750_v3, %v2748_v6 }
 0x35c   : > { %v9655_v36 = vpack.c.bf16 %v2751_v41, %v2749_v39  ;;  %v2519_v47 = vpop.f32.mrb[44].mxu0 }
 0x35d   : > { %v2688_v29 = vadd.f32 %v9486_v48, %v2519_v47  ;;  %v2521_v60 = vpop.f32.mrb[45].mxu0 }
 0x35e   : > { %v2689_v43 = vadd.f32 %v9490_v26, %v2521_v60  ;;  %v2523_v19 = vpop.f32.mrb[46].mxu0  ;;  %6780 = vmatprep.mubr.msk.bf16.mxu1 %vm2900_vm5, %v9655_v36 }
 0x35f   : > { %v2690_v16 = vadd.f32 %v9486_v48, %v2523_v19  ;;  %v2525_v12 = vpop.f32.mrb[47].mxu0  ;;  %3062 = vmatmul.mubr.bf16.gmra.mrb[40].mxu1 %v9653_v31  ;;  %v2752_v54 = vmax.f32 %v2688_v29, 0.0 }
 0x360   : > { %v2691_v52 = vadd.f32 %v9490_v26, %v2525_v12  ;;  %v2753_v11 = vmax.f32 %v2689_v43, 0.0 }
 0x361   : > { %v2754_v63 = vmax.f32 %v2690_v16, 0.0 }
 0x362   : > { %v2755_v61 = vmax.f32 %v2691_v52, 0.0 }
 0x363   : > { %v9664_v1 = vpack.c.bf16 %v2754_v63, %v2752_v54 }
 0x364   : > { %v9666_v27 = vpack.c.bf16 %v2755_v61, %v2753_v11  ;;  %v2529_v24 = vpop.f32.mrb[48].mxu0 }
 0x365   : > { %v2692_v17 = vadd.f32 %v9486_v48, %v2529_v24  ;;  %v2531_v18 = vpop.f32.mrb[49].mxu0 }
 0x366   : > { %v2693_v4 = vadd.f32 %v9490_v26, %v2531_v18  ;;  %v2533_v21 = vpop.f32.mrb[50].mxu0  ;;  %6781 = vmatprep.mubr.msk.bf16.mxu1 %vm2900_vm5, %v9666_v27 }
 0x367   : > { %v2694_v25 = vadd.f32 %v9486_v48, %v2533_v21  ;;  %v2535_v58 = vpop.f32.mrb[51].mxu0  ;;  %3070 = vmatmul.mubr.bf16.gmra.mrb[44].mxu1 %v9664_v1  ;;  %v2756_v44 = vmax.f32 %v2692_v17, 0.0 }
 0x368   : > { %v2695_v59 = vadd.f32 %v9490_v26, %v2535_v58  ;;  %v2757_v37 = vmax.f32 %v2693_v4, 0.0 }
 0x369   : > { %v2758_v46 = vmax.f32 %v2694_v25, 0.0 }
 0x36a   : > { %v2759_v38 = vmax.f32 %v2695_v59, 0.0 }
 0x36b   : > { %v9675_v34 = vpack.c.bf16 %v2758_v46, %v2756_v44 }
 0x36c   : > { %v9677_v42 = vpack.c.bf16 %v2759_v38, %v2757_v37  ;;  %v2539_v53 = vpop.f32.mrb[52].mxu0 }
 0x36d   : > { %v2696_v33 = vadd.f32 %v9486_v48, %v2539_v53  ;;  %v2541_v7 = vpop.f32.mrb[53].mxu0 }
 0x36e   : > { %v2697_v35 = vadd.f32 %v9490_v26, %v2541_v7  ;;  %v2543_v6 = vpop.f32.mrb[54].mxu0  ;;  %6782 = vmatprep.mubr.msk.bf16.mxu1 %vm2900_vm5, %v9677_v42 }
 0x36f   : > { %v2698_v3 = vadd.f32 %v9486_v48, %v2543_v6  ;;  %v2545_v39 = vpop.f32.mrb[55].mxu0  ;;  %3078 = vmatmul.mubr.bf16.gmra.mrb[48].mxu1 %v9675_v34  ;;  %v2760_v47 = vmax.f32 %v2696_v33, 0.0 }
 0x370   : > { %v2699_v41 = vadd.f32 %v9490_v26, %v2545_v39  ;;  %v2761_v60 = vmax.f32 %v2697_v35, 0.0 }
 0x371   : > { %v2762_v29 = vmax.f32 %v2698_v3, 0.0 }
 0x372   : > { %v2763_v43 = vmax.f32 %v2699_v41, 0.0 }
 0x373   : > { %v9686_v19 = vpack.c.bf16 %v2762_v29, %v2760_v47 }
 0x374   : > { %v9688_v16 = vpack.c.bf16 %v2763_v43, %v2761_v60  ;;  %v2549_v12 = vpop.f32.mrb[56].mxu0 }
 0x375   : > { %v2700_v52 = vadd.f32 %v9486_v48, %v2549_v12  ;;  %v2551_v54 = vpop.f32.mrb[57].mxu0 }
 0x376   : > { %v2701_v63 = vadd.f32 %v9490_v26, %v2551_v54  ;;  %v2553_v11 = vpop.f32.mrb[58].mxu0  ;;  %6783 = vmatprep.mubr.msk.bf16.mxu1 %vm2900_vm5, %v9688_v16 }
 0x377   : > { %v2702_v61 = vadd.f32 %v9486_v48, %v2553_v11  ;;  %v2555_v24 = vpop.f32.mrb[59].mxu0  ;;  %3086 = vmatmul.mubr.bf16.gmra.mrb[52].mxu1 %v9686_v19  ;;  %v2764_v18 = vmax.f32 %v2700_v52, 0.0 }
 0x378   : > { %v2703_v17 = vadd.f32 %v9490_v26, %v2555_v24  ;;  %v2765_v21 = vmax.f32 %v2701_v63, 0.0 }
 0x379   : > { %v2766_v4 = vmax.f32 %v2702_v61, 0.0 }
 0x37a   : > { %v2767_v25 = vmax.f32 %v2703_v17, 0.0 }
 0x37b   : > { %v9697_v58 = vpack.c.bf16 %v2766_v4, %v2764_v18 }
 0x37c   : > { %v2825_v59 = vpack.c.bf16 %v2767_v25, %v2765_v21  ;;  %v2559_v44 = vpop.f32.mrb[60].mxu0 }
 0x37d   : > { %v2704_v46 = vadd.f32 %v9486_v48, %v2559_v44  ;;  %v2561_v37 = vpop.f32.mrb[61].mxu0 }
 0x37e   : > { %v2705_v38 = vadd.f32 %v9490_v26, %v2561_v37  ;;  %v2563_v53 = vpop.f32.mrb[62].mxu0  ;;  %6784 = vmatprep.mubr.msk.bf16.mxu1 %vm2900_vm5, %v2825_v59 }
 0x37f   : > { %v2706_v33 = vadd.f32 %v9486_v48, %v2563_v53  ;;  %v2565_v7 = vpop.f32.mrb[63].mxu0  ;;  %3094 = vmatmul.mubr.bf16.gmra.mrb[56].mxu1 %v9697_v58  ;;  %v2768_v6 = vmax.f32 %v2704_v46, 0.0 }
 0x380   : > { %v2707_v35 = vadd.f32 %v9490_v26, %v2565_v7  ;;  %v2769_v39 = vmax.f32 %v2705_v38, 0.0 }
 0x381   : > { %v2770_v3 = vmax.f32 %v2706_v33, 0.0 }
 0x382   : > { %v2771_v41 = vmax.f32 %v2707_v35, 0.0 }
 0x383   : > { %v2826_v47 = vpack.c.bf16 %v2770_v3, %v2768_v6 }
 0x384   : > { %v2827_v29 = vpack.c.bf16 %v2771_v41, %v2769_v39 }
 0x386   : > { %6785 = vmatprep.mubr.msk.bf16.mxu1 %vm2900_vm5, %v2827_v29 }
 0x387   : > { %3102 = vmatmul.mubr.bf16.gmra.mrb[60].mxu1 %v2826_v47 }
 0x388   : > { %6822 = vmatprep.mubr.msk.bf16.mxu1 %vm2900_vm5, %v9498_v32 }
 0x38f   : > { %3240 = vmatmul.mubr.bf16.vlgmr.msra.gmra.mrb[64].mxu1 %v9496_v5 }
 0x390   : > { %6823 = vmatprep.mubr.msk.bf16.mxu1 %vm2900_vm5, %v9516_v55 }
 0x397   : > { %3248 = vmatmul.mubr.bf16.gmra.mrb[68].mxu1 %v9514_v45 }
 0x398   : > { %6824 = vmatprep.mubr.msk.bf16.mxu1 %vm2900_vm5, %v9535_v10 }
 0x39f   : > { %3256 = vmatmul.mubr.bf16.gmra.mrb[72].mxu1 %v9533_v22 }
 0x3a0   : > { %6825 = vmatprep.mubr.msk.bf16.mxu1 %vm2900_vm5, %v9554_v49 }
 0x3a7   : > { %3264 = vmatmul.mubr.bf16.gmra.mrb[76].mxu1 %v9552_v30 }
 0x3a8   : > { %6826 = vmatprep.mubr.msk.bf16.mxu1 %vm2900_vm5, %v9573_v57 }
 0x3af   : > { %3272 = vmatmul.mubr.bf16.gmra.mrb[80].mxu1 %v9571_v56 }
 0x3b0   : > { %6827 = vmatprep.mubr.msk.bf16.mxu1 %vm2900_vm5, %v9592_v13 }
 0x3b7   : > { %3280 = vmatmul.mubr.bf16.gmra.mrb[84].mxu1 %v9590_v62 }
 0x3b8   : > { %6828 = vmatprep.mubr.msk.bf16.mxu1 %vm2900_vm5, %v9611_v50 }
 0x3bf   : > { %3288 = vmatmul.mubr.bf16.gmra.mrb[88].mxu1 %v9609_v28 }
 0x3c0   : > { %6829 = vmatprep.mubr.msk.bf16.mxu1 %vm2900_vm5, %v9622_v51 }
 0x3c7   : > { %3296 = vmatmul.mubr.bf16.gmra.mrb[92].mxu1 %v9620_v40 }
 0x3c8   : > { %6830 = vmatprep.mubr.msk.bf16.mxu1 %vm2900_vm5, %v9633_v0 }
 0x3cf   : > { %3304 = vmatmul.mubr.bf16.gmra.mrb[96].mxu1 %v9631_v23 }
 0x3d0   : > { %6831 = vmatprep.mubr.msk.bf16.mxu1 %vm2900_vm5, %v9644_v20 }
 0x3d7   : > { %3312 = vmatmul.mubr.bf16.gmra.mrb[100].mxu1 %v9642_v15 }
 0x3d8   : > { %6832 = vmatprep.mubr.msk.bf16.mxu1 %vm2900_vm5, %v9655_v36 }
 0x3df   : > { %3320 = vmatmul.mubr.bf16.gmra.mrb[104].mxu1 %v9653_v31 }
 0x3e0   : > { %6833 = vmatprep.mubr.msk.bf16.mxu1 %vm2900_vm5, %v9666_v27 }
 0x3e2   : > { %v9741_v48 = vpop.f32.mrb[0].mxu1 }
 0x3e3   : > { %v2985_v26 = vpop.f32.mrb[1].mxu1 }
 0x3e4   : > { %v9743_v5 = vpop.f32.mrb[2].mxu1 }
 0x3e5   : > { %v2988_v32 = vpop.f32.mrb[3].mxu1 }
 0x3e7   : > { %3328 = vmatmul.mubr.bf16.gmra.mrb[108].mxu1 %v9664_v1 }
 0x3e8   : > { %6834 = vmatprep.mubr.msk.bf16.mxu1 %vm2900_vm5, %v9677_v42 }
 0x3ea   : > { %v9748_v45 = vpop.f32.mrb[4].mxu1 }
 0x3eb   : > { %v2993_v55 = vpop.f32.mrb[5].mxu1 }
 0x3ec   : > { %v9750_v22 = vpop.f32.mrb[6].mxu1 }
 0x3ed   : > { %v2996_v10 = vpop.f32.mrb[7].mxu1 }
 0x3ef   : > { %3336 = vmatmul.mubr.bf16.gmra.mrb[112].mxu1 %v9675_v34 }
 0x3f0   : > { %6835 = vmatprep.mubr.msk.bf16.mxu1 %vm2900_vm5, %v9688_v16 }
 0x3f2   : > { %v9755_v30 = vpop.f32.mrb[8].mxu1 }
 0x3f3   : > { %v3001_v49 = vpop.f32.mrb[9].mxu1 }
 0x3f4   : > { %v9757_v56 = vpop.f32.mrb[10].mxu1 }
 0x3f5   : > { %v3004_v57 = vpop.f32.mrb[11].mxu1 }
 0x3f7   : > { %3344 = vmatmul.mubr.bf16.gmra.mrb[116].mxu1 %v9686_v19 }
 0x3f8   : > { %6836 = vmatprep.mubr.msk.bf16.mxu1 %vm2900_vm5, %v2825_v59 }
 0x3fa   : > { %v9761_v62 = vpop.f32.mrb[12].mxu1 }
 0x3fb   : > { %v3009_v13 = vpop.f32.mrb[13].mxu1 }
 0x3fc   : > { %v9763_v28 = vpop.f32.mrb[14].mxu1 }
 0x3fd   : > { %v3012_v50 = vpop.f32.mrb[15].mxu1 }
 0x3ff   : > { %3352 = vmatmul.mubr.bf16.gmra.mrb[120].mxu1 %v9697_v58 }
 0x400   : > { %6837 = vmatprep.mubr.msk.bf16.mxu1 %vm2900_vm5, %v2827_v29 }
 0x402   : > { %v9767_v40 = vpop.f32.mrb[16].mxu1 }
 0x403   : > { %v3017_v51 = vpop.f32.mrb[17].mxu1 }
 0x404   : > { %v9769_v23 = vpop.f32.mrb[18].mxu1 }
 0x405   : > { %v3020_v0 = vpop.f32.mrb[19].mxu1 }
 0x407   : > { %3360 = vmatmul.mubr.bf16.gmra.mrb[124].mxu1 %v2826_v47 }
 0x40a   : > { %v9771_v15 = vpop.f32.mrb[20].mxu1 }
 0x40b   : > { %v3025_v20 = vpop.f32.mrb[21].mxu1 }
 0x40c   : > { %v9773_v31 = vpop.f32.mrb[22].mxu1 }
 0x40d   : > { %v3028_v36 = vpop.f32.mrb[23].mxu1 }
 0x412   : > { %v9775_v1 = vpop.f32.mrb[24].mxu1 }
 0x413   : > { %v3033_v27 = vpop.f32.mrb[25].mxu1 }
 0x414   : > { %v9777_v34 = vpop.f32.mrb[26].mxu1 }
 0x415   : > { %v3036_v42 = vpop.f32.mrb[27].mxu1 }
 0x416   : > { %v8075_v42 = vld [vmem:[%s11310_s4 + $0x4] ss:$8 sps:$4 sm:$0xff]  }
 0x417   : > { %3640 = vmatprep.mubr.bf16.mxu1 %v8075_v42 }
 0x41a   : > { %v9779_v60 = vpop.f32.mrb[28].mxu1 }
 0x41b   : > { %v3041_v43 = vpop.f32.mrb[29].mxu1 }
 0x41c   : > { %v9781_v19 = vpop.f32.mrb[30].mxu1 }
 0x41d   : > { %v3044_v16 = vpop.f32.mrb[31].mxu1 }
 0x422   : > { %v9783_v12 = vpop.f32.mrb[32].mxu1 }
 0x423   : > { %v3049_v52 = vpop.f32.mrb[33].mxu1 }
 0x424   : > { %v9785_v54 = vpop.f32.mrb[34].mxu1 }
 0x425   : > { %v3052_v63 = vpop.f32.mrb[35].mxu1 }
 0x42a   : > { %v9787_v11 = vpop.f32.mrb[36].mxu1 }
 0x42b   : > { %v3057_v61 = vpop.f32.mrb[37].mxu1 }
 0x42c   : > { %v9789_v24 = vpop.f32.mrb[38].mxu1 }
 0x42d   : > { %v3060_v17 = vpop.f32.mrb[39].mxu1 }
 0x432   : > { %v9791_v18 = vpop.f32.mrb[40].mxu1 }
 0x433   : > { %v3065_v4 = vpop.f32.mrb[41].mxu1 }
 0x434   : > { %v9793_v21 = vpop.f32.mrb[42].mxu1 }
 0x435   : > { %v3068_v25 = vpop.f32.mrb[43].mxu1 }
 0x43a   : > { %v9795_v58 = vpop.f32.mrb[44].mxu1 }
 0x43b   : > { %v3073_v59 = vpop.f32.mrb[45].mxu1 }
 0x43c   : > { %v9797_v44 = vpop.f32.mrb[46].mxu1 }
 0x43d   : > { %v3076_v46 = vpop.f32.mrb[47].mxu1 }
 0x442   : > { %v9799_v37 = vpop.f32.mrb[48].mxu1 }
 0x443   : > { %v3081_v38 = vpop.f32.mrb[49].mxu1 }
 0x444   : > { %v9801_v53 = vpop.f32.mrb[50].mxu1 }
 0x445   : > { %v3084_v33 = vpop.f32.mrb[51].mxu1 }
 0x44a   : > { %v9803_v7 = vpop.f32.mrb[52].mxu1 }
 0x44b   : > { %v3089_v35 = vpop.f32.mrb[53].mxu1 }
 0x44c   : > { %v9805_v6 = vpop.f32.mrb[54].mxu1 }
 0x44d   : > { %v3092_v3 = vpop.f32.mrb[55].mxu1 }
 0x452   : > { %v9807_v39 = vpop.f32.mrb[56].mxu1 }
 0x453   : > { %v3097_v41 = vpop.f32.mrb[57].mxu1 }
 0x454   : > { %v9809_v47 = vpop.f32.mrb[58].mxu1 }
 0x455   : > { %v3100_v29 = vpop.f32.mrb[59].mxu1 }
 0x45a   : > { %v9811_v26 = vpop.f32.mrb[60].mxu1 }
 0x45b   : > { %v3105_v32 = vpop.f32.mrb[61].mxu1 }
 0x45c   : > { %v9813_v55 = vpop.f32.mrb[62].mxu1 }
 0x45d   : > { %v3108_v10 = vpop.f32.mrb[63].mxu1 }
 0x462   : > { %v3241_v49 = vpop.f32.mrb[64].mxu1 }
 0x463   : > { %v9816_v57 = vmax.f32 %v9741_v48, %v3241_v49  ;;  %v3243_v13 = vpop.f32.mrb[65].mxu1 }
 0x464   : > { %v3244_v50 = vpop.f32.mrb[66].mxu1 }
 0x465   : > { %v3369_v51 = vmax.f32 %v9743_v5, %v3244_v50  ;;  %v3246_v0 = vpop.f32.mrb[67].mxu1  ;;  %v3400_v20 = vrot.slane %v9816_v57, 1 }
 0x467   : > { %v3401_v36 = vrot.slane %v3369_v51, 1 }
 0x469   : > { %v3462_v27 = vsel %vm590_vm0, %v3400_v20, %v3401_v36 }
 0x46a   : > { %v3464_v48 = vmax.f32 %v9816_v57, %v3462_v27  ;;  %v3249_v43 = vpop.f32.mrb[68].mxu1  ;;  %v8073_v57 = vld [vmem:[%s11310_s4] ss:$8 sps:$4 sm:$0xff]  }
 0x46b   : > { %v3370_v16 = vmax.f32 %v9748_v45, %v3249_v43  ;;  %v3251_v52 = vpop.f32.mrb[69].mxu1 }
 0x46c   : > { %v3252_v5 = vpop.f32.mrb[70].mxu1 }
 0x46d   : > { %v3402_v63 = vrot.slane %v3370_v16, 1  ;;  %v3371_v61 = vmax.f32 %v9750_v22, %v3252_v5  ;;  %v3254_v17 = vpop.f32.mrb[71].mxu1 }
 0x46f   : > { %v3461_v4 = vsel %vm590_vm0, %v3401_v36, %v3402_v63  ;;  %v3403_v25 = vrot.slane %v3371_v61, 1 }
 0x470   : > { %v3465_v59 = vmax.f32 %v3369_v51, %v3461_v4 }
 0x471   : > { %v3460_v46 = vsel %vm590_vm0, %v3402_v63, %v3403_v25 }
 0x472   : > { %v3466_v38 = vmax.f32 %v3370_v16, %v3460_v46  ;;  %v3257_v33 = vpop.f32.mrb[72].mxu1  ;;  %v9834_v35 = vpack.c.bf16 %v3465_v59, %v3464_v48 }
 0x473   : > { %v3372_v45 = vmax.f32 %v9755_v30, %v3257_v33  ;;  %v3259_v3 = vpop.f32.mrb[73].mxu1 }
 0x474   : > { %v3260_v41 = vpop.f32.mrb[74].mxu1 }
 0x475   : > { %v3404_v29 = vrot.slane %v3372_v45, 1  ;;  %v3373_v22 = vmax.f32 %v9757_v56, %v3260_v41  ;;  %v3262_v32 = vpop.f32.mrb[75].mxu1 }
 0x477   : > { %v3459_v10 = vsel %vm590_vm0, %v3403_v25, %v3404_v29  ;;  %v3405_v49 = vrot.slane %v3373_v22, 1 }
 0x478   : > { %v3467_v13 = vmax.f32 %v3371_v61, %v3459_v10 }
 0x479   : > { %v3458_v50 = vsel %vm590_vm0, %v3404_v29, %v3405_v49 }
 0x47a   : > { %v3468_v51 = vmax.f32 %v3372_v45, %v3458_v50  ;;  %v3265_v0 = vpop.f32.mrb[76].mxu1  ;;  %v9842_v36 = vpack.c.bf16 %v3467_v13, %v3466_v38 }
 0x47b   : > { %v3374_v30 = vmax.f32 %v9761_v62, %v3265_v0  ;;  %v3267_v27 = vpop.f32.mrb[77].mxu1 }
 0x47c   : > { %v3268_v42 = vpop.f32.mrb[78].mxu1 }
 0x47d   : > { %v3406_v48 = vrot.slane %v3374_v30, 1  ;;  %v3375_v56 = vmax.f32 %v9763_v28, %v3268_v42  ;;  %v3270_v43 = vpop.f32.mrb[79].mxu1 }
 0x47f   : > { %v3457_v16 = vsel %vm590_vm0, %v3405_v49, %v3406_v48  ;;  %v3407_v52 = vrot.slane %v3375_v56, 1 }
 0x480   : > { %v3469_v5 = vmax.f32 %v3373_v22, %v3457_v16 }
 0x481   : > { %v3456_v63 = vsel %vm590_vm0, %v3406_v48, %v3407_v52 }
 0x482   : > { %v3470_v61 = vmax.f32 %v3374_v30, %v3456_v63  ;;  %v3273_v17 = vpop.f32.mrb[80].mxu1  ;;  %v9850_v4 = vpack.c.bf16 %v3469_v5, %v3468_v51 }
 0x483   : > { %v3376_v62 = vmax.f32 %v9767_v40, %v3273_v17  ;;  %v3275_v25 = vpop.f32.mrb[81].mxu1 }
 0x484   : > { %v3276_v59 = vpop.f32.mrb[82].mxu1 }
 0x485   : > { %v3408_v46 = vrot.slane %v3376_v62, 1  ;;  %v3377_v28 = vmax.f32 %v9769_v23, %v3276_v59  ;;  %v3278_v38 = vpop.f32.mrb[83].mxu1 }
 0x487   : > { %v3455_v33 = vsel %vm590_vm0, %v3407_v52, %v3408_v46  ;;  %v3409_v45 = vrot.slane %v3377_v28, 1 }
 0x488   : > { %v3471_v3 = vmax.f32 %v3375_v56, %v3455_v33 }
 0x489   : > { %v3454_v41 = vsel %vm590_vm0, %v3408_v46, %v3409_v45 }
 0x48a   : > { %v3472_v29 = vmax.f32 %v3376_v62, %v3454_v41  ;;  %v3281_v22 = vpop.f32.mrb[84].mxu1  ;;  %v9858_v32 = vpack.c.bf16 %v3471_v3, %v3470_v61 }
 0x48b   : > { %v3378_v40 = vmax.f32 %v9771_v15, %v3281_v22  ;;  %v3283_v10 = vpop.f32.mrb[85].mxu1 }
 0x48c   : > { %v3284_v49 = vpop.f32.mrb[86].mxu1 }
 0x48d   : > { %v3410_v13 = vrot.slane %v3378_v40, 1  ;;  %v3379_v23 = vmax.f32 %v9773_v31, %v3284_v49  ;;  %v3286_v50 = vpop.f32.mrb[87].mxu1 }
 0x48f   : > { %v3453_v51 = vsel %vm590_vm0, %v3409_v45, %v3410_v13  ;;  %v3411_v0 = vrot.slane %v3379_v23, 1 }
 0x490   : > { %v3473_v30 = vmax.f32 %v3377_v28, %v3453_v51 }
 0x491   : > { %v3452_v27 = vsel %vm590_vm0, %v3410_v13, %v3411_v0 }
 0x492   : > { %v3474_v42 = vmax.f32 %v3378_v40, %v3452_v27  ;;  %v3289_v48 = vpop.f32.mrb[88].mxu1  ;;  %v9866_v56 = vpack.c.bf16 %v3473_v30, %v3472_v29 }
 0x493   : > { %v3380_v15 = vmax.f32 %v9775_v1, %v3289_v48  ;;  %v3291_v43 = vpop.f32.mrb[89].mxu1 }
 0x494   : > { %v3292_v16 = vpop.f32.mrb[90].mxu1 }
 0x495   : > { %v3412_v52 = vrot.slane %v3380_v15, 1  ;;  %v3381_v31 = vmax.f32 %v9777_v34, %v3292_v16  ;;  %v3294_v5 = vpop.f32.mrb[91].mxu1 }
 0x497   : > { %v3451_v63 = vsel %vm590_vm0, %v3411_v0, %v3412_v52  ;;  %v3413_v61 = vrot.slane %v3381_v31, 1 }
 0x498   : > { %v3475_v17 = vmax.f32 %v3379_v23, %v3451_v63 }
 0x499   : > { %v3450_v62 = vsel %vm590_vm0, %v3412_v52, %v3413_v61 }
 0x49a   : > { %v3476_v25 = vmax.f32 %v3380_v15, %v3450_v62  ;;  %v3297_v59 = vpop.f32.mrb[92].mxu1  ;;  %v9874_v46 = vpack.c.bf16 %v3475_v17, %v3474_v42 }
 0x49b   : > { %v3382_v1 = vmax.f32 %v9779_v60, %v3297_v59  ;;  %v3299_v28 = vpop.f32.mrb[93].mxu1 }
 0x49c   : > { %v3300_v38 = vpop.f32.mrb[94].mxu1 }
 0x49d   : > { %v3414_v33 = vrot.slane %v3382_v1, 1  ;;  %v3383_v34 = vmax.f32 %v9781_v19, %v3300_v38  ;;  %v3302_v45 = vpop.f32.mrb[95].mxu1 }
 0x49f   : > { %v3449_v3 = vsel %vm590_vm0, %v3413_v61, %v3414_v33  ;;  %v3415_v41 = vrot.slane %v3383_v34, 1 }
 0x4a0   : > { %v3477_v29 = vmax.f32 %v3381_v31, %v3449_v3 }
 0x4a1   : > { %v3448_v22 = vsel %vm590_vm0, %v3414_v33, %v3415_v41 }
 0x4a2   : > { %v3478_v40 = vmax.f32 %v3382_v1, %v3448_v22  ;;  %v3305_v10 = vpop.f32.mrb[96].mxu1  ;;  %v9882_v49 = vpack.c.bf16 %v3477_v29, %v3476_v25 }
 0x4a3   : > { %v3384_v60 = vmax.f32 %v9783_v12, %v3305_v10  ;;  %v3307_v13 = vpop.f32.mrb[97].mxu1 }
 0x4a4   : > { %v3308_v23 = vpop.f32.mrb[98].mxu1 }
 0x4a5   : > { %v3416_v50 = vrot.slane %v3384_v60, 1  ;;  %v3385_v19 = vmax.f32 %v9785_v54, %v3308_v23  ;;  %v3310_v51 = vpop.f32.mrb[99].mxu1 }
 0x4a7   : > { %v3447_v0 = vsel %vm590_vm0, %v3415_v41, %v3416_v50  ;;  %v3417_v30 = vrot.slane %v3385_v19, 1 }
 0x4a8   : > { %v3479_v27 = vmax.f32 %v3383_v34, %v3447_v0 }
 0x4a9   : > { %v3446_v42 = vsel %vm590_vm0, %v3416_v50, %v3417_v30 }
 0x4aa   : > { %v3313_v48 = vpop.f32.mrb[100].mxu1  ;;  %v3480_v15 = vmax.f32 %v3384_v60, %v3446_v42  ;;  %v9890_v43 = vpack.c.bf16 %v3479_v27, %v3478_v40 }
 0x4ab   : > { %v3386_v12 = vmax.f32 %v9787_v11, %v3313_v48  ;;  %v3315_v16 = vpop.f32.mrb[101].mxu1 }
 0x4ac   : > { %v3316_v52 = vpop.f32.mrb[102].mxu1 }
 0x4ad   : > { %v3418_v31 = vrot.slane %v3386_v12, 1  ;;  %v3387_v54 = vmax.f32 %v9789_v24, %v3316_v52  ;;  %v3318_v5 = vpop.f32.mrb[103].mxu1 }
 0x4af   : > { %v3419_v63 = vrot.slane %v3387_v54, 1  ;;  %v3445_v61 = vsel %vm590_vm0, %v3417_v30, %v3418_v31 }
 0x4b0   : > { %v3481_v17 = vmax.f32 %v3385_v19, %v3445_v61 }
 0x4b1   : > { %v3444_v62 = vsel %vm590_vm0, %v3418_v31, %v3419_v63 }
 0x4b2   : > { %v3321_v25 = vpop.f32.mrb[104].mxu1  ;;  %v3520_v59 = vpack.c.bf16 %v3481_v17, %v3480_v15  ;;  %v3482_v1 = vmax.f32 %v3386_v12, %v3444_v62 }
 0x4b3   : > { %v3388_v28 = vmax.f32 %v9791_v18, %v3321_v25  ;;  %v3323_v11 = vpop.f32.mrb[105].mxu1 }
 0x4b4   : > { %v3324_v38 = vpop.f32.mrb[106].mxu1  ;;  %7172 = vmatprep.subr.bf16.mxu1 %v3520_v59 }
 0x4b5   : > { %v3420_v33 = vrot.slane %v3388_v28, 1  ;;  %v3389_v24 = vmax.f32 %v9793_v21, %v3324_v38  ;;  %v3326_v34 = vpop.f32.mrb[107].mxu1  ;;  %7173 = vmatpush3.bf16.msra.mxu1 %v9834_v35 }
 0x4b7   : > { %v3421_v45 = vrot.slane %v3389_v24, 1  ;;  %v3443_v3 = vsel %vm590_vm0, %v3419_v63, %v3420_v33 }
 0x4b8   : > { %v3483_v41 = vmax.f32 %v3387_v54, %v3443_v3 }
 0x4b9   : > { %v3442_v29 = vsel %vm590_vm0, %v3420_v33, %v3421_v45 }
 0x4ba   : > { %v3329_v22 = vpop.f32.mrb[108].mxu1  ;;  %v3521_v40 = vpack.c.bf16 %v3483_v41, %v3482_v1  ;;  %v3484_v18 = vmax.f32 %v3388_v28, %v3442_v29 }
 0x4bb   : > { %v3390_v10 = vmax.f32 %v9795_v58, %v3329_v22  ;;  %v3331_v60 = vpop.f32.mrb[109].mxu1 }
 0x4bc   : > { %v3332_v13 = vpop.f32.mrb[110].mxu1  ;;  %7174 = vmatprep.subr.bf16.mxu1 %v3521_v40 }
 0x4bd   : > { %v3422_v21 = vrot.slane %v3390_v10, 1  ;;  %v3391_v23 = vmax.f32 %v9797_v44, %v3332_v13  ;;  %v3334_v35 = vpop.f32.mrb[111].mxu1  ;;  %7175 = vmatpush3.bf16.msra.mxu1 %v9842_v36 }
 0x4bf   : > { %v3423_v50 = vrot.slane %v3391_v23, 1  ;;  %v3441_v19 = vsel %vm590_vm0, %v3421_v45, %v3422_v21 }
 0x4c0   : > { %v3485_v51 = vmax.f32 %v3389_v24, %v3441_v19 }
 0x4c1   : > { %v3440_v0 = vsel %vm590_vm0, %v3422_v21, %v3423_v50 }
 0x4c2   : > { %v3337_v30 = vpop.f32.mrb[112].mxu1  ;;  %v3522_v27 = vpack.c.bf16 %v3485_v51, %v3484_v18  ;;  %v3486_v58 = vmax.f32 %v3390_v10, %v3440_v0 }
 0x4c3   : > { %v3392_v42 = vmax.f32 %v9799_v37, %v3337_v30  ;;  %v3339_v48 = vpop.f32.mrb[113].mxu1 }
 0x4c4   : > { %v3340_v15 = vpop.f32.mrb[114].mxu1  ;;  %7176 = vmatprep.subr.bf16.mxu1 %v3522_v27  ;;  %v8078_v48 = vld [vmem:[%s11310_s4 + $0x10] ss:$8 sps:$4 sm:$0xff]  }
 0x4c5   : > { %v3424_v44 = vrot.slane %v3392_v42, 1  ;;  %v3393_v12 = vmax.f32 %v9801_v53, %v3340_v15  ;;  %v3342_v36 = vpop.f32.mrb[115].mxu1  ;;  %7177 = vmatpush3.bf16.msra.mxu1 %v9850_v4  ;;  %v8079_v15 = vld [vmem:[%s11310_s4 + $0x24] ss:$8 sps:$4 sm:$0xff]  }
 0x4c6   : > { %v8082_v36 = vld [vmem:[%s11310_s4 + $0x34] ss:$8 sps:$4 sm:$0xff]  }
 0x4c7   : > { %v3425_v16 = vrot.slane %v3393_v12, 1  ;;  %v3439_v52 = vsel %vm590_vm0, %v3423_v50, %v3424_v44 }
 0x4c8   : > { %v3487_v31 = vmax.f32 %v3391_v23, %v3439_v52  ;;  %v8085_v52 = vld [vmem:[%s11310_s4 + $0x44] ss:$8 sps:$4 sm:$0xff]  }
 0x4c9   : > { %v3438_v54 = vsel %vm590_vm0, %v3424_v44, %v3425_v16  ;;  %v8103_v44 = vld [vmem:[%s11311_s5 + $0x78] ss:$8 sps:$4 sm:$0xff]  }
 0x4ca   : > { %v3345_v5 = vpop.f32.mrb[116].mxu1  ;;  %v3523_v63 = vpack.c.bf16 %v3487_v31, %v3486_v58  ;;  %v3488_v37 = vmax.f32 %v3392_v42, %v3438_v54  ;;  %v8097_v58 = vld [vmem:[%s11311_s5 + $0x58] ss:$8 sps:$4 sm:$0xff]   ;;  %v8105_v42 = vld [vmem:[%s11311_s5 + $0x7c] ss:$8 sps:$4 sm:$0xff]  }
 0x4cb   : > { %v3394_v61 = vmax.f32 %v9803_v7, %v3345_v5  ;;  %v3347_v17 = vpop.f32.mrb[117].mxu1  ;;  %v8087_v31 = vld [vmem:[%s11310_s4 + $0x40] ss:$8 sps:$4 sm:$0xff]   ;;  %v8088_v54 = vld [vmem:[%s11310_s4 + $0x54] ss:$8 sps:$4 sm:$0xff]  }
 0x4cc   : > { %v3348_v62 = vpop.f32.mrb[118].mxu1  ;;  %7178 = vmatprep.subr.bf16.mxu1 %v3523_v63  ;;  %v8090_v5 = vld [vmem:[%s11310_s4 + $0x50] ss:$8 sps:$4 sm:$0xff]   ;;  %v8091_v63 = vld [vmem:[%s11310_s4 + $0x64] ss:$8 sps:$4 sm:$0xff]  }
 0x4cd   : > { %v3426_v53 = vrot.slane %v3394_v61, 1  ;;  %v3395_v25 = vmax.f32 %v9805_v6, %v3348_v62  ;;  %v3350_v4 = vpop.f32.mrb[119].mxu1  ;;  %7179 = vmatpush3.bf16.msra.mxu1 %v9858_v32  ;;  %v8096_v17 = vld [vmem:[%s11310_s4 + $0x70] ss:$8 sps:$4 sm:$0xff]   ;;  %v8108_v62 = vld [vmem:[%s11311_s5 + $0x8c] ss:$8 sps:$4 sm:$0xff]  }
 0x4ce   : > { %v8109_v4 = vld [vmem:[%s11311_s5 + $0x98] ss:$8 sps:$4 sm:$0xff]  }
 0x4cf   : > { %v3427_v59 = vrot.slane %v3395_v25, 1  ;;  %v3437_v1 = vsel %vm590_vm0, %v3425_v16, %v3426_v53  ;;  %v8084_v16 = vld [vmem:[%s11310_s4 + $0x30] ss:$8 sps:$4 sm:$0xff]  }
 0x4d0   : > { %v3489_v28 = vmax.f32 %v3393_v12, %v3437_v1  ;;  %v8081_v12 = vld [vmem:[%s11310_s4 + $0x20] ss:$8 sps:$4 sm:$0xff]  }
 0x4d1   : > { %v3436_v11 = vsel %vm590_vm0, %v3426_v53, %v3427_v59  ;;  %v8106_v53 = vld [vmem:[%s11311_s5 + $0x88] ss:$8 sps:$4 sm:$0xff]  }
 0x4d2   : > { %v3353_v38 = vpop.f32.mrb[120].mxu1  ;;  %v3524_v33 = vpack.c.bf16 %v3489_v28, %v3488_v37  ;;  %v3490_v7 = vmax.f32 %v3394_v61, %v3436_v11  ;;  %v8093_v37 = vld [vmem:[%s11310_s4 + $0x60] ss:$8 sps:$4 sm:$0xff]   ;;  %v8094_v61 = vld [vmem:[%s11310_s4 + $0x74] ss:$8 sps:$4 sm:$0xff]  }
 0x4d3   : > { %v3396_v24 = vmax.f32 %v9807_v39, %v3353_v38  ;;  %v3355_v34 = vpop.f32.mrb[121].mxu1  ;;  %v8116_v38 = vld [vmem:[%s11311_s5 + $0x4] ss:$8 sps:$4 sm:$0xff]  }
 0x4d4   : > { %v3356_v45 = vpop.f32.mrb[122].mxu1  ;;  %7180 = vmatprep.subr.bf16.mxu1 %v3524_v33 }
 0x4d5   : > { %v3428_v6 = vrot.slane %v3396_v24, 1  ;;  %v3397_v3 = vmax.f32 %v9809_v47, %v3356_v45  ;;  %v3358_v32 = vpop.f32.mrb[123].mxu1  ;;  %7181 = vmatpush3.bf16.msra.mxu1 %v9866_v56 }
 0x4d7   : > { %v3429_v41 = vrot.slane %v3397_v3, 1  ;;  %v3435_v29 = vsel %vm590_vm0, %v3427_v59, %v3428_v6  ;;  %v6864_v59 = vld [vmem:[%s11311_s5 + $0xa8] sm:$0x33] }
 0x4d8   : > { %v3491_v22 = vmax.f32 %v3395_v25, %v3435_v29  ;;  %v8111_v25 = vld [vmem:[%s11311_s5 + $0x9c] ss:$8 sps:$4 sm:$0xff]   ;;  %v6876_v1 = vcombine.high %v6864_v59, %v6864_v59  ;;  %v6875_v28 = vcombine.low %v6864_v59, %v6864_v59 }
 0x4d9   : > { %v3434_v40 = vsel %vm590_vm0, %v3428_v6, %v3429_v41 }
 0x4da   : > { %v3361_v18 = vpop.f32.mrb[124].mxu1  ;;  %v3525_v10 = vpack.c.bf16 %v3491_v22, %v3490_v7  ;;  %v3492_v39 = vmax.f32 %v3396_v24, %v3434_v40  ;;  %v3858_v11 = vsel %vm3856_vm6, %v6875_v28, 0 }
 0x4db   : > { %v3398_v60 = vmax.f32 %v9811_v26, %v3361_v18  ;;  %v3363_v13 = vpop.f32.mrb[125].mxu1 }
 0x4dc   : > { %v3364_v21 = vpop.f32.mrb[126].mxu1  ;;  %7182 = vmatprep.subr.bf16.mxu1 %v3525_v10 }
 0x4dd   : > { %v3430_v47 = vrot.slane %v3398_v60, 1  ;;  %v3399_v23 = vmax.f32 %v9813_v55, %v3364_v21  ;;  %v3366_v56 = vpop.f32.mrb[127].mxu1  ;;  %7183 = vmatpush3.bf16.msra.mxu1 %v9874_v46  ;;  %v8099_v46 = vld [vmem:[%s11311_s5 + $0x5c] ss:$8 sps:$4 sm:$0xff]  }
 0x4df   : > { %v3431_v35 = vrot.slane %v3399_v23, 1  ;;  %v3433_v50 = vsel %vm590_vm0, %v3429_v41, %v3430_v47 }
 0x4e0   : > { %v3493_v19 = vmax.f32 %v3397_v3, %v3433_v50 }
 0x4e1   : > { %v3463_v51 = vsel %vm590_vm0, %v3431_v35, %v3400_v20  ;;  %v3432_v26 = vsel %vm590_vm0, %v3430_v47, %v3431_v35  ;;  %v8076_v20 = vld [vmem:[%s11310_s4 + $0x14] ss:$8 sps:$4 sm:$0xff]  }
 0x4e2   : > { %v3495_v0 = vmax.f32 %v3399_v23, %v3463_v51  ;;  %v3526_v30 = vpack.c.bf16 %v3493_v19, %v3492_v39  ;;  %v3494_v27 = vmax.f32 %v3398_v60, %v3432_v26 }
 0x4e4   : > { %7184 = vmatprep.subr.bf16.mxu1 %v3526_v30  ;;  %v3527_v55 = vpack.c.bf16 %v3495_v0, %v3494_v27 }
 0x4e5   : > { %7185 = vmatpush3.bf16.msra.mxu1 %v9882_v49  ;;  %v8102_v49 = vld [vmem:[%s11311_s5 + $0x6c] ss:$8 sps:$4 sm:$0xff]  }
 0x4e6   : > { %7186 = vmatprep.subr.bf16.mxu1 %v3527_v55 }
 0x4e9   : > { %7187 = vmatpush3.bf16.msra.mxu1 %v9890_v43  ;;  %v8100_v43 = vld [vmem:[%s11311_s5 + $0x68] ss:$8 sps:$4 sm:$0xff]  }
 0x4ea   : > { %3863 = vmatprep.subr.bf16.mxu1 %v8099_v46 }
 0x4ec   : > { %3641 = vmatmul.mubr.bf16.vlgmr.msra.gmra.mrb[128].mxu1 %v8073_v57 }
 0x4ed   : > { %3648 = vmatprep.mubr.bf16.mxu1 %v8076_v20  ;;  %3864 = vmatpush1.bf16.msra.mxu1 %v8097_v58  ;;  %v8114_v58 = vld [vmem:[%s11311_s5] ss:$8 sps:$4 sm:$0xff]  }
 0x4ee   : > { %3865 = vmatprep.subr.bf16.mxu1 %v8102_v49 }
 0x4f1   : > { %3866 = vmatpush1.bf16.msra.mxu1 %v8100_v43 }
 0x4f2   : > { %3867 = vmatprep.subr.bf16.mxu1 %v8105_v42  ;;  %v8119_v42 = vld [vmem:[%s11311_s5 + $0x14] ss:$8 sps:$4 sm:$0xff]  }
 0x4f4   : > { %3649 = vmatmul.mubr.bf16.gmra.mrb[132].mxu1 %v8078_v48 }
 0x4f5   : > { %3656 = vmatprep.mubr.bf16.mxu1 %v8079_v15  ;;  %3868 = vmatpush1.bf16.msra.mxu1 %v8103_v44 }
 0x4f6   : > { %3869 = vmatprep.subr.bf16.mxu1 %v8108_v62 }
 0x4f9   : > { %3870 = vmatpush1.bf16.msra.mxu1 %v8106_v53 }
 0x4fa   : > { %3871 = vmatprep.subr.bf16.mxu1 %v8111_v25  ;;  %v8122_v25 = vld [vmem:[%s11311_s5 + $0x24] ss:$8 sps:$4 sm:$0xff]  }
 0x4fc   : > { %3657 = vmatmul.mubr.bf16.gmra.mrb[136].mxu1 %v8081_v12 }
 0x4fd   : > { %3664 = vmatprep.mubr.bf16.mxu1 %v8082_v36  ;;  %3872 = vmatpush1.bf16.msra.mxu1 %v8109_v4 }
 0x4fe   : > { %6877 = vmatprep.subr.msk.bf16.mxu1 %vm3856_vm6, %v6876_v1 }
 0x501   : > { %3874 = vmatpush1.bf16.msra.mxu1 %v3858_v11 }
 0x502   : > { %4061 = vmatprep.subr.bf16.mxu1 %v8116_v38 }
 0x504   : > { %3665 = vmatmul.mubr.bf16.gmra.mrb[140].mxu1 %v8084_v16 }
 0x505   : > { %3672 = vmatprep.mubr.bf16.mxu1 %v8085_v52 }
 0x50c   : > { %3673 = vmatmul.mubr.bf16.gmra.mrb[144].mxu1 %v8087_v31 }
 0x50d   : > { %3680 = vmatprep.mubr.bf16.mxu1 %v8088_v54 }
 0x514   : > { %3681 = vmatmul.mubr.bf16.gmra.mrb[148].mxu1 %v8090_v5 }
 0x515   : > { %3688 = vmatprep.mubr.bf16.mxu1 %v8091_v63 }
 0x51c   : > { %3689 = vmatmul.mubr.bf16.gmra.mrb[152].mxu1 %v8093_v37 }
 0x51d   : > { %3696 = vmatprep.mubr.bf16.mxu1 %v8094_v61  ;;  %v8117_v61 = vld [vmem:[%s11311_s5 + $0x10] ss:$8 sps:$4 sm:$0xff]  }
 0x524   : > { %3697 = vmatmul.mubr.bf16.gmra.mrb[156].mxu1 %v8096_v17 }
 0x525   : > { %3895 = vmatprep.mubr.bf16.mxu1 %v11333_v2 }
 0x5bf   : > { %v7188_v33 = vpop.f32.mrb[128].mxu1 }
 0x5c0   : > { %v7189_v7 = vpop.f32.mrb[129].mxu1 }
 0x5c1   : > { %v10030_v24 = vadd.f32 %v7189_v7, %v7188_v33  ;;  %v7191_v34 = vpop.f32.mrb[130].mxu1 }
 0x5c2   : > { %v7192_v45 = vpop.f32.mrb[131].mxu1 }
 0x5c3   : > { %v10032_v6 = vadd.f32 %v7192_v45, %v7191_v34  ;;  %v11332_v3 = vrot.slane %v10030_v24, 1  ;;  %v11331_v32 = vrot.slane %v10030_v24, 2  ;;  %v11330_v41 = vrot.slane %v10030_v24, 3  ;;  %v8120_v34 = vld [vmem:[%s11311_s5 + $0x20] ss:$8 sps:$4 sm:$0xff]  }
 0x5c4   : > { %v11329_v10 = vrot.slane %v10030_v24, 4 }
 0x5c5   : > { %v3725_v22 = vrot.slane %v10032_v6, 1  ;;  %v4175_v40 = vrot.slane %v10032_v6, 2  ;;  %v4457_v18 = vrot.slane %v10032_v6, 3  ;;  %v4739_v39 = vrot.slane %v10032_v6, 4 }
 0x5c7   : > { %v7194_v60 = vpop.f32.mrb[132].mxu1  ;;  %v3754_v13 = vsel %vm590_vm0, %v11332_v3, %v3725_v22  ;;  %v10052_v21 = vsel %vm1287_vm2, %v11331_v32, %v4175_v40  ;;  %v10058_v47 = vsel %vm1746_vm3, %v11330_v41, %v4457_v18  ;;  %v10064_v56 = vsel %vm2205_vm4, %v11329_v10, %v4739_v39 }
 0x5c8   : > { %v7195_v23 = vpop.f32.mrb[133].mxu1  ;;  %11353 = vst [vmem:[#allocation10_spill] sm:$0xff] %v10064_v56  ;;  %v11365_v56 = vrot.slane %v10030_v24, 1 }
 0x5c9   : > { %v10066_v35 = vadd.f32 %v7195_v23, %v7194_v60  ;;  %v7197_v50 = vpop.f32.mrb[134].mxu1 }
 0x5ca   : > { %v7198_v19 = vpop.f32.mrb[135].mxu1 }
 0x5cb   : > { %v3726_v51 = vrot.slane %v10066_v35, 1  ;;  %v4176_v26 = vrot.slane %v10066_v35, 2  ;;  %v4458_v0 = vrot.slane %v10066_v35, 3  ;;  %v4740_v30 = vrot.slane %v10066_v35, 4 }
 0x5cc   : > { %v10072_v27 = vadd.f32 %v7198_v19, %v7197_v50 }
 0x5cd   : > { %v3753_v55 = vsel %vm590_vm0, %v3725_v22, %v3726_v51  ;;  %v10078_v46 = vsel %vm1287_vm2, %v4175_v40, %v4176_v26  ;;  %v10082_v57 = vsel %vm1746_vm3, %v4457_v18, %v4458_v0  ;;  %v10086_v20 = vsel %vm2205_vm4, %v4739_v39, %v4740_v30  ;;  %v8125_v18 = vld [vmem:[%s11311_s5 + $0x34] ss:$8 sps:$4 sm:$0xff]  }
 0x5ce   : > { %v3768_v49 = vpack.c.bf16 %v3753_v55, %v3754_v13  ;;  %v3727_v43 = vrot.slane %v10072_v27, 1  ;;  %v4177_v12 = vrot.slane %v10072_v27, 2  ;;  %v4459_v16 = vrot.slane %v10072_v27, 3 }
 0x5cf   : > { %v7200_v44 = vpop.f32.mrb[136].mxu1  ;;  %v4741_v5 = vrot.slane %v10072_v27, 4 }
 0x5d0   : > { %v7201_v31 = vpop.f32.mrb[137].mxu1  ;;  %6878 = vmatmul.mubr.msk.bf16.vlgmr.msra.gmra.mrb[160].mxu1 %vm3831_vm7, %v3768_v49  ;;  %v3752_v54 = vsel %vm590_vm0, %v3726_v51, %v3727_v43  ;;  %v10117_v17 = vsel %vm1287_vm2, %v4176_v26, %v4177_v12  ;;  %v10121_v62 = vsel %vm1746_vm3, %v4458_v0, %v4459_v16 }
 0x5d1   : > { %v10109_v63 = vadd.f32 %v7201_v31, %v7200_v44  ;;  %v7203_v37 = vpop.f32.mrb[138].mxu1  ;;  %3905 = vmatprep.mubr.bf16.mxu1 %v11333_v2  ;;  %4062 = vmatpush1.bf16.msra.mxu1 %v8114_v58  ;;  %v10128_v4 = vsel %vm2205_vm4, %v4740_v30, %v4741_v5  ;;  %v3715_v44 = vld [vmem:[%s11311_s5 + $0x50] sm:$0x33]  ;;  %v8128_v31 = vld [vmem:[%s11311_s5 + $0x44] ss:$8 sps:$4 sm:$0xff]  }
 0x5d2   : > { %v7204_v53 = vpop.f32.mrb[139].mxu1  ;;  %4063 = vmatprep.subr.bf16.mxu1 %v8119_v42  ;;  %11354 = vst [vmem:[#allocation11_spill] sm:$0xff] %v10128_v4  ;;  %v8123_v42 = vld [vmem:[%s11311_s5 + $0x30] ss:$8 sps:$4 sm:$0xff]  }
 0x5d3   : > { %v10130_v59 = vadd.f32 %v7204_v53, %v7203_v37  ;;  %v3728_v1 = vrot.slane %v10109_v63, 1  ;;  %v4178_v28 = vrot.slane %v10109_v63, 2  ;;  %v4460_v11 = vrot.slane %v10109_v63, 3 }
 0x5d4   : > { %v4742_v38 = vrot.slane %v10109_v63, 4 }
 0x5d5   : > { %v3751_v33 = vsel %vm590_vm0, %v3727_v43, %v3728_v1  ;;  %v3729_v7 = vrot.slane %v10130_v59, 1  ;;  %4064 = vmatpush1.bf16.msra.mxu1 %v8117_v61  ;;  %v10146_v22 = vsel %vm1287_vm2, %v4177_v12, %v4178_v28  ;;  %v4179_v60 = vrot.slane %v10130_v59, 2 }
 0x5d6   : > { %v3769_v40 = vpack.c.bf16 %v3751_v33, %v3752_v54  ;;  %4065 = vmatprep.subr.bf16.mxu1 %v8122_v25  ;;  %v10156_v13 = vsel %vm1746_vm3, %v4459_v16, %v4460_v11  ;;  %v4461_v51 = vrot.slane %v10130_v59, 3  ;;  %v10165_v26 = vsel %vm2205_vm4, %v4741_v5, %v4742_v38 }
 0x5d7   : > { %v7206_v23 = vpop.f32.mrb[140].mxu1  ;;  %v3750_v50 = vsel %vm590_vm0, %v3728_v1, %v3729_v7  ;;  %11355 = vst [vmem:[#allocation12_spill] sm:$0xff] %v10165_v26  ;;  %v10170_v30 = vsel %vm1287_vm2, %v4178_v28, %v4179_v60  ;;  %v4743_v58 = vrot.slane %v10130_v59, 4  ;;  %v6897_v25 = vcombine.high %v3715_v44, %v3715_v44 }
 0x5d8   : > { %v7207_v0 = vpop.f32.mrb[141].mxu1  ;;  %6879 = vmatmul.mubr.msk.bf16.gmra.mrb[164].mxu1 %vm3831_vm7, %v3769_v40  ;;  %v10186_v12 = vsel %vm1746_vm3, %v4460_v11, %v4461_v51  ;;  %v6896_v1 = vcombine.low %v3715_v44, %v3715_v44 }
 0x5d9   : > { %v10175_v49 = vadd.f32 %v7207_v0, %v7206_v23  ;;  %v7209_v43 = vpop.f32.mrb[142].mxu1  ;;  %3915 = vmatprep.mubr.bf16.mxu1 %v11333_v2  ;;  %4066 = vmatpush1.bf16.msra.mxu1 %v8120_v34  ;;  %v10193_v54 = vsel %vm2205_vm4, %v4742_v38, %v4743_v58  ;;  %v8126_v38 = vld [vmem:[%s11311_s5 + $0x40] ss:$8 sps:$4 sm:$0xff]  }
 0x5da   : > { %v7210_v16 = vpop.f32.mrb[143].mxu1  ;;  %4067 = vmatprep.subr.bf16.mxu1 %v8125_v18  ;;  %11356 = vst [vmem:[#allocation13_spill] sm:$0xff] %v10193_v54 }
 0x5db   : > { %v10195_v5 = vadd.f32 %v7210_v16, %v7209_v43  ;;  %v3730_v37 = vrot.slane %v10175_v49, 1  ;;  %v4180_v61 = vrot.slane %v10175_v49, 2  ;;  %v4462_v53 = vrot.slane %v10175_v49, 3 }
 0x5dc   : > { %v4744_v28 = vrot.slane %v10175_v49, 4 }
 0x5dd   : > { %v3749_v11 = vsel %vm590_vm0, %v3729_v7, %v3730_v37  ;;  %v3731_v33 = vrot.slane %v10195_v5, 1  ;;  %4068 = vmatpush1.bf16.msra.mxu1 %v8123_v42  ;;  %v10211_v40 = vsel %vm1287_vm2, %v4179_v60, %v4180_v61  ;;  %v4181_v7 = vrot.slane %v10195_v5, 2 }
 0x5de   : > { %v3770_v18 = vpack.c.bf16 %v3749_v11, %v3750_v50  ;;  %4069 = vmatprep.subr.bf16.mxu1 %v8128_v31  ;;  %v10218_v0 = vsel %vm1746_vm3, %v4461_v51, %v4462_v53  ;;  %v4463_v60 = vrot.slane %v10195_v5, 3  ;;  %v10227_v50 = vsel %vm2205_vm4, %v4743_v58, %v4744_v28 }
 0x5df   : > { %v7212_v43 = vpop.f32.mrb[144].mxu1  ;;  %v3748_v42 = vsel %vm590_vm0, %v3730_v37, %v3731_v33  ;;  %11357 = vst [vmem:[#allocation14_spill] sm:$0xff] %v10227_v50  ;;  %v10232_v51 = vsel %vm1287_vm2, %v4180_v61, %v4181_v7  ;;  %v4745_v37 = vrot.slane %v10195_v5, 4  ;;  %v4056_v61 = vsel %vm3856_vm6, %v6896_v1, 0 }
 0x5e0   : > { %v7213_v16 = vpop.f32.mrb[145].mxu1  ;;  %6880 = vmatmul.mubr.msk.bf16.gmra.mrb[168].mxu1 %vm3831_vm7, %v3770_v18  ;;  %v10242_v58 = vsel %vm1746_vm3, %v4462_v53, %v4463_v60 }
 0x5e1   : > { %v10237_v11 = vadd.f32 %v7213_v16, %v7212_v43  ;;  %v7215_v9 = vpop.f32.mrb[146].mxu1  ;;  %3925 = vmatprep.mubr.bf16.mxu1 %v11333_v2  ;;  %4070 = vmatpush1.bf16.msra.mxu1 %v8126_v38  ;;  %v10251_v43 = vsel %vm2205_vm4, %v4744_v28, %v4745_v37 }
 0x5e2   : > { %v7216_v18 = vpop.f32.mrb[147].mxu1  ;;  %6898 = vmatprep.subr.msk.bf16.mxu1 %vm3856_vm6, %v6897_v25  ;;  %11358 = vst [vmem:[#allocation15_spill] sm:$0xff] %v10251_v43 }
 0x5e3   : > { %v10253_v16 = vadd.f32 %v7216_v18, %v7215_v9  ;;  %v3732_v38 = vrot.slane %v10237_v11, 1  ;;  %v4182_v53 = vrot.slane %v10237_v11, 2  ;;  %v4464_v31 = vrot.slane %v10237_v11, 3 }
 0x5e4   : > { %v4746_v25 = vrot.slane %v10237_v11, 4 }
 0x5e5   : > { %v3747_v1 = vsel %vm590_vm0, %v3731_v33, %v3732_v38  ;;  %v3733_v55 = vrot.slane %v10253_v16, 1  ;;  %4072 = vmatpush1.bf16.msra.mxu1 %v4056_v61  ;;  %v10266_v9 = vsel %vm1287_vm2, %v4181_v7, %v4182_v53  ;;  %v4183_v44 = vrot.slane %v10253_v16, 2 }
 0x5e6   : > { %v3771_v18 = vpack.c.bf16 %v3747_v1, %v3748_v42  ;;  %4311 = vmatprep.subr.bf16.mxu1 %v8133_v8  ;;  %v10273_v33 = vsel %vm1746_vm3, %v4463_v60, %v4464_v31  ;;  %v4465_v7 = vrot.slane %v10253_v16, 3  ;;  %v10282_v8 = vsel %vm2205_vm4, %v4745_v37, %v4746_v25 }
 0x5e7   : > { %v7218_v19 = vpop.f32.mrb[148].mxu1  ;;  %v3746_v61 = vsel %vm590_vm0, %v3732_v38, %v3733_v55  ;;  %11359 = vst [vmem:[#allocation16_spill] sm:$0xff] %v10282_v8  ;;  %v10287_v60 = vsel %vm1287_vm2, %v4182_v53, %v4183_v44  ;;  %v4747_v38 = vrot.slane %v10253_v16, 4  ;;  %v11364_v8 = vmov 0  }
 0x5e8   : > { %v7219_v42 = vpop.f32.mrb[149].mxu1  ;;  %6881 = vmatmul.mubr.msk.bf16.gmra.mrb[172].mxu1 %vm3831_vm7, %v3771_v18  ;;  %v10297_v37 = vsel %vm1746_vm3, %v4464_v31, %v4465_v7 }
 0x5e9   : > { %v10292_v52 = vadd.f32 %v7219_v42, %v7218_v19  ;;  %v7221_v36 = vpop.f32.mrb[150].mxu1  ;;  %3935 = vmatprep.mubr.bf16.mxu1 %v11333_v2  ;;  %v10301_v18 = vsel %vm2205_vm4, %v4746_v25, %v4747_v38 }
 0x5ea   : > { %v7222_v23 = vpop.f32.mrb[151].mxu1  ;;  %11360 = vst [vmem:[#allocation17_spill] sm:$0xff] %v10301_v18 }
 0x5eb   : > { %v10303_v53 = vadd.f32 %v7222_v23, %v7221_v36  ;;  %v3734_v1 = vrot.slane %v10292_v52, 1  ;;  %v4184_v39 = vrot.slane %v10292_v52, 2  ;;  %v4466_v19 = vrot.slane %v10292_v52, 3 }
 0x5ec   : > { %v4748_v42 = vrot.slane %v10292_v52, 4 }
 0x5ed   : > { %v3745_v15 = vsel %vm590_vm0, %v3733_v55, %v3734_v1  ;;  %v3735_v31 = vrot.slane %v10303_v53, 1  ;;  %v10316_v36 = vsel %vm1287_vm2, %v4183_v44, %v4184_v39  ;;  %v4185_v34 = vrot.slane %v10303_v53, 2 }
 0x5ee   : > { %v3772_v23 = vpack.c.bf16 %v3745_v15, %v3746_v61  ;;  %v10323_v45 = vsel %vm1746_vm3, %v4465_v7, %v4466_v19  ;;  %v4467_v44 = vrot.slane %v10303_v53, 3  ;;  %v10332_v15 = vsel %vm2205_vm4, %v4747_v38, %v4748_v42 }
 0x5ef   : > { %v7224_v55 = vpop.f32.mrb[152].mxu1  ;;  %v3744_v48 = vsel %vm590_vm0, %v3734_v1, %v3735_v31  ;;  %11361 = vst [vmem:[#allocation18_spill] sm:$0xff] %v10332_v15  ;;  %v10337_v7 = vsel %vm1287_vm2, %v4184_v39, %v4185_v34  ;;  %v4749_v1 = vrot.slane %v10303_v53, 4 }
 0x5f0   : > { %v7225_v61 = vpop.f32.mrb[153].mxu1  ;;  %6882 = vmatmul.mubr.msk.bf16.gmra.mrb[176].mxu1 %vm3831_vm7, %v3772_v23  ;;  %v10347_v38 = vsel %vm1746_vm3, %v4466_v19, %v4467_v44 }
 0x5f1   : > { %v10342_v29 = vadd.f32 %v7225_v61, %v7224_v55  ;;  %v7227_v28 = vpop.f32.mrb[154].mxu1  ;;  %3945 = vmatprep.mubr.bf16.mxu1 %v11333_v2  ;;  %v10351_v23 = vsel %vm2205_vm4, %v4748_v42, %v4749_v1 }
 0x5f2   : > { %v7228_v10 = vpop.f32.mrb[155].mxu1  ;;  %11362 = vst [vmem:[#allocation19_spill] sm:$0xff] %v10351_v23 }
 0x5f3   : > { %v10353_v39 = vadd.f32 %v7228_v10, %v7227_v28  ;;  %v3736_v25 = vrot.slane %v10342_v29, 1  ;;  %v4186_v41 = vrot.slane %v10342_v29, 2  ;;  %v4468_v55 = vrot.slane %v10342_v29, 3 }
 0x5f4   : > { %v4750_v61 = vrot.slane %v10342_v29, 4 }
 0x5f5   : > { %v3743_v32 = vsel %vm590_vm0, %v3735_v31, %v3736_v25  ;;  %v3737_v19 = vrot.slane %v10353_v39, 1  ;;  %v10366_v10 = vsel %vm1287_vm2, %v4185_v34, %v4186_v41  ;;  %v4187_v2 = vrot.slane %v10353_v39, 2 }
 0x5f6   : > { %v3773_v28 = vpack.c.bf16 %v3743_v32, %v3744_v48  ;;  %v10373_v18 = vsel %vm1746_vm3, %v4467_v44, %v4468_v55  ;;  %v4469_v34 = vrot.slane %v10353_v39, 3  ;;  %v10382_v32 = vsel %vm2205_vm4, %v4749_v1, %v4750_v61 }
 0x5f7   : > { %v7230_v31 = vpop.f32.mrb[156].mxu1  ;;  %v3742_v15 = vsel %vm590_vm0, %v3736_v25, %v3737_v19  ;;  %11363 = vst [vmem:[#allocation20_spill] sm:$0xff] %v10382_v32  ;;  %v10387_v44 = vsel %vm1287_vm2, %v4186_v41, %v4187_v2  ;;  %v4751_v25 = vrot.slane %v10353_v39, 4 }
 0x5f8   : > { %v7231_v48 = vpop.f32.mrb[157].mxu1  ;;  %6883 = vmatmul.mubr.msk.bf16.gmra.mrb[180].mxu1 %vm3831_vm7, %v3773_v28  ;;  %v10397_v1 = vsel %vm1746_vm3, %v4468_v55, %v4469_v34 }
 0x5f9   : > { %v10392_v43 = vadd.f32 %v7231_v48, %v7230_v31  ;;  %v7233_v3 = vpop.f32.mrb[158].mxu1  ;;  %3955 = vmatprep.mubr.bf16.mxu1 %v11364_v8  ;;  %v10401_v28 = vsel %vm2205_vm4, %v4750_v61, %v4751_v25  ;;  %v11366_v61 = vrot.slane %v10030_v24, 2 }
 0x5fa   : > { %v7234_v54 = vpop.f32.mrb[159].mxu1 }
 0x5fb   : > { %v10403_v41 = vadd.f32 %v7234_v54, %v7233_v3  ;;  %v3738_v42 = vrot.slane %v10392_v43, 1  ;;  %v4188_v23 = vrot.slane %v10392_v43, 2  ;;  %v4470_v31 = vrot.slane %v10392_v43, 3 }
 0x5fc   : > { %v4752_v48 = vrot.slane %v10392_v43, 4 }
 0x5fd   : > { %v3741_v32 = vsel %vm590_vm0, %v3737_v19, %v3738_v42  ;;  %v3739_v55 = vrot.slane %v10403_v41, 1  ;;  %v10416_v3 = vsel %vm1287_vm2, %v4187_v2, %v4188_v23  ;;  %v4189_v4 = vrot.slane %v10403_v41, 2 }
 0x5fe   : > { %v3774_v54 = vpack.c.bf16 %v3741_v32, %v3742_v15  ;;  %v10423_v26 = vsel %vm1746_vm3, %v4469_v34, %v4470_v31  ;;  %v4471_v15 = vrot.slane %v10403_v41, 3 }
 0x5ff   : > { %v3740_v19 = vsel %vm590_vm0, %v3738_v42, %v3739_v55  ;;  %v3755_v50 = vsel %vm590_vm0, %v3739_v55, %v11365_v56  ;;  %v10437_v34 = vsel %vm1287_vm2, %v4188_v23, %v4189_v4  ;;  %v10443_v42 = vsel %vm1287_vm2, %v4189_v4, %v11366_v61 }
 0x600   : > { %6884 = vmatmul.mubr.msk.bf16.gmra.mrb[184].mxu1 %vm3831_vm7, %v3774_v54  ;;  %v3775_v32 = vpack.c.bf16 %v3755_v50, %v3740_v19  ;;  %v10447_v56 = vsel %vm2205_vm4, %v4751_v25, %v4752_v48  ;;  %v4225_v55 = vpack.c.bf16 %v10443_v42, %v10437_v34  ;;  %v10454_v50 = vsel %vm1746_vm3, %v4470_v31, %v4471_v15  ;;  %v8173_v34 = vld [vmem:[%s11311_s5 + $0x184] ss:$8 sps:$4 sm:$0xff]   ;;  %v8188_v42 = vld [vmem:[%s11313_s7 + $0x18] sm:$0xff]  }
 0x601   : > { %3965 = vmatprep.mubr.bf16.mxu1 %v11364_v8  ;;  %v11367_v23 = vrot.slane %v10030_v24, 3  ;;  %v4753_v61 = vrot.slane %v10403_v41, 4  ;;  %v11368_v31 = vrot.slane %v10030_v24, 4  ;;  %v11369_v4 = vpack.c.bf16 %v10032_v6, %v10030_v24  ;;  %v8142_v24 = vld [vmem:[%s11311_s5 + $0xe4] ss:$8 sps:$4 sm:$0xff]  }
 0x602   : > { %v11370_v6 = vpack.c.bf16 %v10072_v27, %v10066_v35  ;;  %v8143_v35 = vld [vmem:[%s11311_s5 + $0xf0] ss:$8 sps:$4 sm:$0xff]  }
 0x603   : > { %v10460_v54 = vsel %vm1746_vm3, %v4471_v15, %v11367_v23  ;;  %v10469_v19 = vsel %vm2205_vm4, %v4752_v48, %v4753_v61  ;;  %v10475_v2 = vsel %vm2205_vm4, %v4753_v61, %v11368_v31  ;;  %v8131_v23 = vld [vmem:[%s11311_s5 + $0xb0] ss:$8 sps:$4 sm:$0xff]   ;;  %v8136_v48 = vld [vmem:[%s11311_s5 + $0xc4] ss:$8 sps:$4 sm:$0xff]   ;;  %v8139_v61 = vld [vmem:[%s11311_s5 + $0xd4] ss:$8 sps:$4 sm:$0xff]  }
 0x604   : > { %v4507_v25 = vpack.c.bf16 %v10460_v54, %v10454_v50  ;;  %v4789_v15 = vpack.c.bf16 %v10475_v2, %v10469_v19  ;;  %v8137_v31 = vld [vmem:[%s11311_s5 + $0xd0] ss:$8 sps:$4 sm:$0xff]   ;;  %v8189_v54 = vld [vmem:[%s11313_s7 + $0x88] sm:$0xff]  }
 0x605   : > { %v8207_v2 = vld [vmem:[%s11313_s7 + $0xd0] sm:$0xff]   ;;  %v8209_v19 = vld [vmem:[%s11313_s7 + $0xd8] sm:$0xff]  }
 0x608   : > { %6885 = vmatmul.mubr.msk.bf16.gmra.mrb[188].mxu1 %vm3831_vm7, %v3775_v32  ;;  %v8134_v32 = vld [vmem:[%s11311_s5 + $0xc0] ss:$8 sps:$4 sm:$0xff]  }
 0x609   : > { %4093 = vmatprep.mubr.bf16.mxu1 %v11364_v8 }
 0x610   : > { %6899 = vmatmul.mubr.msk.bf16.vlgmr.msra.gmra.mrb[160].mxu1 %vm3831_vm7, %v11369_v4  ;;  %v8140_v4 = vld [vmem:[%s11311_s5 + $0xe0] ss:$8 sps:$4 sm:$0xff]  }
 0x611   : > { %4103 = vmatprep.mubr.bf16.mxu1 %v11364_v8  ;;  %4312 = vmatpush1.bf16.msra.mxu1 %v8131_v23  ;;  %v8145_v23 = vld [vmem:[%s11311_s5 + $0xf4] ss:$8 sps:$4 sm:$0xff]  }
 0x612   : > { %4313 = vmatprep.subr.bf16.mxu1 %v8136_v48  ;;  %v6917_v48 = vld [vmem:[%s11311_s5 + $0x100] sm:$0x33] }
 0x613   : > { %v6929_v27 = vcombine.high %v6917_v48, %v6917_v48 }
 0x615   : > { %4314 = vmatpush1.bf16.msra.mxu1 %v8134_v32  ;;  %v6928_v32 = vcombine.low %v6917_v48, %v6917_v48  ;;  %v11379_v48 = vpack.c.bf16 %v10211_v40, %v10170_v30  ;;  %v11381_v30 = vpack.c.bf16 %v10316_v36, %v10287_v60  ;;  %v11382_v40 = vpack.c.bf16 %v10366_v10, %v10337_v7  ;;  %v8184_v60 = vld [vmem:[%s11313_s7 + $0x8] sm:$0xff]   ;;  %v8170_v7 = vld [vmem:[%s11311_s5 + $0x174] ss:$8 sps:$4 sm:$0xff]  }
 0x616   : > { %4315 = vmatprep.subr.bf16.mxu1 %v8139_v61  ;;  %v11371_v61 = vpack.c.bf16 %v10130_v59, %v10109_v63  ;;  %v11373_v63 = vpack.c.bf16 %v10253_v16, %v10237_v11  ;;  %v11374_v59 = vpack.c.bf16 %v10303_v53, %v10292_v52  ;;  %v8148_v52 = vld [vmem:[%s11311_s5 + $0x108] ss:$8 sps:$4 sm:$0xff]   ;;  %v8153_v11 = vld [vmem:[%s11311_s5 + $0x11c] ss:$8 sps:$4 sm:$0xff]   ;;  %v8156_v16 = vld [vmem:[%s11311_s5 + $0x12c] ss:$8 sps:$4 sm:$0xff]  }
 0x617   : > { %v8154_v53 = vld [vmem:[%s11311_s5 + $0x128] ss:$8 sps:$4 sm:$0xff]  }
 0x618   : > { %6900 = vmatmul.mubr.msk.bf16.gmra.mrb[164].mxu1 %vm3831_vm7, %v11370_v6  ;;  %v11372_v6 = vpack.c.bf16 %v10195_v5, %v10175_v49  ;;  %v11375_v49 = vpack.c.bf16 %v10353_v39, %v10342_v29  ;;  %v11376_v5 = vpack.c.bf16 %v10403_v41, %v10392_v43  ;;  %v11377_v29 = vpack.c.bf16 %v10078_v46, %v10052_v21  ;;  %v8151_v43 = vld [vmem:[%s11311_s5 + $0x118] ss:$8 sps:$4 sm:$0xff]   ;;  %v8159_v21 = vld [vmem:[%s11311_s5 + $0x13c] ss:$8 sps:$4 sm:$0xff]   ;;  %v8162_v41 = vld [vmem:[%s11311_s5 + $0x14c] ss:$8 sps:$4 sm:$0xff]  }
 0x619   : > { %4113 = vmatprep.mubr.bf16.mxu1 %v11364_v8  ;;  %4316 = vmatpush1.bf16.msra.mxu1 %v8137_v31  ;;  %v4306_v31 = vsel %vm3856_vm6, %v6928_v32, 0  ;;  %v11378_v46 = vpack.c.bf16 %v10146_v22, %v10117_v17  ;;  %v8157_v39 = vld [vmem:[%s11311_s5 + $0x138] ss:$8 sps:$4 sm:$0xff]   ;;  %v8160_v17 = vld [vmem:[%s11311_s5 + $0x148] ss:$8 sps:$4 sm:$0xff]   ;;  %v11380_v32 = vpack.c.bf16 %v10266_v9, %v10232_v51  ;;  %v11383_v51 = vpack.c.bf16 %v10416_v3, %v10387_v44 }
 0x61a   : > { %4317 = vmatprep.subr.bf16.mxu1 %v8142_v24  ;;  %v8150_v24 = vld [vmem:[%s11311_s5 + $0x10c] ss:$8 sps:$4 sm:$0xff]   ;;  %v8182_v9 = vld [vmem:[%s11313_s7] sm:$0xff]   ;;  %v11384_v44 = vpack.c.bf16 %v10082_v57, %v10058_v47  ;;  %v8168_v3 = vld [vmem:[%s11311_s5 + $0x170] ss:$8 sps:$4 sm:$0xff]  }
 0x61b   : > { %5249 = vmatpush1.bf16.msra.mxu0 %v8182_v9  ;;  %v8165_v36 = vld [vmem:[%s11311_s5 + $0x160] ss:$8 sps:$4 sm:$0xff]   ;;  %v8186_v10 = vld [vmem:[%s11313_s7 + $0x10] sm:$0xff]   ;;  %v11406_v9 = vld [vmem:[#allocation19_spill] sm:$0xff] }
 0x61c   : > { %5250 = vmatprep.subr.bf16.mxu0 %v11364_v8  ;;  %v8171_v47 = vld [vmem:[%s11311_s5 + $0x180] ss:$8 sps:$4 sm:$0xff]   ;;  %v8176_v57 = vld [vmem:[%s11311_s5 + $0x194] ss:$8 sps:$4 sm:$0xff]  }
 0x61d   : > { %4318 = vmatpush1.bf16.msra.mxu1 %v8140_v4  ;;  %v6949_v4 = vld [vmem:[%s11311_s5 + $0x158] sm:$0x33] }
 0x61e   : > { %4319 = vmatprep.subr.bf16.mxu1 %v8145_v23  ;;  %v6961_v22 = vcombine.high %v6949_v4, %v6949_v4  ;;  %v6960_v23 = vcombine.low %v6949_v4, %v6949_v4  ;;  %v11399_v4 = vld [vmem:[#allocation16_spill] sm:$0xff] }
 0x61f   : > { %5251 = vmatpush1.bf16.msra.mxu0 %v8184_v60 }
 0x620   : > { %6901 = vmatmul.mubr.msk.bf16.gmra.mrb[168].mxu1 %vm3831_vm7, %v11371_v61  ;;  %5252 = vmatprep.subr.bf16.mxu0 %v11364_v8  ;;  %v11385_v61 = vpack.c.bf16 %v10156_v13, %v10121_v62  ;;  %v6981_v62 = vld [vmem:[%s11311_s5 + $0x1b0] sm:$0x33]  ;;  %v8177_v13 = vld [vmem:[%s11311_s5 + $0x1a0] ss:$8 sps:$4 sm:$0xff]  }
 0x621   : > { %4123 = vmatprep.mubr.bf16.mxu1 %v11364_v8  ;;  %4320 = vmatpush1.bf16.msra.mxu1 %v8143_v35  ;;  %v4588_v35 = vsel %vm3856_vm6, %v6960_v23, 0  ;;  %v8197_v23 = vld [vmem:[%s11313_s7 + $0xa8] sm:$0xff]  }
 0x622   : > { %6930 = vmatprep.subr.msk.bf16.mxu1 %vm3856_vm6, %v6929_v27  ;;  %v8167_v27 = vld [vmem:[%s11311_s5 + $0x164] ss:$8 sps:$4 sm:$0xff]  }
 0x623   : > { %5253 = vmatpush1.bf16.msra.mxu0 %v8186_v10  ;;  %v8205_v10 = vld [vmem:[%s11313_s7 + $0xc8] sm:$0xff]  }
 0x624   : > { %5254 = vmatprep.subr.bf16.mxu0 %v11364_v8 }
 0x625   : > { %4322 = vmatpush1.bf16.msra.mxu1 %v4306_v31  ;;  %v8174_v31 = vld [vmem:[%s11311_s5 + $0x190] ss:$8 sps:$4 sm:$0xff]  }
 0x626   : > { %4593 = vmatprep.subr.bf16.mxu1 %v8150_v24  ;;  %v8179_v24 = vld [vmem:[%s11311_s5 + $0x1a4] ss:$8 sps:$4 sm:$0xff]  }
 0x627   : > { %5255 = vmatpush1.bf16.msra.mxu0 %v8188_v42 }
 0x628   : > { %6902 = vmatmul.mubr.msk.bf16.gmra.mrb[172].mxu1 %vm3831_vm7, %v11372_v6  ;;  %5256 = vmatprep.subr.bf16.mxu0 %v11364_v8  ;;  %v8192_v6 = vld [vmem:[%s11313_s7 + $0x28] sm:$0xff]  }
 0x629   : > { %4133 = vmatprep.mubr.bf16.mxu1 %v11364_v8 }
 0x630   : > { %6903 = vmatmul.mubr.msk.bf16.gmra.mrb[176].mxu1 %vm3831_vm7, %v11373_v63  ;;  %v6993_v63 = vcombine.high %v6981_v62, %v6981_v62 }
 0x631   : > { %4143 = vmatprep.mubr.bf16.mxu1 %v11364_v8 }
 0x638   : > { %6904 = vmatmul.mubr.msk.bf16.gmra.mrb[180].mxu1 %vm3831_vm7, %v11374_v59  ;;  %v6992_v59 = vcombine.low %v6981_v62, %v6981_v62 }
 0x639   : > { %4153 = vmatprep.mubr.bf16.mxu1 %v11364_v8 }
 0x640   : > { %6905 = vmatmul.mubr.msk.bf16.gmra.mrb[184].mxu1 %vm3831_vm7, %v11375_v49  ;;  %v8194_v49 = vld [vmem:[%s11313_s7 + $0x30] sm:$0xff]  }
 0x641   : > { %4163 = vmatprep.mubr.bf16.mxu1 %v11364_v8 }
 0x648   : > { %6906 = vmatmul.mubr.msk.bf16.gmra.mrb[188].mxu1 %vm3831_vm7, %v11376_v5  ;;  %v11386_v5 = vpack.c.bf16 %v10218_v0, %v10186_v12  ;;  %v8198_v12 = vld [vmem:[%s11313_s7 + $0x40] sm:$0xff]   ;;  %v11387_v0 = vpack.c.bf16 %v10273_v33, %v10242_v58  ;;  %v11388_v58 = vpack.c.bf16 %v10323_v45, %v10297_v37  ;;  %v11389_v33 = vpack.c.bf16 %v10373_v18, %v10347_v38  ;;  %v8183_v45 = vld [vmem:[%s11313_s7 + $0x70] sm:$0xff]  }
 0x649   : > { %4343 = vmatprep.mubr.bf16.mxu1 %v11364_v8  ;;  %v11391_v37 = vld [vmem:[#allocation10_spill] sm:$0xff]  ;;  %v8187_v38 = vld [vmem:[%s11313_s7 + $0x80] sm:$0xff]  }
 0x64a   : > { %v11392_v18 = vpack.c.bf16 %v10086_v20, %v11391_v37  ;;  %v11394_v20 = vld [vmem:[#allocation11_spill] sm:$0xff] }
 0x650   : > { %6931 = vmatmul.mubr.msk.bf16.vlgmr.msra.gmra.mrb[160].mxu1 %vm3831_vm7, %v11377_v29  ;;  %v8200_v29 = vld [vmem:[%s11313_s7 + $0x48] sm:$0xff]  }
 0x651   : > { %4353 = vmatprep.mubr.bf16.mxu1 %v11364_v8  ;;  %4594 = vmatpush1.bf16.msra.mxu1 %v8148_v52  ;;  %v4870_v52 = vsel %vm3856_vm6, %v6992_v59, 0 }
 0x652   : > { %4595 = vmatprep.subr.bf16.mxu1 %v8153_v11  ;;  %v8196_v11 = vld [vmem:[%s11313_s7 + $0x38] sm:$0xff]  }
 0x655   : > { %4596 = vmatpush1.bf16.msra.mxu1 %v8151_v43  ;;  %v8202_v43 = vld [vmem:[%s11313_s7 + $0x50] sm:$0xff]  }
 0x656   : > { %4597 = vmatprep.subr.bf16.mxu1 %v8156_v16  ;;  %v11390_v16 = vpack.c.bf16 %v10423_v26, %v10397_v1  ;;  %v8185_v26 = vld [vmem:[%s11313_s7 + $0x78] sm:$0xff]   ;;  %v11393_v1 = vld [vmem:[#allocation12_spill] sm:$0xff] }
 0x657   : > { %v11395_v50 = vpack.c.bf16 %v11393_v1, %v11394_v20 }
 0x658   : > { %6932 = vmatmul.mubr.msk.bf16.gmra.mrb[164].mxu1 %vm3831_vm7, %v11378_v46 }
 0x659   : > { %4363 = vmatprep.mubr.bf16.mxu1 %v11364_v8  ;;  %4598 = vmatpush1.bf16.msra.mxu1 %v8154_v53  ;;  %v11396_v53 = vld [vmem:[#allocation14_spill] sm:$0xff] }
 0x65a   : > { %4599 = vmatprep.subr.bf16.mxu1 %v8159_v21  ;;  %v11397_v21 = vld [vmem:[#allocation13_spill] sm:$0xff] }
 0x65b   : > { %v11398_v46 = vpack.c.bf16 %v11396_v53, %v11397_v21 }
 0x65d   : > { %4600 = vmatpush1.bf16.msra.mxu1 %v8157_v39  ;;  %v8193_v39 = vld [vmem:[%s11313_s7 + $0x98] sm:$0xff]  }
 0x65e   : > { %4601 = vmatprep.subr.bf16.mxu1 %v8162_v41  ;;  %v8195_v41 = vld [vmem:[%s11313_s7 + $0xa0] sm:$0xff]  }
 0x660   : > { %6933 = vmatmul.mubr.msk.bf16.gmra.mrb[168].mxu1 %vm3831_vm7, %v11379_v48  ;;  %v8199_v48 = vld [vmem:[%s11313_s7 + $0xb0] sm:$0xff]  }
 0x661   : > { %4373 = vmatprep.mubr.bf16.mxu1 %v11364_v8  ;;  %4602 = vmatpush1.bf16.msra.mxu1 %v8160_v17  ;;  %v11400_v17 = vld [vmem:[#allocation15_spill] sm:$0xff] }
 0x662   : > { %6962 = vmatprep.subr.msk.bf16.mxu1 %vm3856_vm6, %v6961_v22  ;;  %v11401_v22 = vpack.c.bf16 %v11399_v4, %v11400_v17 }
 0x665   : > { %4604 = vmatpush1.bf16.msra.mxu1 %v4588_v35  ;;  %v11402_v35 = vld [vmem:[#allocation18_spill] sm:$0xff] }
 0x666   : > { %4875 = vmatprep.subr.bf16.mxu1 %v8167_v27  ;;  %v11403_v27 = vld [vmem:[#allocation17_spill] sm:$0xff] }
 0x668   : > { %6934 = vmatmul.mubr.msk.bf16.gmra.mrb[172].mxu1 %vm3831_vm7, %v11380_v32  ;;  %v11404_v32 = vpack.c.bf16 %v11402_v35, %v11403_v27 }
 0x669   : > { %4383 = vmatprep.mubr.bf16.mxu1 %v11364_v8 }
 0x670   : > { %6935 = vmatmul.mubr.msk.bf16.gmra.mrb[176].mxu1 %vm3831_vm7, %v11381_v30  ;;  %v8201_v30 = vld [vmem:[%s11313_s7 + $0xb8] sm:$0xff]  }
 0x671   : > { %4393 = vmatprep.mubr.bf16.mxu1 %v11364_v8 }
 0x678   : > { %6936 = vmatmul.mubr.msk.bf16.gmra.mrb[180].mxu1 %vm3831_vm7, %v11382_v40  ;;  %v8203_v40 = vld [vmem:[%s11313_s7 + $0xc0] sm:$0xff]  }
 0x679   : > { %4403 = vmatprep.mubr.bf16.mxu1 %v11364_v8 }
 0x680   : > { %6937 = vmatmul.mubr.msk.bf16.gmra.mrb[184].mxu1 %vm3831_vm7, %v11383_v51  ;;  %v11405_v51 = vld [vmem:[#allocation20_spill] sm:$0xff] }
 0x681   : > { %4413 = vmatprep.mubr.bf16.mxu1 %v11364_v8  ;;  %v11407_v60 = vpack.c.bf16 %v11405_v51, %v11406_v9 }
 0x688   : > { %6938 = vmatmul.mubr.msk.bf16.gmra.mrb[188].mxu1 %vm3831_vm7, %v4225_v55  ;;  %v8190_v55 = vld [vmem:[%s11313_s7 + $0x20] sm:$0xff]  }
 0x689   : > { %4625 = vmatprep.mubr.bf16.mxu1 %v11364_v8  ;;  %5257 = vmatpush1.bf16.msra.mxu0 %v8190_v55 }
 0x68a   : > { %5258 = vmatprep.subr.bf16.mxu0 %v11364_v8 }
 0x68d   : > { %5259 = vmatpush1.bf16.msra.mxu0 %v8192_v6 }
 0x68e   : > { %5260 = vmatprep.subr.bf16.mxu0 %v11364_v8 }
 0x690   : > { %6963 = vmatmul.mubr.msk.bf16.vlgmr.msra.gmra.mrb[160].mxu1 %vm3831_vm7, %v11384_v44  ;;  %v11409_v44 = vsub.s32 0, %v8518_v14 }
 0x691   : > { %4635 = vmatprep.mubr.bf16.mxu1 %v11364_v8  ;;  %4876 = vmatpush1.bf16.msra.mxu1 %v8165_v36  ;;  %v11408_v36 = vpack.c.bf16 %v10447_v56, %v10401_v28  ;;  %v8206_v28 = vld [vmem:[%s11313_s7 + $0x60] sm:$0xff]   ;;  %v8208_v56 = vld [vmem:[%s11313_s7 + $0x68] sm:$0xff]  }
 0x692   : > { %4877 = vmatprep.subr.bf16.mxu1 %v8170_v7  ;;  %5261 = vmatpush1.bf16.msra.mxu0 %v8194_v49  ;;  %v8204_v7 = vld [vmem:[%s11313_s7 + $0x58] sm:$0xff]  }
 0x693   : > { %5262 = vmatprep.subr.bf16.mxu0 %v11364_v8 }
 0x695   : > { %4878 = vmatpush1.bf16.msra.mxu1 %v8168_v3 }
 0x696   : > { %4879 = vmatprep.subr.bf16.mxu1 %v8173_v34  ;;  %5263 = vmatpush1.bf16.msra.mxu0 %v8196_v11 }
 0x697   : > { %5264 = vmatprep.subr.bf16.mxu0 %v11364_v8 }
 0x698   : > { %6964 = vmatmul.mubr.msk.bf16.gmra.mrb[164].mxu1 %vm3831_vm7, %v11385_v61 }
 0x699   : > { %4645 = vmatprep.mubr.bf16.mxu1 %v11364_v8  ;;  %4880 = vmatpush1.bf16.msra.mxu1 %v8171_v47 }
 0x69a   : > { %4881 = vmatprep.subr.bf16.mxu1 %v8176_v57  ;;  %5265 = vmatpush1.bf16.msra.mxu0 %v8198_v12 }
 0x69b   : > { %5266 = vmatprep.subr.bf16.mxu0 %v11364_v8 }
 0x69d   : > { %4882 = vmatpush1.bf16.msra.mxu1 %v8174_v31 }
 0x69e   : > { %4883 = vmatprep.subr.bf16.mxu1 %v8179_v24  ;;  %5267 = vmatpush1.bf16.msra.mxu0 %v8200_v29 }
 0x69f   : > { %5268 = vmatprep.subr.bf16.mxu0 %v11364_v8 }
 0x6a0   : > { %6965 = vmatmul.mubr.msk.bf16.gmra.mrb[168].mxu1 %vm3831_vm7, %v11386_v5 }
 0x6a1   : > { %4655 = vmatprep.mubr.bf16.mxu1 %v11364_v8  ;;  %4884 = vmatpush1.bf16.msra.mxu1 %v8177_v13 }
 0x6a2   : > { %6994 = vmatprep.subr.msk.bf16.mxu1 %vm3856_vm6, %v6993_v63  ;;  %5269 = vmatpush1.bf16.msra.mxu0 %v8202_v43 }
 0x6a3   : > { %5270 = vmatprep.subr.bf16.mxu0 %v11364_v8 }
 0x6a5   : > { %4886 = vmatpush1.bf16.msra.mxu1 %v4870_v52 }
 0x6a6   : > { %5458 = vmatprep.subr.bf16.mxu1 %v11364_v8  ;;  %5271 = vmatpush1.bf16.msra.mxu0 %v8204_v7 }
 0x6a7   : > { %5272 = vmatprep.subr.bf16.mxu0 %v11364_v8 }
 0x6a8   : > { %6966 = vmatmul.mubr.msk.bf16.gmra.mrb[172].mxu1 %vm3831_vm7, %v11387_v0 }
 0x6a9   : > { %4665 = vmatprep.mubr.bf16.mxu1 %v11364_v8 }
 0x6aa   : > { %5273 = vmatpush1.bf16.msra.mxu0 %v8206_v28 }
 0x6ab   : > { %5274 = vmatprep.subr.bf16.mxu0 %v11364_v8 }
 0x6ae   : > { %5275 = vmatpush1.bf16.msra.mxu0 %v8208_v56 }
 0x6b0   : > { %6967 = vmatmul.mubr.msk.bf16.gmra.mrb[176].mxu1 %vm3831_vm7, %v11388_v58 }
 0x6b1   : > { %4675 = vmatprep.mubr.bf16.mxu1 %v11364_v8 }
 0x6b8   : > { %6968 = vmatmul.mubr.msk.bf16.gmra.mrb[180].mxu1 %vm3831_vm7, %v11389_v33 }
 0x6b9   : > { %4685 = vmatprep.mubr.bf16.mxu1 %v11364_v8 }
 0x6c0   : > { %6969 = vmatmul.mubr.msk.bf16.gmra.mrb[184].mxu1 %vm3831_vm7, %v11390_v16 }
 0x6c1   : > { %4695 = vmatprep.mubr.bf16.mxu1 %v11364_v8 }
 0x6c8   : > { %6970 = vmatmul.mubr.msk.bf16.gmra.mrb[188].mxu1 %vm3831_vm7, %v4507_v25  ;;  %v8191_v25 = vld [vmem:[%s11313_s7 + $0x90] sm:$0xff]  }
 0x6c9   : > { %4907 = vmatprep.mubr.bf16.mxu1 %v11364_v8 }
 0x6d0   : > { %6995 = vmatmul.mubr.msk.bf16.vlgmr.msra.gmra.mrb[160].mxu1 %vm3831_vm7, %v11392_v18 }
 0x6d1   : > { %4917 = vmatprep.mubr.bf16.mxu1 %v11364_v8  ;;  %5459 = vmatpush1.bf16.msra.mxu1 %v8183_v45 }
 0x6d2   : > { %5460 = vmatprep.subr.bf16.mxu1 %v11364_v8 }
 0x6d5   : > { %5461 = vmatpush1.bf16.msra.mxu1 %v8185_v26 }
 0x6d6   : > { %5462 = vmatprep.subr.bf16.mxu1 %v11364_v8 }
 0x6d8   : > { %6996 = vmatmul.mubr.msk.bf16.gmra.mrb[164].mxu1 %vm3831_vm7, %v11395_v50 }
 0x6d9   : > { %4927 = vmatprep.mubr.bf16.mxu1 %v11364_v8  ;;  %5463 = vmatpush1.bf16.msra.mxu1 %v8187_v38 }
 0x6da   : > { %5464 = vmatprep.subr.bf16.mxu1 %v11364_v8 }
 0x6dd   : > { %5465 = vmatpush1.bf16.msra.mxu1 %v8189_v54 }
 0x6de   : > { %5466 = vmatprep.subr.bf16.mxu1 %v11364_v8 }
 0x6e0   : > { %6997 = vmatmul.mubr.msk.bf16.gmra.mrb[168].mxu1 %vm3831_vm7, %v11398_v46 }
 0x6e1   : > { %4937 = vmatprep.mubr.bf16.mxu1 %v11364_v8  ;;  %5467 = vmatpush1.bf16.msra.mxu1 %v8191_v25 }
 0x6e2   : > { %5468 = vmatprep.subr.bf16.mxu1 %v11364_v8 }
 0x6e5   : > { %5469 = vmatpush1.bf16.msra.mxu1 %v8193_v39 }
 0x6e6   : > { %5470 = vmatprep.subr.bf16.mxu1 %v11364_v8 }
 0x6e8   : > { %6998 = vmatmul.mubr.msk.bf16.gmra.mrb[172].mxu1 %vm3831_vm7, %v11401_v22 }
 0x6e9   : > { %4947 = vmatprep.mubr.bf16.mxu1 %v11364_v8  ;;  %5471 = vmatpush1.bf16.msra.mxu1 %v8195_v41 }
 0x6ea   : > { %5472 = vmatprep.subr.bf16.mxu1 %v11364_v8 }
 0x6ed   : > { %5473 = vmatpush1.bf16.msra.mxu1 %v8197_v23 }
 0x6ee   : > { %5474 = vmatprep.subr.bf16.mxu1 %v11364_v8 }
 0x6f0   : > { %6999 = vmatmul.mubr.msk.bf16.gmra.mrb[176].mxu1 %vm3831_vm7, %v11404_v32 }
 0x6f1   : > { %4957 = vmatprep.mubr.bf16.mxu1 %v11364_v8  ;;  %5475 = vmatpush1.bf16.msra.mxu1 %v8199_v48 }
 0x6f2   : > { %5476 = vmatprep.subr.bf16.mxu1 %v11364_v8 }
 0x6f5   : > { %5477 = vmatpush1.bf16.msra.mxu1 %v8201_v30 }
 0x6f6   : > { %5478 = vmatprep.subr.bf16.mxu1 %v11364_v8 }
 0x6f8   : > { %7000 = vmatmul.mubr.msk.bf16.gmra.mrb[180].mxu1 %vm3831_vm7, %v11407_v60 }
 0x6f9   : > { %4967 = vmatprep.mubr.bf16.mxu1 %v11364_v8  ;;  %5479 = vmatpush1.bf16.msra.mxu1 %v8203_v40 }
 0x6fa   : > { %5480 = vmatprep.subr.bf16.mxu1 %v11364_v8 }
 0x6fd   : > { %5481 = vmatpush1.bf16.msra.mxu1 %v8205_v10 }
 0x6fe   : > { %5482 = vmatprep.subr.bf16.mxu1 %v11364_v8 }
 0x700   : > { %7001 = vmatmul.mubr.msk.bf16.gmra.mrb[184].mxu1 %vm3831_vm7, %v11408_v36 }
 0x701   : > { %4977 = vmatprep.mubr.bf16.mxu1 %v11364_v8  ;;  %5483 = vmatpush1.bf16.msra.mxu1 %v8207_v2 }
 0x702   : > { %5484 = vmatprep.subr.bf16.mxu1 %v11364_v8  ;;  %v11410_v8 = vsub.s32 1, %v8518_v14  ;;  %v7075_v14 = vld [vmem:[%s11314_s8 + $0x4] sm:$0xf] }
 0x705   : > { %5485 = vmatpush1.bf16.msra.mxu1 %v8209_v19 }
 0x708   : > { %7002 = vmatmul.mubr.msk.bf16.gmra.mrb[188].mxu1 %vm3831_vm7, %v4789_v15  ;;  %v5020_v15 = vld [vmem:[%s11312_s6] sm:$0x3] }
 0x709   : > { %v10858_v3 = vrot.slane %v5020_v15, %v11409_v44  ;;  %v10862_v34 = vrot.slane %v5020_v15, %v11410_v8 }
 0x7a3   : > { %v4909_v42 = vpop.f32.mrb[160].mxu1 }
 0x7a4   : > { %v5032_v47 = vadd.f32 %v10858_v3, %v4909_v42  ;;  %v4911_v57 = vpop.f32.mrb[161].mxu1 }
 0x7a5   : > { %v5033_v55 = vadd.f32 %v10862_v34, %v4911_v57  ;;  %v4913_v61 = vpop.f32.mrb[162].mxu1 }
 0x7a6   : > { %v5034_v31 = vadd.f32 %v10858_v3, %v4913_v61  ;;  %v4915_v24 = vpop.f32.mrb[163].mxu1  ;;  %v5064_v62 = vmax.f32 %v5032_v47, 0.0 }
 0x7a7   : > { %v5035_v6 = vadd.f32 %v10862_v34, %v4915_v24  ;;  %v5065_v63 = vmax.f32 %v5033_v55, 0.0 }
 0x7a8   : > { %v5066_v13 = vmax.f32 %v5034_v31, 0.0 }
 0x7a9   : > { %v5067_v59 = vmax.f32 %v5035_v6, 0.0 }
 0x7aa   : > { %v5124_v49 = vpack.c.bf16 %v5066_v13, %v5064_v62 }
 0x7ab   : > { %v5125_v5 = vpack.c.bf16 %v5067_v59, %v5065_v63  ;;  %v4919_v52 = vpop.f32.mrb[164].mxu1 }
 0x7ac   : > { %v5036_v11 = vadd.f32 %v10858_v3, %v4919_v52  ;;  %v4921_v12 = vpop.f32.mrb[165].mxu1 }
 0x7ad   : > { %v5037_v0 = vadd.f32 %v10862_v34, %v4921_v12  ;;  %v4923_v29 = vpop.f32.mrb[166].mxu1  ;;  %7017 = vmatprep.mubr.msk.bf16.mxu0 %vm712_vm1, %v5125_v5  ;;  %7067 = vmatprep.mubr.msk.bf16.mxu1 %vm712_vm1, %v5125_v5 }
 0x7ae   : > { %v5038_v43 = vadd.f32 %v10858_v3, %v4923_v29  ;;  %v4925_v58 = vpop.f32.mrb[167].mxu1  ;;  %5281 = vmatmul.mubr.bf16.vlgmr.msra.gmra.mrb[64].mxu0 %v5124_v49  ;;  %5491 = vmatmul.mubr.bf16.vlgmr.msra.gmra.mrb[192].mxu1 %v5124_v49  ;;  %v5068_v16 = vmax.f32 %v5036_v11, 0.0 }
 0x7af   : > { %v5039_v33 = vadd.f32 %v10862_v34, %v4925_v58  ;;  %v5069_v37 = vmax.f32 %v5037_v0, 0.0 }
 0x7b0   : > { %v5070_v45 = vmax.f32 %v5038_v43, 0.0 }
 0x7b1   : > { %v5071_v18 = vmax.f32 %v5039_v33, 0.0 }
 0x7b2   : > { %v5126_v26 = vpack.c.bf16 %v5070_v45, %v5068_v16 }
 0x7b3   : > { %v5127_v38 = vpack.c.bf16 %v5071_v18, %v5069_v37  ;;  %v4929_v1 = vpop.f32.mrb[168].mxu1 }
 0x7b4   : > { %v5040_v20 = vadd.f32 %v10858_v3, %v4929_v1  ;;  %v4931_v50 = vpop.f32.mrb[169].mxu1 }
 0x7b5   : > { %v5041_v54 = vadd.f32 %v10862_v34, %v4931_v50  ;;  %v4933_v25 = vpop.f32.mrb[170].mxu1  ;;  %7018 = vmatprep.mubr.msk.bf16.mxu0 %vm712_vm1, %v5127_v38  ;;  %7068 = vmatprep.mubr.msk.bf16.mxu1 %vm712_vm1, %v5127_v38 }
 0x7b6   : > { %v5042_v53 = vadd.f32 %v10858_v3, %v4933_v25  ;;  %v4935_v21 = vpop.f32.mrb[171].mxu1  ;;  %5289 = vmatmul.mubr.bf16.gmra.mrb[68].mxu0 %v5126_v26  ;;  %5499 = vmatmul.mubr.bf16.gmra.mrb[196].mxu1 %v5126_v26  ;;  %v5072_v39 = vmax.f32 %v5040_v20, 0.0 }
 0x7b7   : > { %v5043_v46 = vadd.f32 %v10862_v34, %v4935_v21  ;;  %v5073_v4 = vmax.f32 %v5041_v54, 0.0 }
 0x7b8   : > { %v5074_v41 = vmax.f32 %v5042_v53, 0.0 }
 0x7b9   : > { %v5075_v17 = vmax.f32 %v5043_v46, 0.0 }
 0x7ba   : > { %v5128_v22 = vpack.c.bf16 %v5074_v41, %v5072_v39 }
 0x7bb   : > { %v5129_v23 = vpack.c.bf16 %v5075_v17, %v5073_v4  ;;  %v4939_v48 = vpop.f32.mrb[172].mxu1 }
 0x7bc   : > { %v5044_v35 = vadd.f32 %v10858_v3, %v4939_v48  ;;  %v4941_v27 = vpop.f32.mrb[173].mxu1 }
 0x7bd   : > { %v5045_v32 = vadd.f32 %v10862_v34, %v4941_v27  ;;  %v4943_v30 = vpop.f32.mrb[174].mxu1  ;;  %7019 = vmatprep.mubr.msk.bf16.mxu0 %vm712_vm1, %v5129_v23  ;;  %7069 = vmatprep.mubr.msk.bf16.mxu1 %vm712_vm1, %v5129_v23 }
 0x7be   : > { %v5046_v40 = vadd.f32 %v10858_v3, %v4943_v30  ;;  %v4945_v51 = vpop.f32.mrb[175].mxu1  ;;  %5297 = vmatmul.mubr.bf16.gmra.mrb[72].mxu0 %v5128_v22  ;;  %5507 = vmatmul.mubr.bf16.gmra.mrb[200].mxu1 %v5128_v22  ;;  %v5076_v60 = vmax.f32 %v5044_v35, 0.0 }
 0x7bf   : > { %v5047_v9 = vadd.f32 %v10862_v34, %v4945_v51  ;;  %v5077_v7 = vmax.f32 %v5045_v32, 0.0 }
 0x7c0   : > { %v5078_v36 = vmax.f32 %v5046_v40, 0.0 }
 0x7c1   : > { %v5079_v10 = vmax.f32 %v5047_v9, 0.0 }
 0x7c2   : > { %v5130_v28 = vpack.c.bf16 %v5078_v36, %v5076_v60  ;;  %v8343_v36 = vmov 0.0  }
 0x7c3   : > { %v5131_v2 = vpack.c.bf16 %v5079_v10, %v5077_v7  ;;  %v4949_v56 = vpop.f32.mrb[176].mxu1  ;;  %7327 = vmatprep.subr.bf16.mxu0 %v8343_v36  ;;  %7347 = vmatprep.subr.bf16.mxu1 %v8343_v36 }
 0x7c4   : > { %v5048_v19 = vadd.f32 %v10858_v3, %v4949_v56  ;;  %v4951_v15 = vpop.f32.mrb[177].mxu1 }
 0x7c5   : > { %v5049_v44 = vadd.f32 %v10862_v34, %v4951_v15  ;;  %v4953_v8 = vpop.f32.mrb[178].mxu1  ;;  %7020 = vmatprep.mubr.msk.bf16.mxu0 %vm712_vm1, %v5131_v2  ;;  %7070 = vmatprep.mubr.msk.bf16.mxu1 %vm712_vm1, %v5131_v2 }
 0x7c6   : > { %v5050_v42 = vadd.f32 %v10858_v3, %v4953_v8  ;;  %v4955_v47 = vpop.f32.mrb[179].mxu1  ;;  %5305 = vmatmul.mubr.bf16.gmra.mrb[76].mxu0 %v5130_v28  ;;  %5515 = vmatmul.mubr.bf16.gmra.mrb[204].mxu1 %v5130_v28  ;;  %v5080_v55 = vmax.f32 %v5048_v19, 0.0 }
 0x7c7   : > { %v5051_v57 = vadd.f32 %v10862_v34, %v4955_v47  ;;  %v5081_v31 = vmax.f32 %v5049_v44, 0.0 }
 0x7c8   : > { %v5082_v61 = vmax.f32 %v5050_v42, 0.0 }
 0x7c9   : > { %v5083_v24 = vmax.f32 %v5051_v57, 0.0 }
 0x7ca   : > { %v5132_v6 = vpack.c.bf16 %v5082_v61, %v5080_v55 }
 0x7cb   : > { %v5133_v62 = vpack.c.bf16 %v5083_v24, %v5081_v31  ;;  %v4959_v13 = vpop.f32.mrb[180].mxu1 }
 0x7cc   : > { %v5052_v63 = vadd.f32 %v10858_v3, %v4959_v13  ;;  %v4961_v59 = vpop.f32.mrb[181].mxu1 }
 0x7cd   : > { %v5053_v49 = vadd.f32 %v10862_v34, %v4961_v59  ;;  %v4963_v5 = vpop.f32.mrb[182].mxu1  ;;  %7021 = vmatprep.mubr.msk.bf16.mxu0 %vm712_vm1, %v5133_v62  ;;  %7071 = vmatprep.mubr.msk.bf16.mxu1 %vm712_vm1, %v5133_v62 }
 0x7ce   : > { %v5054_v52 = vadd.f32 %v10858_v3, %v4963_v5  ;;  %v4965_v11 = vpop.f32.mrb[183].mxu1  ;;  %5313 = vmatmul.mubr.bf16.gmra.mrb[80].mxu0 %v5132_v6  ;;  %5523 = vmatmul.mubr.bf16.gmra.mrb[208].mxu1 %v5132_v6  ;;  %v5084_v0 = vmax.f32 %v5052_v63, 0.0 }
 0x7cf   : > { %v5055_v12 = vadd.f32 %v10862_v34, %v4965_v11  ;;  %v5085_v43 = vmax.f32 %v5053_v49, 0.0 }
 0x7d0   : > { %v5086_v29 = vmax.f32 %v5054_v52, 0.0 }
 0x7d1   : > { %v5087_v58 = vmax.f32 %v5055_v12, 0.0 }
 0x7d2   : > { %v5134_v33 = vpack.c.bf16 %v5086_v29, %v5084_v0 }
 0x7d3   : > { %v5135_v16 = vpack.c.bf16 %v5087_v58, %v5085_v43  ;;  %v4969_v45 = vpop.f32.mrb[184].mxu1 }
 0x7d4   : > { %v5056_v37 = vadd.f32 %v10858_v3, %v4969_v45  ;;  %v4971_v18 = vpop.f32.mrb[185].mxu1 }
 0x7d5   : > { %v5057_v26 = vadd.f32 %v10862_v34, %v4971_v18  ;;  %v4973_v38 = vpop.f32.mrb[186].mxu1  ;;  %7022 = vmatprep.mubr.msk.bf16.mxu0 %vm712_vm1, %v5135_v16  ;;  %7072 = vmatprep.mubr.msk.bf16.mxu1 %vm712_vm1, %v5135_v16 }
 0x7d6   : > { %v5058_v1 = vadd.f32 %v10858_v3, %v4973_v38  ;;  %v4975_v20 = vpop.f32.mrb[187].mxu1  ;;  %5321 = vmatmul.mubr.bf16.gmra.mrb[84].mxu0 %v5134_v33  ;;  %5531 = vmatmul.mubr.bf16.gmra.mrb[212].mxu1 %v5134_v33  ;;  %v5088_v54 = vmax.f32 %v5056_v37, 0.0 }
 0x7d7   : > { %v5059_v50 = vadd.f32 %v10862_v34, %v4975_v20  ;;  %v5089_v53 = vmax.f32 %v5057_v26, 0.0 }
 0x7d8   : > { %v5090_v25 = vmax.f32 %v5058_v1, 0.0 }
 0x7d9   : > { %v5091_v21 = vmax.f32 %v5059_v50, 0.0 }
 0x7da   : > { %v5136_v46 = vpack.c.bf16 %v5090_v25, %v5088_v54 }
 0x7db   : > { %v5137_v39 = vpack.c.bf16 %v5091_v21, %v5089_v53  ;;  %v4979_v41 = vpop.f32.mrb[188].mxu1 }
 0x7dc   : > { %v5060_v4 = vadd.f32 %v10858_v3, %v4979_v41  ;;  %v4981_v17 = vpop.f32.mrb[189].mxu1 }
 0x7dd   : > { %v5061_v22 = vadd.f32 %v10862_v34, %v4981_v17  ;;  %v4983_v23 = vpop.f32.mrb[190].mxu1  ;;  %7023 = vmatprep.mubr.msk.bf16.mxu0 %vm712_vm1, %v5137_v39  ;;  %7073 = vmatprep.mubr.msk.bf16.mxu1 %vm712_vm1, %v5137_v39 }
 0x7de   : > { %v5062_v48 = vadd.f32 %v10858_v3, %v4983_v23  ;;  %v4985_v35 = vpop.f32.mrb[191].mxu1  ;;  %5329 = vmatmul.mubr.bf16.gmra.mrb[88].mxu0 %v5136_v46  ;;  %5539 = vmatmul.mubr.bf16.gmra.mrb[216].mxu1 %v5136_v46  ;;  %v5092_v32 = vmax.f32 %v5060_v4, 0.0 }
 0x7df   : > { %v5063_v27 = vadd.f32 %v10862_v34, %v4985_v35  ;;  %v5093_v40 = vmax.f32 %v5061_v22, 0.0 }
 0x7e0   : > { %v5094_v30 = vmax.f32 %v5062_v48, 0.0 }
 0x7e1   : > { %v5095_v51 = vmax.f32 %v5063_v27, 0.0 }
 0x7e2   : > { %v5138_v9 = vpack.c.bf16 %v5094_v30, %v5092_v32 }
 0x7e3   : > { %v5139_v60 = vpack.c.bf16 %v5095_v51, %v5093_v40 }
 0x7e5   : > { %7024 = vmatprep.mubr.msk.bf16.mxu0 %vm712_vm1, %v5139_v60  ;;  %7074 = vmatprep.mubr.msk.bf16.mxu1 %vm712_vm1, %v5139_v60 }
 0x7e6   : > { %5337 = vmatmul.mubr.bf16.gmra.mrb[92].mxu0 %v5138_v9  ;;  %5547 = vmatmul.mubr.bf16.gmra.mrb[220].mxu1 %v5138_v9 }
 0x7e7   : > { %7363 = vmatprep.mubr.msk.bf16.mxu1 %vm8344_vm8, %v8343_v36  ;;  %7343 = vmatprep.mubr.msk.bf16.mxu0 %vm8344_vm8, %v8343_v36 }
 0x881   : > { %v5282_v3 = vpop.f32.mrb[64].mxu0  ;;  %v5492_v34 = vpop.f32.mrb[192].mxu1 }
 0x882   : > { %v10918_v7 = vmax.f32 %v5282_v3, %v5492_v34  ;;  %v5284_v10 = vpop.f32.mrb[65].mxu0  ;;  %v5494_v28 = vpop.f32.mrb[193].mxu1 }
 0x883   : > { %v5285_v2 = vpop.f32.mrb[66].mxu0  ;;  %v5495_v56 = vpop.f32.mrb[194].mxu1 }
 0x884   : > { %v5556_v19 = vmax.f32 %v5285_v2, %v5495_v56  ;;  %v5287_v15 = vpop.f32.mrb[67].mxu0  ;;  %v5497_v44 = vpop.f32.mrb[195].mxu1  ;;  %v5571_v8 = vrot.slane %v10918_v7, 1 }
 0x886   : > { %v5572_v42 = vrot.slane %v5556_v19, 1 }
 0x888   : > { %v5601_v47 = vsel %vm590_vm0, %v5571_v8, %v5572_v42 }
 0x889   : > { %v5603_v57 = vmax.f32 %v10918_v7, %v5601_v47  ;;  %v5290_v55 = vpop.f32.mrb[68].mxu0  ;;  %v5500_v61 = vpop.f32.mrb[196].mxu1  ;;  %v5619_v7 = vld [vmem:[%s11314_s8] sm:$0xf] }
 0x88a   : > { %v5557_v31 = vmax.f32 %v5290_v55, %v5500_v61  ;;  %v5292_v24 = vpop.f32.mrb[69].mxu0  ;;  %v5502_v6 = vpop.f32.mrb[197].mxu1 }
 0x88b   : > { %v5293_v62 = vpop.f32.mrb[70].mxu0  ;;  %v5503_v13 = vpop.f32.mrb[198].mxu1 }
 0x88c   : > { %v5573_v63 = vrot.slane %v5557_v31, 1  ;;  %v5558_v59 = vmax.f32 %v5293_v62, %v5503_v13  ;;  %v5295_v49 = vpop.f32.mrb[71].mxu0  ;;  %v5505_v5 = vpop.f32.mrb[199].mxu1 }
 0x88e   : > { %v5600_v52 = vsel %vm590_vm0, %v5572_v42, %v5573_v63  ;;  %v5574_v11 = vrot.slane %v5558_v59, 1 }
 0x88f   : > { %v5604_v12 = vmax.f32 %v5556_v19, %v5600_v52 }
 0x890   : > { %v5599_v0 = vsel %vm590_vm0, %v5573_v63, %v5574_v11 }
 0x891   : > { %v10930_v29 = vpack.c.bf16 %v5604_v12, %v5603_v57  ;;  %v5605_v43 = vmax.f32 %v5557_v31, %v5599_v0  ;;  %v5298_v58 = vpop.f32.mrb[72].mxu0  ;;  %v5508_v33 = vpop.f32.mrb[200].mxu1 }
 0x892   : > { %v5559_v16 = vmax.f32 %v5298_v58, %v5508_v33  ;;  %v5300_v45 = vpop.f32.mrb[73].mxu0  ;;  %v5510_v37 = vpop.f32.mrb[201].mxu1 }
 0x893   : > { %v5301_v18 = vpop.f32.mrb[74].mxu0  ;;  %v5511_v26 = vpop.f32.mrb[202].mxu1  ;;  %7328 = vmatpush3.bf16.msra.mxu0 %v10930_v29  ;;  %7348 = vmatpush3.bf16.msra.mxu1 %v10930_v29 }
 0x894   : > { %v5575_v38 = vrot.slane %v5559_v16, 1  ;;  %v5560_v1 = vmax.f32 %v5301_v18, %v5511_v26  ;;  %v5303_v20 = vpop.f32.mrb[75].mxu0  ;;  %v5513_v50 = vpop.f32.mrb[203].mxu1  ;;  %7329 = vmatprep.subr.bf16.mxu0 %v8343_v36  ;;  %7349 = vmatprep.subr.bf16.mxu1 %v8343_v36 }
 0x896   : > { %v5598_v54 = vsel %vm590_vm0, %v5574_v11, %v5575_v38  ;;  %v5576_v25 = vrot.slane %v5560_v1, 1 }
 0x897   : > { %v5606_v53 = vmax.f32 %v5558_v59, %v5598_v54 }
 0x898   : > { %v5597_v21 = vsel %vm590_vm0, %v5575_v38, %v5576_v25 }
 0x899   : > { %v10940_v46 = vpack.c.bf16 %v5606_v53, %v5605_v43  ;;  %v5607_v39 = vmax.f32 %v5559_v16, %v5597_v21  ;;  %v5306_v41 = vpop.f32.mrb[76].mxu0  ;;  %v5516_v4 = vpop.f32.mrb[204].mxu1 }
 0x89a   : > { %v5561_v17 = vmax.f32 %v5306_v41, %v5516_v4  ;;  %v5308_v22 = vpop.f32.mrb[77].mxu0  ;;  %v5518_v23 = vpop.f32.mrb[205].mxu1 }
 0x89b   : > { %v5309_v48 = vpop.f32.mrb[78].mxu0  ;;  %v5519_v35 = vpop.f32.mrb[206].mxu1  ;;  %7330 = vmatpush3.bf16.msra.mxu0 %v10940_v46  ;;  %7350 = vmatpush3.bf16.msra.mxu1 %v10940_v46 }
 0x89c   : > { %v5577_v27 = vrot.slane %v5561_v17, 1  ;;  %v5562_v32 = vmax.f32 %v5309_v48, %v5519_v35  ;;  %v5311_v30 = vpop.f32.mrb[79].mxu0  ;;  %v5521_v40 = vpop.f32.mrb[207].mxu1  ;;  %7331 = vmatprep.subr.bf16.mxu0 %v8343_v36  ;;  %7351 = vmatprep.subr.bf16.mxu1 %v8343_v36 }
 0x89e   : > { %v5596_v51 = vsel %vm590_vm0, %v5576_v25, %v5577_v27  ;;  %v5578_v9 = vrot.slane %v5562_v32, 1 }
 0x89f   : > { %v5608_v60 = vmax.f32 %v5560_v1, %v5596_v51 }
 0x8a0   : > { %v5595_v3 = vsel %vm590_vm0, %v5577_v27, %v5578_v9 }
 0x8a1   : > { %v10950_v34 = vpack.c.bf16 %v5608_v60, %v5607_v39  ;;  %v5609_v10 = vmax.f32 %v5561_v17, %v5595_v3  ;;  %v5314_v28 = vpop.f32.mrb[80].mxu0  ;;  %v5524_v2 = vpop.f32.mrb[208].mxu1 }
 0x8a2   : > { %v5563_v56 = vmax.f32 %v5314_v28, %v5524_v2  ;;  %v5316_v19 = vpop.f32.mrb[81].mxu0  ;;  %v5526_v15 = vpop.f32.mrb[209].mxu1 }
 0x8a3   : > { %v5317_v44 = vpop.f32.mrb[82].mxu0  ;;  %v5527_v42 = vpop.f32.mrb[210].mxu1  ;;  %7332 = vmatpush3.bf16.msra.mxu0 %v10950_v34  ;;  %7352 = vmatpush3.bf16.msra.mxu1 %v10950_v34 }
 0x8a4   : > { %v5579_v47 = vrot.slane %v5563_v56, 1  ;;  %v5564_v57 = vmax.f32 %v5317_v44, %v5527_v42  ;;  %v5319_v55 = vpop.f32.mrb[83].mxu0  ;;  %v5529_v61 = vpop.f32.mrb[211].mxu1  ;;  %7333 = vmatprep.subr.bf16.mxu0 %v8343_v36  ;;  %7353 = vmatprep.subr.bf16.mxu1 %v8343_v36 }
 0x8a6   : > { %v5594_v31 = vsel %vm590_vm0, %v5578_v9, %v5579_v47  ;;  %v5580_v24 = vrot.slane %v5564_v57, 1 }
 0x8a7   : > { %v5610_v6 = vmax.f32 %v5562_v32, %v5594_v31 }
 0x8a8   : > { %v5593_v62 = vsel %vm590_vm0, %v5579_v47, %v5580_v24 }
 0x8a9   : > { %v10960_v13 = vpack.c.bf16 %v5610_v6, %v5609_v10  ;;  %v5611_v63 = vmax.f32 %v5563_v56, %v5593_v62  ;;  %v5322_v59 = vpop.f32.mrb[84].mxu0  ;;  %v5532_v49 = vpop.f32.mrb[212].mxu1  ;;  %v8211_v62 = vld [vmem:[%s11315_s9 + $0x30] sm:$0xff]  }
 0x8aa   : > { %v5565_v5 = vmax.f32 %v5322_v59, %v5532_v49  ;;  %v5324_v52 = vpop.f32.mrb[85].mxu0  ;;  %v5534_v11 = vpop.f32.mrb[213].mxu1  ;;  %v8213_v59 = vld [vmem:[%s11315_s9 + $0x40] sm:$0xff]   ;;  %v8214_v49 = vld [vmem:[%s11315_s9 + $0x48] sm:$0xff]  }
 0x8ab   : > { %v5325_v12 = vpop.f32.mrb[86].mxu0  ;;  %v5535_v0 = vpop.f32.mrb[214].mxu1  ;;  %7334 = vmatpush3.bf16.msra.mxu0 %v10960_v13  ;;  %7354 = vmatpush3.bf16.msra.mxu1 %v10960_v13  ;;  %v7115_v52 = vld [vmem:[%s11314_s8 + $0xc] sm:$0xf] }
 0x8ac   : > { %v5581_v43 = vrot.slane %v5565_v5, 1  ;;  %v5566_v58 = vmax.f32 %v5325_v12, %v5535_v0  ;;  %v5327_v33 = vpop.f32.mrb[87].mxu0  ;;  %v5537_v16 = vpop.f32.mrb[215].mxu1  ;;  %7335 = vmatprep.subr.bf16.mxu0 %v8343_v36  ;;  %7355 = vmatprep.subr.bf16.mxu1 %v8343_v36  ;;  %v8215_v12 = vld [vmem:[%s11315_s9] sm:$0xff]  }
 0x8ae   : > { %v5592_v45 = vsel %vm590_vm0, %v5580_v24, %v5581_v43  ;;  %v5582_v37 = vrot.slane %v5566_v58, 1 }
 0x8af   : > { %v5612_v18 = vmax.f32 %v5564_v57, %v5592_v45 }
 0x8b0   : > { %v5591_v26 = vsel %vm590_vm0, %v5581_v43, %v5582_v37 }
 0x8b1   : > { %v10970_v38 = vpack.c.bf16 %v5612_v18, %v5611_v63  ;;  %v5613_v1 = vmax.f32 %v5565_v5, %v5591_v26  ;;  %v5330_v20 = vpop.f32.mrb[88].mxu0  ;;  %v5540_v50 = vpop.f32.mrb[216].mxu1  ;;  %v8212_v63 = vld [vmem:[%s11315_s9 + $0x38] sm:$0xff]   ;;  %v7098_v5 = vld [vmem:[%s11314_s8 + $0x8] sm:$0xf] }
 0x8b2   : > { %v5567_v54 = vmax.f32 %v5330_v20, %v5540_v50  ;;  %v5332_v25 = vpop.f32.mrb[89].mxu0  ;;  %v5542_v53 = vpop.f32.mrb[217].mxu1  ;;  %v8216_v26 = vld [vmem:[%s11315_s9 + $0x8] sm:$0xff]   ;;  %v8218_v20 = vld [vmem:[%s11315_s9 + $0x18] sm:$0xff]   ;;  %v8219_v50 = vld [vmem:[%s11315_s9 + $0x20] sm:$0xff]  }
 0x8b3   : > { %v5333_v21 = vpop.f32.mrb[90].mxu0  ;;  %v5543_v39 = vpop.f32.mrb[218].mxu1  ;;  %7336 = vmatpush3.bf16.msra.mxu0 %v10970_v38  ;;  %7356 = vmatpush3.bf16.msra.mxu1 %v10970_v38  ;;  %v8220_v25 = vld [vmem:[%s11315_s9 + $0x50] sm:$0xff]   ;;  %v8221_v53 = vld [vmem:[%s11315_s9 + $0x58] sm:$0xff]  }
 0x8b4   : > { %v5583_v41 = vrot.slane %v5567_v54, 1  ;;  %v5568_v4 = vmax.f32 %v5333_v21, %v5543_v39  ;;  %v5335_v17 = vpop.f32.mrb[91].mxu0  ;;  %v5545_v22 = vpop.f32.mrb[219].mxu1  ;;  %7337 = vmatprep.subr.bf16.mxu0 %v8343_v36  ;;  %7357 = vmatprep.subr.bf16.mxu1 %v8343_v36  ;;  %v8222_v21 = vld [vmem:[%s11315_s9 + $0x60] sm:$0xff]   ;;  %v8223_v39 = vld [vmem:[%s11315_s9 + $0x68] sm:$0xff]  }
 0x8b6   : > { %v5590_v23 = vsel %vm590_vm0, %v5582_v37, %v5583_v41  ;;  %v5584_v48 = vrot.slane %v5568_v4, 1 }
 0x8b7   : > { %v5614_v35 = vmax.f32 %v5566_v58, %v5590_v23  ;;  %v8224_v23 = vld [vmem:[%s11315_s9 + $0x70] sm:$0xff]  }
 0x8b8   : > { %v5589_v27 = vsel %vm590_vm0, %v5583_v41, %v5584_v48 }
 0x8b9   : > { %v10980_v32 = vpack.c.bf16 %v5614_v35, %v5613_v1  ;;  %v5615_v30 = vmax.f32 %v5567_v54, %v5589_v27  ;;  %v5338_v40 = vpop.f32.mrb[92].mxu0  ;;  %v5548_v51 = vpop.f32.mrb[220].mxu1  ;;  %v8217_v1 = vld [vmem:[%s11315_s9 + $0x10] sm:$0xff]   ;;  %v8226_v27 = vld [vmem:[%s11315_s9 + $0x80] sm:$0xff]  }
 0x8ba   : > { %v5569_v9 = vmax.f32 %v5338_v40, %v5548_v51  ;;  %v5340_v60 = vpop.f32.mrb[93].mxu0  ;;  %v5550_v3 = vpop.f32.mrb[221].mxu1  ;;  %v8228_v40 = vld [vmem:[%s11315_s9 + $0x90] sm:$0xff]   ;;  %v8229_v51 = vld [vmem:[%s11315_s9 + $0x98] sm:$0xff]  }
 0x8bb   : > { %v5341_v10 = vpop.f32.mrb[94].mxu0  ;;  %v5551_v28 = vpop.f32.mrb[222].mxu1  ;;  %7338 = vmatpush3.bf16.msra.mxu0 %v10980_v32  ;;  %7358 = vmatpush3.bf16.msra.mxu1 %v10980_v32 }
 0x8bc   : > { %v5585_v2 = vrot.slane %v5569_v9, 1  ;;  %v5570_v56 = vmax.f32 %v5341_v10, %v5551_v28  ;;  %v5343_v19 = vpop.f32.mrb[95].mxu0  ;;  %v5553_v15 = vpop.f32.mrb[223].mxu1  ;;  %7339 = vmatprep.subr.bf16.mxu0 %v8343_v36  ;;  %7359 = vmatprep.subr.bf16.mxu1 %v8343_v36 }
 0x8be   : > { %v5588_v44 = vsel %vm590_vm0, %v5584_v48, %v5585_v2  ;;  %v5586_v42 = vrot.slane %v5570_v56, 1  ;;  %v8225_v48 = vld [vmem:[%s11315_s9 + $0x78] sm:$0xff]  }
 0x8bf   : > { %v5616_v47 = vmax.f32 %v5568_v4, %v5588_v44 }
 0x8c0   : > { %v5587_v57 = vsel %vm590_vm0, %v5585_v2, %v5586_v42  ;;  %v5602_v55 = vsel %vm590_vm0, %v5586_v42, %v5571_v8  ;;  %v8210_v8 = vld [vmem:[%s11315_s9 + $0x28] sm:$0xff]  }
 0x8c1   : > { %v10994_v61 = vpack.c.bf16 %v5616_v47, %v5615_v30  ;;  %v5617_v31 = vmax.f32 %v5569_v9, %v5587_v57  ;;  %v5618_v24 = vmax.f32 %v5570_v56, %v5602_v55  ;;  %v8227_v30 = vld [vmem:[%s11315_s9 + $0x88] sm:$0xff]  }
 0x8c3   : > { %v10996_v6 = vpack.c.bf16 %v5618_v24, %v5617_v31  ;;  %7340 = vmatpush3.bf16.msra.mxu0 %v10994_v61  ;;  %7360 = vmatpush3.bf16.msra.mxu1 %v10994_v61 }
 0x8c4   : > { %7341 = vmatprep.subr.bf16.mxu0 %v8343_v36  ;;  %7361 = vmatprep.subr.bf16.mxu1 %v8343_v36 }
 0x8c7   : > { %7342 = vmatpush3.bf16.msra.mxu0 %v10996_v6  ;;  %7362 = vmatpush3.bf16.msra.mxu1 %v10996_v6 }
 0x8c8   : > { %7395 = vmatprep.subr.bf16.mxu1 %v8343_v36  ;;  %7367 = vmatprep.subr.bf16.mxu0 %v8343_v36 }
 0x8ca   : > { %7364 = vmatmul.mubr.bf16.vlgmr.msra.gmra.mrb[224].mxu1 %v7075_v14  ;;  %7344 = vmatmul.mubr.bf16.vlgmr.msra.gmra.mrb[96].mxu0 %v5619_v7 }
 0x8cb   : > { %7396 = vmatpush3.bf16.msra.mxu1 %v10930_v29  ;;  %7411 = vmatprep.mubr.msk.bf16.mxu1 %vm8344_vm8, %v8343_v36 }
 0x8cc   : > { %7397 = vmatprep.subr.bf16.mxu1 %v8343_v36  ;;  %7368 = vmatpush3.bf16.msra.mxu0 %v8210_v8 }
 0x8cd   : > { %7369 = vmatprep.subr.bf16.mxu0 %v8343_v36  ;;  %7377 = vmatprep.mubr.msk.bf16.mxu0 %vm8344_vm8, %v8343_v36 }
 0x8cf   : > { %7398 = vmatpush3.bf16.msra.mxu1 %v10940_v46 }
 0x8d0   : > { %7399 = vmatprep.subr.bf16.mxu1 %v8343_v36  ;;  %7370 = vmatpush3.bf16.msra.mxu0 %v8211_v62 }
 0x8d1   : > { %7371 = vmatprep.subr.bf16.mxu0 %v8343_v36 }
 0x8d3   : > { %7400 = vmatpush3.bf16.msra.mxu1 %v10950_v34 }
 0x8d4   : > { %7401 = vmatprep.subr.bf16.mxu1 %v8343_v36  ;;  %7372 = vmatpush3.bf16.msra.mxu0 %v8212_v63 }
 0x8d5   : > { %7373 = vmatprep.subr.bf16.mxu0 %v8343_v36 }
 0x8d7   : > { %7402 = vmatpush3.bf16.msra.mxu1 %v10960_v13 }
 0x8d8   : > { %7403 = vmatprep.subr.bf16.mxu1 %v8343_v36  ;;  %7374 = vmatpush3.bf16.msra.mxu0 %v8213_v59 }
 0x8d9   : > { %7375 = vmatprep.subr.bf16.mxu0 %v8343_v36 }
 0x8db   : > { %7404 = vmatpush3.bf16.msra.mxu1 %v10970_v38 }
 0x8dc   : > { %7405 = vmatprep.subr.bf16.mxu1 %v8343_v36  ;;  %7376 = vmatpush3.bf16.msra.mxu0 %v8214_v49 }
 0x8dd   : > { %7381 = vmatprep.subr.bf16.mxu0 %v8343_v36 }
 0x8df   : > { %7406 = vmatpush3.bf16.msra.mxu1 %v10980_v32 }
 0x8e0   : > { %7407 = vmatprep.subr.bf16.mxu1 %v8343_v36 }
 0x8e3   : > { %7408 = vmatpush3.bf16.msra.mxu1 %v10994_v61 }
 0x8e4   : > { %7409 = vmatprep.subr.bf16.mxu1 %v8343_v36 }
 0x8e7   : > { %7410 = vmatpush3.bf16.msra.mxu1 %v10996_v6 }
 0x8e8   : > { %7429 = vmatprep.subr.bf16.mxu1 %v8343_v36 }
 0x8ea   : > { %7412 = vmatmul.mubr.bf16.vlgmr.msra.gmra.mrb[228].mxu1 %v7098_v5  ;;  %v8235_v5 = vld [vmem:[%s11317_s11] sm:$0xff]  }
 0x8eb   : > { %7430 = vmatpush3.bf16.msra.mxu1 %v10930_v29  ;;  %7445 = vmatprep.mubr.msk.bf16.mxu1 %vm8344_vm8, %v8343_v36 }
 0x8ec   : > { %7431 = vmatprep.subr.bf16.mxu1 %v8343_v36 }
 0x8ef   : > { %7432 = vmatpush3.bf16.msra.mxu1 %v10940_v46 }
 0x8f0   : > { %7433 = vmatprep.subr.bf16.mxu1 %v8343_v36 }
 0x8f3   : > { %7434 = vmatpush3.bf16.msra.mxu1 %v10950_v34 }
 0x8f4   : > { %7435 = vmatprep.subr.bf16.mxu1 %v8343_v36 }
 0x8f7   : > { %7436 = vmatpush3.bf16.msra.mxu1 %v10960_v13 }
 0x8f8   : > { %7437 = vmatprep.subr.bf16.mxu1 %v8343_v36 }
 0x8fb   : > { %7438 = vmatpush3.bf16.msra.mxu1 %v10970_v38 }
 0x8fc   : > { %7439 = vmatprep.subr.bf16.mxu1 %v8343_v36 }
 0x8ff   : > { %7440 = vmatpush3.bf16.msra.mxu1 %v10980_v32 }
 0x900   : > { %7441 = vmatprep.subr.bf16.mxu1 %v8343_v36 }
 0x903   : > { %7442 = vmatpush3.bf16.msra.mxu1 %v10994_v61 }
 0x904   : > { %7443 = vmatprep.subr.bf16.mxu1 %v8343_v36 }
 0x907   : > { %7444 = vmatpush3.bf16.msra.mxu1 %v10996_v6 }
 0x908   : > { %7483 = vmatprep.subr.bf16.mxu1 %v8343_v36 }
 0x90a   : > { %7446 = vmatmul.mubr.bf16.vlgmr.msra.gmra.mrb[232].mxu1 %v7115_v52 }
 0x90b   : > { %7493 = vmatprep.mubr.msk.bf16.mxu1 %vm8344_vm8, %v8343_v36 }
 0x99d   : > { %v5715_v11 = vpop.f32.mrb[224].mxu1  ;;  %v5662_v0 = vpop.f32.mrb[96].mxu0 }
 0x99e   : > { %v5732_v43 = vpack.c.bf16 %v5715_v11, %v5715_v11  ;;  %v7365_v58 = vpop.f32.mrb[225].mxu1  ;;  %v7345_v33 = vpop.f32.mrb[97].mxu0  ;;  %v5678_v54 = vpack.c.bf16 %v5662_v0, %v5662_v0 }
 0x99f   : > { %v5718_v16 = vpop.f32.mrb[226].mxu1  ;;  %v5665_v45 = vpop.f32.mrb[98].mxu0  ;;  %v8237_v58 = vld [vmem:[%s11317_s11 + $0x10] sm:$0xff]   ;;  %v8238_v33 = vld [vmem:[%s11317_s11 + $0x18] sm:$0xff]  }
 0x9a0   : > { %7378 = vmatmul.mubr.msk.bf16.vlgmr.msra.gmra.mrb[100].mxu0 %vm5763_vm9, %v5732_v43  ;;  %v7366_v37 = vpop.f32.mrb[227].mxu1  ;;  %v7346_v18 = vpop.f32.mrb[99].mxu0  ;;  %v8236_v43 = vld [vmem:[%s11317_s11 + $0x8] sm:$0xff]   ;;  %v8239_v16 = vld [vmem:[%s11317_s11 + $0x20] sm:$0xff]  }
 0x9a1   : > { %7382 = vmatpush3.bf16.msra.mxu0 %v8215_v12  ;;  %7391 = vmatprep.mubr.msk.bf16.mxu0 %vm8344_vm8, %v8343_v36  ;;  %v8240_v45 = vld [vmem:[%s11317_s11 + $0x28] sm:$0xff]   ;;  %v8241_v37 = vld [vmem:[%s11317_s11 + $0x30] sm:$0xff]   ;;  %v8242_v18 = vld [vmem:[%s11317_s11 + $0x38] ss:$0 sps:$4 sm:$0xff]  }
 0x9a2   : > { %7383 = vmatprep.subr.bf16.mxu0 %v8343_v36 }
 0x9a5   : > { %7384 = vmatpush3.bf16.msra.mxu0 %v8216_v26  ;;  %v6347_v26 = vsel %vm6345_vm10, %v8242_v18, 0 }
 0x9a6   : > { %7385 = vmatprep.subr.bf16.mxu0 %v8343_v36 }
 0x9a9   : > { %7386 = vmatpush3.bf16.msra.mxu0 %v8217_v1  ;;  %v8243_v1 = vld [vmem:[%s11319_s13] sm:$0xff]  }
 0x9aa   : > { %7387 = vmatprep.subr.bf16.mxu0 %v8343_v36 }
 0x9ad   : > { %7388 = vmatpush3.bf16.msra.mxu0 %v8218_v20  ;;  %v8244_v20 = vld [vmem:[%s11319_s13 + $0x8] sm:$0xff]  }
 0x9ae   : > { %7389 = vmatprep.subr.bf16.mxu0 %v8343_v36 }
 0x9b1   : > { %7390 = vmatpush3.bf16.msra.mxu0 %v8219_v50  ;;  %v8245_v50 = vld [vmem:[%s11319_s13 + $0x10] sm:$0xff]  }
 0x9b2   : > { %7415 = vmatprep.subr.bf16.mxu0 %v8343_v36 }
 0x9b4   : > { %7392 = vmatmul.mubr.msk.bf16.vlgmr.msra.gmra.mrb[104].mxu0 %vm5763_vm9, %v5678_v54  ;;  %v8246_v54 = vld [vmem:[%s11319_s13 + $0x18] sm:$0xff]  }
 0x9b5   : > { %7416 = vmatpush3.bf16.msra.mxu0 %v8220_v25  ;;  %7425 = vmatprep.mubr.msk.bf16.mxu0 %vm8344_vm8, %v8343_v36 }
 0x9b6   : > { %7417 = vmatprep.subr.bf16.mxu0 %v8343_v36 }
 0x9b9   : > { %7418 = vmatpush3.bf16.msra.mxu0 %v8221_v53  ;;  %v7149_v53 = vld [vmem:[%s11316_s10] ss:$0 sm:$0xff] }
 0x9ba   : > { %7419 = vmatprep.subr.bf16.mxu0 %v8343_v36 }
 0x9bd   : > { %7420 = vmatpush3.bf16.msra.mxu0 %v8222_v21  ;;  %v5916_v41 = vpop.f32.mrb[228].mxu1 }
 0x9be   : > { %7421 = vmatprep.subr.bf16.mxu0 %v8343_v36  ;;  %v7413_v4 = vpop.f32.mrb[229].mxu1  ;;  %v5933_v35 = vpack.c.bf16 %v5916_v41, %v5916_v41 }
 0x9bf   : > { %v5919_v17 = vpop.f32.mrb[230].mxu1 }
 0x9c0   : > { %v7414_v22 = vpop.f32.mrb[231].mxu1 }
 0x9c1   : > { %7422 = vmatpush3.bf16.msra.mxu0 %v8223_v39 }
 0x9c2   : > { %7423 = vmatprep.subr.bf16.mxu0 %v8343_v36 }
 0x9c5   : > { %7424 = vmatpush3.bf16.msra.mxu0 %v8224_v23 }
 0x9c6   : > { %7449 = vmatprep.subr.bf16.mxu0 %v8343_v36 }
 0x9c8   : > { %7426 = vmatmul.mubr.msk.bf16.vlgmr.msra.gmra.mrb[108].mxu0 %vm5763_vm9, %v5933_v35  ;;  %v8248_v35 = vld [vmem:[%s11319_s13 + $0x28] ss:$0 sps:$4 sm:$0x33]  }
 0x9c9   : > { %7450 = vmatpush3.bf16.msra.mxu0 %v8225_v48  ;;  %7459 = vmatprep.mubr.msk.bf16.mxu0 %vm8344_vm8, %v8343_v36  ;;  %v8247_v48 = vld [vmem:[%s11319_s13 + $0x20] sm:$0xff]  }
 0x9ca   : > { %7451 = vmatprep.subr.bf16.mxu0 %v8343_v36 }
 0x9cd   : > { %7452 = vmatpush3.bf16.msra.mxu0 %v8226_v27  ;;  %v6446_v27 = vsel %vm3856_vm6, %v8248_v35, 0 }
 0x9ce   : > { %7453 = vmatprep.subr.bf16.mxu0 %v8343_v36 }
 0x9d1   : > { %7454 = vmatpush3.bf16.msra.mxu0 %v8227_v30  ;;  %v7150_v30 = vld [vmem:[%s11318_s12] ss:$0 sm:$0xff] }
 0x9d2   : > { %7455 = vmatprep.subr.bf16.mxu0 %v8343_v36 }
 0x9d5   : > { %7456 = vmatpush3.bf16.msra.mxu0 %v8228_v40 }
 0x9d6   : > { %7457 = vmatprep.subr.bf16.mxu0 %v8343_v36 }
 0x9d9   : > { %7458 = vmatpush3.bf16.msra.mxu0 %v8229_v51 }
 0x9da   : > { %7463 = vmatprep.subr.bf16.mxu0 %v8343_v36 }
 0x9dd   : > { %v6044_v9 = vpop.f32.mrb[232].mxu1 }
 0x9de   : > { %v6061_v60 = vpack.c.bf16 %v6044_v9, %v6044_v9  ;;  %v7447_v3 = vpop.f32.mrb[233].mxu1 }
 0x9df   : > { %v6047_v10 = vpop.f32.mrb[234].mxu1 }
 0x9e0   : > { %7460 = vmatmul.mubr.msk.bf16.vlgmr.msra.gmra.mrb[112].mxu0 %vm5763_vm9, %v6061_v60  ;;  %v7448_v28 = vpop.f32.mrb[235].mxu1 }
 0x9e1   : > { %7464 = vmatpush3.bf16.msra.mxu0 %v10930_v29  ;;  %7479 = vmatprep.mubr.msk.bf16.mxu0 %vm8344_vm8, %v8343_v36  ;;  %v7132_v29 = vld [vmem:[%s11314_s8 + $0x10] sm:$0xf] }
 0x9e2   : > { %7465 = vmatprep.subr.bf16.mxu0 %v8343_v36 }
 0x9e5   : > { %7466 = vmatpush3.bf16.msra.mxu0 %v10940_v46  ;;  %v8230_v46 = vld [vmem:[%s11315_s9 + $0xa0] sm:$0xff]  }
 0x9e6   : > { %7467 = vmatprep.subr.bf16.mxu0 %v8343_v36  ;;  %7484 = vmatpush3.bf16.msra.mxu1 %v8230_v46 }
 0x9e7   : > { %7485 = vmatprep.subr.bf16.mxu1 %v8343_v36 }
 0x9e9   : > { %7468 = vmatpush3.bf16.msra.mxu0 %v10950_v34  ;;  %v8231_v34 = vld [vmem:[%s11315_s9 + $0xa8] sm:$0xff]  }
 0x9ea   : > { %7469 = vmatprep.subr.bf16.mxu0 %v8343_v36  ;;  %7486 = vmatpush3.bf16.msra.mxu1 %v8231_v34 }
 0x9eb   : > { %7487 = vmatprep.subr.bf16.mxu1 %v8343_v36 }
 0x9ed   : > { %7470 = vmatpush3.bf16.msra.mxu0 %v10960_v13  ;;  %v8232_v13 = vld [vmem:[%s11315_s9 + $0xb0] sm:$0xff]  }
 0x9ee   : > { %7471 = vmatprep.subr.bf16.mxu0 %v8343_v36  ;;  %7488 = vmatpush3.bf16.msra.mxu1 %v8232_v13 }
 0x9ef   : > { %7489 = vmatprep.subr.bf16.mxu1 %v8343_v36 }
 0x9f1   : > { %7472 = vmatpush3.bf16.msra.mxu0 %v10970_v38  ;;  %v8233_v38 = vld [vmem:[%s11315_s9 + $0xb8] sm:$0xff]  }
 0x9f2   : > { %7473 = vmatprep.subr.bf16.mxu0 %v8343_v36  ;;  %7490 = vmatpush3.bf16.msra.mxu1 %v8233_v38 }
 0x9f3   : > { %7491 = vmatprep.subr.bf16.mxu1 %v8343_v36 }
 0x9f5   : > { %7474 = vmatpush3.bf16.msra.mxu0 %v10980_v32  ;;  %v8234_v32 = vld [vmem:[%s11315_s9 + $0xc0] sm:$0xff]  }
 0x9f6   : > { %7475 = vmatprep.subr.bf16.mxu0 %v8343_v36  ;;  %7492 = vmatpush3.bf16.msra.mxu1 %v8234_v32 }
 0x9f7   : > { %7497 = vmatprep.subr.bf16.mxu1 %v8343_v36 }
 0x9f9   : > { %7476 = vmatpush3.bf16.msra.mxu0 %v10994_v61 }
 0x9fa   : > { %7477 = vmatprep.subr.bf16.mxu0 %v8343_v36 }
 0x9fd   : > { %7478 = vmatpush3.bf16.msra.mxu0 %v10996_v6 }
 0x9fe   : > { %7517 = vmatprep.subr.bf16.mxu0 %v8343_v36 }
 0xa00   : > { %7480 = vmatmul.mubr.bf16.vlgmr.msra.gmra.mrb[116].mxu0 %v7132_v29 }
 0xa01   : > { %7529 = vmatprep.mubr.msk.bf16.mxu0 %vm8344_vm8, %v8343_v36  ;;  %7518 = vmatpush3.bf16.msra.mxu0 %v8243_v1 }
 0xa02   : > { %7519 = vmatprep.subr.bf16.mxu0 %v8343_v36 }
 0xa05   : > { %7520 = vmatpush3.bf16.msra.mxu0 %v8244_v20 }
 0xa06   : > { %7521 = vmatprep.subr.bf16.mxu0 %v8343_v36 }
 0xa09   : > { %7522 = vmatpush3.bf16.msra.mxu0 %v8245_v50 }
 0xa0a   : > { %7523 = vmatprep.subr.bf16.mxu0 %v8343_v36 }
 0xa0d   : > { %7524 = vmatpush3.bf16.msra.mxu0 %v8246_v54 }
 0xa0e   : > { %7525 = vmatprep.subr.bf16.mxu0 %v8343_v36 }
 0xa11   : > { %7526 = vmatpush3.bf16.msra.mxu0 %v8247_v48 }
 0xa12   : > { %7527 = vmatprep.subr.bf16.mxu0 %v8343_v36 }
 0xa15   : > { %7528 = vmatpush3.bf16.msra.mxu0 %v6446_v27 }
 0xa73   : > { %v5801_v2 = vpop.f32.mrb[100].mxu0 }
 0xa74   : > { %v7379_v56 = vpop.f32.mrb[101].mxu0 }
 0xa75   : > { %v5804_v19 = vpop.f32.mrb[102].mxu0 }
 0xa76   : > { %v7380_v15 = vpop.f32.mrb[103].mxu0 }
 0xa87   : > { %v5874_v44 = vpop.f32.mrb[104].mxu0 }
 0xa88   : > { %v5875_v42 = vadd.f32 %v5874_v44, %v5801_v2  ;;  %v7393_v47 = vpop.f32.mrb[105].mxu0 }
 0xa89   : > { %v5877_v57 = vpop.f32.mrb[106].mxu0 }
 0xa8a   : > { %v7394_v55 = vpop.f32.mrb[107].mxu0 }
 0xa9b   : > { %v6001_v61 = vpop.f32.mrb[108].mxu0 }
 0xa9c   : > { %v6007_v31 = vadd.f32 %v6001_v61, %v5875_v42  ;;  %v7427_v24 = vpop.f32.mrb[109].mxu0 }
 0xa9d   : > { %v6004_v6 = vpop.f32.mrb[110].mxu0 }
 0xa9e   : > { %v7428_v14 = vpop.f32.mrb[111].mxu0 }
 0xab3   : > { %v6129_v7 = vpop.f32.mrb[112].mxu0 }
 0xab4   : > { %v6135_v8 = vadd.f32 %v6129_v7, %v6007_v31  ;;  %v7461_v62 = vpop.f32.mrb[113].mxu0 }
 0xab5   : > { %v6132_v63 = vpop.f32.mrb[114].mxu0 }
 0xab6   : > { %v7462_v59 = vpop.f32.mrb[115].mxu0 }
 0xad3   : > { %v6172_v49 = vpop.f32.mrb[116].mxu0 }
 0xad4   : > { %v6189_v52 = vpack.c.bf16 %v6172_v49, %v6172_v49  ;;  %v7481_v11 = vpop.f32.mrb[117].mxu0 }
 0xad5   : > { %v6175_v12 = vpop.f32.mrb[118].mxu0 }
 0xad6   : > { %7494 = vmatmul.mubr.msk.bf16.vlgmr.msra.gmra.mrb[236].mxu1 %vm5763_vm9, %v6189_v52  ;;  %v7482_v0 = vpop.f32.mrb[119].mxu0 }
 0xad7   : > { %7498 = vmatpush3.bf16.msra.mxu1 %v8235_v5  ;;  %7513 = vmatprep.mubr.msk.bf16.mxu1 %vm8344_vm8, %v8343_v36 }
 0xad8   : > { %7499 = vmatprep.subr.bf16.mxu1 %v8343_v36 }
 0xadb   : > { %7500 = vmatpush3.bf16.msra.mxu1 %v8236_v43 }
 0xadc   : > { %7501 = vmatprep.subr.bf16.mxu1 %v8343_v36 }
 0xadf   : > { %7502 = vmatpush3.bf16.msra.mxu1 %v8237_v58 }
 0xae0   : > { %7503 = vmatprep.subr.bf16.mxu1 %v8343_v36 }
 0xae3   : > { %7504 = vmatpush3.bf16.msra.mxu1 %v8238_v33 }
 0xae4   : > { %7505 = vmatprep.subr.bf16.mxu1 %v8343_v36 }
 0xae7   : > { %7506 = vmatpush3.bf16.msra.mxu1 %v8239_v16 }
 0xae8   : > { %7507 = vmatprep.subr.bf16.mxu1 %v8343_v36 }
 0xaeb   : > { %7508 = vmatpush3.bf16.msra.mxu1 %v8240_v45 }
 0xaec   : > { %7509 = vmatprep.subr.bf16.mxu1 %v8343_v36 }
 0xaef   : > { %7510 = vmatpush3.bf16.msra.mxu1 %v8241_v37 }
 0xaf0   : > { %7511 = vmatprep.subr.bf16.mxu1 %v8343_v36  ;;  %v7160_v36 = vld [vmem:[%s11320_s14] ss:$0 sm:$0xff] }
 0xaf3   : > { %7512 = vmatpush3.bf16.msra.mxu1 %v6347_v26 }
 0xba9   : > { %v6257_v25 = vpop.f32.mrb[236].mxu1 }
 0xbaa   : > { %v6263_v21 = vadd.f32 %v6257_v25, %v6135_v8  ;;  %v7495_v39 = vpop.f32.mrb[237].mxu1 }
 0xbab   : > { %v6260_v41 = vpop.f32.mrb[238].mxu1 }
 0xbac   : > { %v6271_v4 = vadd.f32 %v7149_v53, %v6263_v21  ;;  %v7496_v17 = vpop.f32.mrb[239].mxu1 }
 0xbae   : > { %v6272_v22 = vmax.f32 %v6271_v4, 0.0 }
 0xbb0   : > { %v6288_v23 = vpack.c.bf16 %v6272_v22, %v6272_v22 }
 0xbb2   : > { %7514 = vmatmul.mubr.msk.bf16.vlgmr.msra.gmra.mrb[240].mxu1 %vm6341_vm11, %v6288_v23 }
 0xc85   : > { %v6383_v40 = vpop.f32.mrb[240].mxu1 }
 0xc86   : > { %v6384_v51 = vadd.f32 %v7150_v30, %v6383_v40  ;;  %v7515_v9 = vpop.f32.mrb[241].mxu1 }
 0xc87   : > { %v6386_v60 = vpop.f32.mrb[242].mxu1 }
 0xc88   : > { %v6389_v3 = vmax.f32 %v6384_v51, 0.0  ;;  %v7516_v10 = vpop.f32.mrb[243].mxu1 }
 0xc8a   : > { %v6401_v28 = vpack.c.bf16 %v6389_v3, %v6389_v3 }
 0xc8c   : > { %7530 = vmatmul.mubr.msk.bf16.vlgmr.msra.gmra.mrb[120].mxu0 %vm3831_vm7, %v6401_v28 }
 0xd5f   : > { %v6482_v29 = vpop.f32.mrb[120].mxu0 }
 0xd60   : > { %v6483_v46 = vadd.f32 %v7160_v36, %v6482_v29  ;;  %v7531_v34 = vpop.f32.mrb[121].mxu0 }
 0xd61   : > { %v6485_v13 = vpop.f32.mrb[122].mxu0 }
 0xd62   : > { %v7532_v38 = vpop.f32.mrb[123].mxu0  ;;  %6489 = vst.msk [vmem:[%s488_s29] sm:$0xff] %vm6488_vm12, %v6483_v46 }
 0xd63   : > { %8291 = shalt.err (!%p8288_p3)
}
 0xd64   : > { %s8292_s16 = scalar_lea.hbm %s11264_s26, 128  ;;  %s8296_s25 = scalar_lea.hbm %s11321_s15, 256 }
 0xd65   : > { %p8293_p4 = scmp.ne.s32.totalorder %s11264_s26, %s8292_s16  ;;  %p8297_p9 = scmp.lt.u32.totalorder %s11264_s26, %s11321_s15 }
 0xd66   : > { %p8298_p10 = scmp.lt.u32.totalorder %s8296_s25, %s8292_s16  ;;  %p8300_p12 = scmp.lt.u32.totalorder %s8292_s16, %s11264_s26 }
 0xd67   : > { %p8294_p7 = pnand %p8293_p4, %p8464_p5 }
 0xd68   : > { %p8299_p11 = por %p8298_p10, %p8297_p9 }
 0xd69   : > { %p8295_p8 = pneg %p8294_p7 }
 0xd6a   : > { %p8301_p13 = por %p8300_p12, %p8299_p11 }
 0xd6c   : > { %p8302_p0 = pnand %p8301_p13, %p8295_p8 }
 0xd6e   : > { %8305 = shalt.err (!%p8302_p0)
}
 0xd6f   : > { %7917 = dma.vmem_to_hbm [thread:$0]  (%p8464_p5), %s11266_s20, 128, %s11264_s26, %s6491_s22  }
 0xd70 PF: > { %s11411_s30 = sld [smem:[#allocation5_spill]]  ;;  %p7923_p1 = scmp.ge.s32.totalorder %s8340_s21, 2 }
 0xd72   : > { %p7920_p2 = pnand %p7923_p1, %p8468_p6 }
 0xd76   : > { %s6516_s23 = sand.u32 1, %s11411_s30  }
 0xd77   : > { %s6517_s24 = scalar_lea.sflag [#allocation3], %s6516_s23 }
 0xd78   : > { %8323 = dma.done.wait (!%p7920_p2), %s6517_s24, 128  }
 0xd79   : > { %8325 = vsyncadd (!%p7920_p2), %s6517_s24, 4294967168  ;;  %s11413_s21 = sld [smem:[#allocation7_spill]]  ;;  %s11414_s16 = sld [smem:[#allocation6_spill]] }
 0xd7a   : > { %s11415_s20 = sld [smem:[#allocation8_spill]]  ;;  %s11416_s18 = smov %s8332_s19 }
 0xd7f   : > { %p25_p3 = scmp.ge.s32.totalorder %s11413_s21, 4   ;;  %s11417_s19 = smov %s11414_s16 }
 0xd81   :  { %27 = sbr.rel (!%p25_p3) target bundleno = 3 (0x3), region = 133 }
 0xd88   :  { %6522 = vsyncpa [#allocation3], 1 }
 0xd89   :  { %6524 = vsyncpa [#allocation3 + $0x1], 1 }

</bundles_post_ra>
